<compile_context>
chip_gen: v7x
topology: tpu7x:2x2x1
jax: 0.10.0
libtpu: 0.0.40
codegen_flags: <defaults>
</compile_context>

<pallas_src>
import jax
import jax.numpy as jnp
from jax.experimental import pallas as pl
from jax.experimental.pallas import tpu as pltpu

NEG_SLOPE = 0.01  # F.leaky_relu default negative_slope


# ------------- wrapper-side weight preprocessing (tiny, constant-folded under jit) -------------
def _banded_conv_matrix(w, w_in, w_out):
    """w: (Cout, Cin, K, K) -> banded (Cin*K*w_in, Cout*w_out) matrix.

    Row r = (c*K + ki)*w_in + iw ; col = o*w_out + wo ;
    value = w[o, c, ki, iw - wo] if 0 <= iw - wo < K else 0.
    So  (Ho, Cin*K*w_in) @ banded  ==  valid conv, output cols = (o, wo).
    """
    cout, cin, K, _ = w.shape
    iw = jnp.arange(w_in)[:, None]
    wo = jnp.arange(w_out)[None, :]
    kj = iw - wo                                    # (w_in, w_out)
    valid = (kj >= 0) & (kj < K)
    kj_c = jnp.clip(kj, 0, K - 1)
    wt = w.transpose(1, 2, 0, 3)                    # (Cin, K, Cout, K)
    band = wt[:, :, :, kj_c]                        # (Cin, K, Cout, w_in, w_out)
    band = jnp.where(valid[None, None, None], band, 0.0)
    band = band.transpose(0, 1, 3, 2, 4)            # (Cin, K, w_in, Cout, w_out)
    return band.reshape(cin * K * w_in, cout * w_out)


def _pool_col_sel(c, w):
    """(2, c*w, c*(w//2)) 0/1 matrices selecting even / odd wo inside each channel block."""
    wp = w // 2
    src = jnp.arange(c * w)[:, None]
    dst = jnp.arange(c * wp)[None, :]
    o, j = dst // wp, dst % wp
    a = (src == o * w + 2 * j).astype(jnp.float32)
    b = (src == o * w + 2 * j + 1).astype(jnp.float32)
    return jnp.stack([a, b])


def _pool_row_sel(h):
    """(2, h//2, h) 0/1 matrices selecting even / odd rows."""
    hp = h // 2
    dst = jnp.arange(hp)[:, None]
    src = jnp.arange(h)[None, :]
    a = (src == 2 * dst).astype(jnp.float32)
    b = (src == 2 * dst + 1).astype(jnp.float32)
    return jnp.stack([a, b])


def _pad2(a, rows, cols, dtype=None):
    dtype = a.dtype if dtype is None else dtype
    out = jnp.zeros((rows, cols), dtype)
    return out.at[: a.shape[0], : a.shape[1]].set(a.astype(dtype))


# ------------- fully fused kernel: conv1+pool -> conv2+pool -> 4-layer MLP -------------
def _convnet_kernel(x_ref, w1_ref, b1_ref, sc1_ref, sr1_ref,
                    w2_ref, b2_ref, sc2_ref, sr2_ref,
                    w5_ref, b5_ref, w6_ref, b6_ref,
                    w7_ref, b7_ref, w8_ref, b8_ref,
                    o_ref, x1s, p1s, x2s):
    # ---- conv1: assemble row-unfolded input (28, 3*5*32=480) via ref windows ----
    for c in range(3):
        for ki in range(5):
            idx = c * 5 + ki
            x1s[:, idx * 32:(idx + 1) * 32] = x_ref[0, c, ki:ki + 28, :]
    y1 = jnp.dot(x1s[...].astype(jnp.bfloat16), w1_ref[...],
                 preferred_element_type=jnp.float32) + b1_ref[...]     # (28, 6*28=168)
    y1 = jnp.where(y1 >= 0, y1, NEG_SLOPE * y1)

    # ---- maxpool 2x2: max of even/odd selection matmuls (cols then rows) ----
    cm = jnp.maximum(
        jnp.dot(y1, sc1_ref[0], preferred_element_type=jnp.float32),
        jnp.dot(y1, sc1_ref[1], preferred_element_type=jnp.float32))   # (28, 6*14=84)
    p1s[...] = jnp.maximum(
        jnp.dot(sr1_ref[0], cm, preferred_element_type=jnp.float32),
        jnp.dot(sr1_ref[1], cm, preferred_element_type=jnp.float32))   # (14, 84)

    # ---- conv2: row-unfold pooled features (10, 6*5*14=420) ----
    for c in range(6):
        for ki in range(5):
            idx = c * 5 + ki
            x2s[:, idx * 14:(idx + 1) * 14] = p1s[ki:ki + 10, c * 14:(c + 1) * 14]
    y2 = jnp.dot(x2s[...].astype(jnp.bfloat16), w2_ref[...],
                 preferred_element_type=jnp.float32) + b2_ref[...]     # (10, 16*10=160)
    y2 = jnp.where(y2 >= 0, y2, NEG_SLOPE * y2)

    # ---- maxpool 2x2 again -> (5, 80) features, layout [h, c*5 + w] ----
    cm2 = jnp.maximum(
        jnp.dot(y2, sc2_ref[0], preferred_element_type=jnp.float32),
        jnp.dot(y2, sc2_ref[1], preferred_element_type=jnp.float32))   # (10, 16*5=80)
    feat = jnp.maximum(
        jnp.dot(sr2_ref[0], cm2, preferred_element_type=jnp.float32),
        jnp.dot(sr2_ref[1], cm2, preferred_element_type=jnp.float32))  # (5, 80)

    # ---- fused MLP head (all widths zero-padded to 128 lanes; padded lanes stay 0) ----
    # L5: contraction over flat index h*80 + (c*5 + w); rows of w5 grouped per h.
    h = b5_ref[...]                                                    # (1, 128)
    for r in range(5):
        h = h + jnp.dot(feat[r:r + 1, :].astype(jnp.bfloat16),
                        w5_ref[r * 80:(r + 1) * 80, :],
                        preferred_element_type=jnp.float32)
    h = jnp.maximum(h, 0.0)
    h = jnp.maximum(jnp.dot(h.astype(jnp.bfloat16), w6_ref[...],
                            preferred_element_type=jnp.float32) + b6_ref[...], 0.0)
    h = jnp.maximum(jnp.dot(h.astype(jnp.bfloat16), w7_ref[...],
                            preferred_element_type=jnp.float32) + b7_ref[...], 0.0)
    o_ref[0] = jnp.dot(h.astype(jnp.bfloat16), w8_ref[...],
                       preferred_element_type=jnp.float32) + b8_ref[...]   # (1, 128)


def convnet_forward(img, params):
    """img: (B, 3, 32, 32) NCHW -> (B, 10) logits, matching convNET.forward."""
    (w1, b1), (w2, b2) = params["conv1"], params["conv2"]
    (w5, b5), (w6, b6), (w7, b7), (w8, b8) = params["fc"]
    B = img.shape[0]

    # Conv trunk constants.
    w1m = _banded_conv_matrix(w1, 32, 28).astype(jnp.bfloat16)          # (480, 168)
    b1e = jnp.repeat(b1, 28).reshape(1, 6 * 28).astype(jnp.float32)
    sc1 = _pool_col_sel(6, 28)                                          # (2, 168, 84)
    sr1 = _pool_row_sel(28)                                             # (2, 14, 28)
    w2m = _banded_conv_matrix(w2, 14, 10).astype(jnp.bfloat16)          # (420, 160)
    b2e = jnp.repeat(b2, 10).reshape(1, 16 * 10).astype(jnp.float32)
    sc2 = _pool_col_sel(16, 10)                                         # (2, 160, 80)
    sr2 = _pool_row_sel(10)                                             # (2, 5, 10)

    # MLP constants: permute L5 rows from torch's (c*25 + h*5 + w) order to (h*80 + c*5 + w).
    w5p = w5.reshape(120, 16, 5, 5).transpose(2, 1, 3, 0).reshape(400, 120)
    w5m = _pad2(w5p, 400, 128, jnp.bfloat16)
    b5e = _pad2(b5.reshape(1, -1), 1, 128, jnp.float32)
    w6m = _pad2(w6.T, 128, 128, jnp.bfloat16)
    b6e = _pad2(b6.reshape(1, -1), 1, 128, jnp.float32)
    w7m = _pad2(w7.T, 128, 128, jnp.bfloat16)
    b7e = _pad2(b7.reshape(1, -1), 1, 128, jnp.float32)
    w8m = _pad2(w8.T, 128, 128, jnp.bfloat16)
    b8e = _pad2(b8.reshape(1, -1), 1, 128, jnp.float32)

    def whole(shape):
        return pl.BlockSpec(shape, lambda i, _s=shape: (0,) * len(_s))

    out = pl.pallas_call(
        _convnet_kernel,
        out_shape=jax.ShapeDtypeStruct((B, 1, 128), jnp.float32),
        grid=(B,),
        in_specs=[
            pl.BlockSpec((1, 3, 32, 32), lambda i: (i, 0, 0, 0)),
            whole((480, 168)), whole((1, 168)),
            whole((2, 168, 84)), whole((2, 14, 28)),
            whole((420, 160)), whole((1, 160)),
            whole((2, 160, 80)), whole((2, 5, 10)),
            whole((400, 128)), whole((1, 128)),
            whole((128, 128)), whole((1, 128)),
            whole((128, 128)), whole((1, 128)),
            whole((128, 128)), whole((1, 128)),
        ],
        out_specs=pl.BlockSpec((1, 1, 128), lambda i: (i, 0, 0)),
        scratch_shapes=[
            pltpu.VMEM((28, 480), jnp.float32),   # conv1 row-unfolded input
            pltpu.VMEM((14, 84), jnp.float32),    # pooled conv1 features
            pltpu.VMEM((10, 420), jnp.float32),   # conv2 row-unfolded input
        ],
        compiler_params=pltpu.CompilerParams(
            dimension_semantics=("parallel",)),
    )(img, w1m, b1e, sc1, sr1, w2m, b2e, sc2, sr2,
      w5m, b5e, w6m, b6e, w7m, b7e, w8m, b8e)
    return out[:, 0, :10]


# ------------- pure-JAX reference (for a loose numerical sanity check) -------------
def _reference_forward(img, params):
    (w1, b1), (w2, b2) = params["conv1"], params["conv2"]
    (w5, b5), (w6, b6), (w7, b7), (w8, b8) = params["fc"]

    def conv(x, w, b):
        y = jax.lax.conv_general_dilated(
            x, w, (1, 1), "VALID", dimension_numbers=("NCHW", "OIHW", "NCHW"))
        return y + b[None, :, None, None]

    def lrelu(x):
        return jnp.where(x >= 0, x, NEG_SLOPE * x)

    def pool(x):
        return jax.lax.reduce_window(x, -jnp.inf, jax.lax.max,
                                     (1, 1, 2, 2), (1, 1, 2, 2), "VALID")

    h = pool(lrelu(conv(img, w1, b1)))
    h = pool(lrelu(conv(h, w2, b2)))
    h = h.reshape(h.shape[0], -1)
    h = jnp.maximum(h @ w5.T + b5, 0.0)
    h = jnp.maximum(h @ w6.T + b6, 0.0)
    h = jnp.maximum(h @ w7.T + b7, 0.0)
    return h @ w8.T + b8


def init_params(key):
    ks = jax.random.split(key, 12)

    def w(k, shape, scale):
        return jax.random.normal(k, shape, jnp.float32) * scale

    return {
        "conv1": (w(ks[0], (6, 3, 5, 5), 0.10), w(ks[1], (6,), 0.10)),
        "conv2": (w(ks[2], (16, 6, 5, 5), 0.10), w(ks[3], (16,), 0.10)),
        "fc": (
            (w(ks[4], (120, 400), 0.05), w(ks[5], (120,), 0.05)),
            (w(ks[6], (100, 120), 0.05), w(ks[7], (100,), 0.05)),
            (w(ks[8], (84, 100), 0.05), w(ks[9], (84,), 0.05)),
            (w(ks[10], (10, 84), 0.05), w(ks[11], (10,), 0.05)),
        ),
    }


if __name__ == "__main__":
    key = jax.random.PRNGKey(0)
    pkey, xkey = jax.random.split(key)
    params = init_params(pkey)
    # 32x32 spatial is implied by the 400-wide flatten (16 * 5 * 5).
    img = jax.random.normal(xkey, (2, 3, 32, 32), jnp.float32)

    fwd = jax.jit(lambda x: convnet_forward(x, params))
    out = fwd(img)
    jax.block_until_ready(out)
    assert out.shape == (2, 10) and out.dtype == jnp.float32

    ref = jax.jit(lambda x: _reference_forward(x, params))(img)
    jax.block_until_ready(ref)
    # bf16 MXU inputs -> loose tolerance; still catches any layout/permutation bug.
    assert jnp.allclose(out, ref, rtol=1e-1, atol=1e-1)
    print("KERNEL_OK")
</pallas_src>

<mosaic_0001>
module attributes {stable_mosaic.version = 11 : i64} {
  func.func @_convnet_kernel(%arg0: i32, %arg1: memref<1x3x32x32xf32, #tpu.memory_space<vmem>>, %arg2: memref<480x168xbf16, #tpu.memory_space<vmem>>, %arg3: memref<1x168xf32, #tpu.memory_space<vmem>>, %arg4: memref<2x168x84xf32, #tpu.memory_space<vmem>>, %arg5: memref<2x14x28xf32, #tpu.memory_space<vmem>>, %arg6: memref<420x160xbf16, #tpu.memory_space<vmem>>, %arg7: memref<1x160xf32, #tpu.memory_space<vmem>>, %arg8: memref<2x160x80xf32, #tpu.memory_space<vmem>>, %arg9: memref<2x5x10xf32, #tpu.memory_space<vmem>>, %arg10: memref<400x128xbf16, #tpu.memory_space<vmem>>, %arg11: memref<1x128xf32, #tpu.memory_space<vmem>>, %arg12: memref<128x128xbf16, #tpu.memory_space<vmem>>, %arg13: memref<1x128xf32, #tpu.memory_space<vmem>>, %arg14: memref<128x128xbf16, #tpu.memory_space<vmem>>, %arg15: memref<1x128xf32, #tpu.memory_space<vmem>>, %arg16: memref<128x128xbf16, #tpu.memory_space<vmem>>, %arg17: memref<1x128xf32, #tpu.memory_space<vmem>>, %arg18: memref<1x1x128xf32, #tpu.memory_space<vmem>>, %arg19: memref<28x480xf32, #tpu.memory_space<vmem>>, %arg20: memref<14x84xf32, #tpu.memory_space<vmem>>, %arg21: memref<10x420xf32, #tpu.memory_space<vmem>>) attributes {dimension_semantics = [#tpu.dimension_semantics<parallel>], iteration_bounds = array<i64: 2>, scalar_prefetch = 0 : i64, scratch_operands = 3 : i64, tpu.core_type = #tpu.core_type<tc>, window_params = [{transform_indices = @transform_0, window_bounds = array<i64: 1, 3, 32, 32>}, {pipeline_mode = #tpu.pipeline_mode<synchronous>, transform_indices = @transform_1, window_bounds = array<i64: 480, 168>}, {pipeline_mode = #tpu.pipeline_mode<synchronous>, transform_indices = @transform_2, window_bounds = array<i64: 1, 168>}, {pipeline_mode = #tpu.pipeline_mode<synchronous>, transform_indices = @transform_3, window_bounds = array<i64: 2, 168, 84>}, {pipeline_mode = #tpu.pipeline_mode<synchronous>, transform_indices = @transform_4, window_bounds = array<i64: 2, 14, 28>}, {pipeline_mode = #tpu.pipeline_mode<synchronous>, transform_indices = @transform_5, window_bounds = array<i64: 420, 160>}, {pipeline_mode = #tpu.pipeline_mode<synchronous>, transform_indices = @transform_6, window_bounds = array<i64: 1, 160>}, {pipeline_mode = #tpu.pipeline_mode<synchronous>, transform_indices = @transform_7, window_bounds = array<i64: 2, 160, 80>}, {pipeline_mode = #tpu.pipeline_mode<synchronous>, transform_indices = @transform_8, window_bounds = array<i64: 2, 5, 10>}, {pipeline_mode = #tpu.pipeline_mode<synchronous>, transform_indices = @transform_9, window_bounds = array<i64: 400, 128>}, {pipeline_mode = #tpu.pipeline_mode<synchronous>, transform_indices = @transform_10, window_bounds = array<i64: 1, 128>}, {pipeline_mode = #tpu.pipeline_mode<synchronous>, transform_indices = @transform_11, window_bounds = array<i64: 128, 128>}, {pipeline_mode = #tpu.pipeline_mode<synchronous>, transform_indices = @transform_12, window_bounds = array<i64: 1, 128>}, {pipeline_mode = #tpu.pipeline_mode<synchronous>, transform_indices = @transform_13, window_bounds = array<i64: 128, 128>}, {pipeline_mode = #tpu.pipeline_mode<synchronous>, transform_indices = @transform_14, window_bounds = array<i64: 1, 128>}, {pipeline_mode = #tpu.pipeline_mode<synchronous>, transform_indices = @transform_15, window_bounds = array<i64: 128, 128>}, {pipeline_mode = #tpu.pipeline_mode<synchronous>, transform_indices = @transform_16, window_bounds = array<i64: 1, 128>}, {transform_indices = @transform_17, window_bounds = array<i64: 1, 1, 128>}]} {
    %c0 = arith.constant 0 : index
    %c0_0 = arith.constant 0 : index
    %c0_1 = arith.constant 0 : index
    %c0_2 = arith.constant 0 : index
    %0 = vector.load %arg1[%c0, %c0_0, %c0_1, %c0_2] : memref<1x3x32x32xf32, #tpu.memory_space<vmem>>, vector<1x1x28x32xf32>
    %1 = vector.shape_cast %0 : vector<1x1x28x32xf32> to vector<28x32xf32>
    %c0_3 = arith.constant 0 : index
    %c0_4 = arith.constant 0 : index
    %2 = vector.load %arg19[%c0_3, %c0_4] : memref<28x480xf32, #tpu.memory_space<vmem>>, vector<28x32xf32>
    tpu.vector_store %arg19[%c0_3, %c0_4], %1 {strides = array<i32>} : memref<28x480xf32, #tpu.memory_space<vmem>>, vector<28x32xf32>,
    %c0_5 = arith.constant 0 : index
    %c0_6 = arith.constant 0 : index
    %c1 = arith.constant 1 : index
    %c0_7 = arith.constant 0 : index
    %3 = vector.load %arg1[%c0_5, %c0_6, %c1, %c0_7] : memref<1x3x32x32xf32, #tpu.memory_space<vmem>>, vector<1x1x28x32xf32>
    %4 = vector.shape_cast %3 : vector<1x1x28x32xf32> to vector<28x32xf32>
    %c0_8 = arith.constant 0 : index
    %c32 = arith.constant 32 : index
    %5 = vector.load %arg19[%c0_8, %c32] : memref<28x480xf32, #tpu.memory_space<vmem>>, vector<28x32xf32>
    tpu.vector_store %arg19[%c0_8, %c32], %4 {strides = array<i32>} : memref<28x480xf32, #tpu.memory_space<vmem>>, vector<28x32xf32>,
    %c0_9 = arith.constant 0 : index
    %c0_10 = arith.constant 0 : index
    %c2 = arith.constant 2 : index
    %c0_11 = arith.constant 0 : index
    %6 = vector.load %arg1[%c0_9, %c0_10, %c2, %c0_11] : memref<1x3x32x32xf32, #tpu.memory_space<vmem>>, vector<1x1x28x32xf32>
    %7 = vector.shape_cast %6 : vector<1x1x28x32xf32> to vector<28x32xf32>
    %c0_12 = arith.constant 0 : index
    %c64 = arith.constant 64 : index
    %8 = vector.load %arg19[%c0_12, %c64] : memref<28x480xf32, #tpu.memory_space<vmem>>, vector<28x32xf32>
    tpu.vector_store %arg19[%c0_12, %c64], %7 {strides = array<i32>} : memref<28x480xf32, #tpu.memory_space<vmem>>, vector<28x32xf32>,
    %c0_13 = arith.constant 0 : index
    %c0_14 = arith.constant 0 : index
    %c3 = arith.constant 3 : index
    %c0_15 = arith.constant 0 : index
    %9 = vector.load %arg1[%c0_13, %c0_14, %c3, %c0_15] : memref<1x3x32x32xf32, #tpu.memory_space<vmem>>, vector<1x1x28x32xf32>
    %10 = vector.shape_cast %9 : vector<1x1x28x32xf32> to vector<28x32xf32>
    %c0_16 = arith.constant 0 : index
    %c96 = arith.constant 96 : index
    %11 = vector.load %arg19[%c0_16, %c96] : memref<28x480xf32, #tpu.memory_space<vmem>>, vector<28x32xf32>
    tpu.vector_store %arg19[%c0_16, %c96], %10 {strides = array<i32>} : memref<28x480xf32, #tpu.memory_space<vmem>>, vector<28x32xf32>,
    %c0_17 = arith.constant 0 : index
    %c0_18 = arith.constant 0 : index
    %c4 = arith.constant 4 : index
    %c0_19 = arith.constant 0 : index
    %12 = vector.load %arg1[%c0_17, %c0_18, %c4, %c0_19] : memref<1x3x32x32xf32, #tpu.memory_space<vmem>>, vector<1x1x28x32xf32>
    %13 = vector.shape_cast %12 : vector<1x1x28x32xf32> to vector<28x32xf32>
    %c0_20 = arith.constant 0 : index
    %c128 = arith.constant 128 : index
    %14 = vector.load %arg19[%c0_20, %c128] : memref<28x480xf32, #tpu.memory_space<vmem>>, vector<28x32xf32>
    tpu.vector_store %arg19[%c0_20, %c128], %13 {strides = array<i32>} : memref<28x480xf32, #tpu.memory_space<vmem>>, vector<28x32xf32>,
    %c0_21 = arith.constant 0 : index
    %c1_22 = arith.constant 1 : index
    %c0_23 = arith.constant 0 : index
    %c0_24 = arith.constant 0 : index
    %15 = vector.load %arg1[%c0_21, %c1_22, %c0_23, %c0_24] : memref<1x3x32x32xf32, #tpu.memory_space<vmem>>, vector<1x1x28x32xf32>
    %16 = vector.shape_cast %15 : vector<1x1x28x32xf32> to vector<28x32xf32>
    %c0_25 = arith.constant 0 : index
    %c160 = arith.constant 160 : index
    %17 = vector.load %arg19[%c0_25, %c160] : memref<28x480xf32, #tpu.memory_space<vmem>>, vector<28x32xf32>
    tpu.vector_store %arg19[%c0_25, %c160], %16 {strides = array<i32>} : memref<28x480xf32, #tpu.memory_space<vmem>>, vector<28x32xf32>,
    %c0_26 = arith.constant 0 : index
    %c1_27 = arith.constant 1 : index
    %c1_28 = arith.constant 1 : index
    %c0_29 = arith.constant 0 : index
    %18 = vector.load %arg1[%c0_26, %c1_27, %c1_28, %c0_29] : memref<1x3x32x32xf32, #tpu.memory_space<vmem>>, vector<1x1x28x32xf32>
    %19 = vector.shape_cast %18 : vector<1x1x28x32xf32> to vector<28x32xf32>
    %c0_30 = arith.constant 0 : index
    %c192 = arith.constant 192 : index
    %20 = vector.load %arg19[%c0_30, %c192] : memref<28x480xf32, #tpu.memory_space<vmem>>, vector<28x32xf32>
    tpu.vector_store %arg19[%c0_30, %c192], %19 {strides = array<i32>} : memref<28x480xf32, #tpu.memory_space<vmem>>, vector<28x32xf32>,
    %c0_31 = arith.constant 0 : index
    %c1_32 = arith.constant 1 : index
    %c2_33 = arith.constant 2 : index
    %c0_34 = arith.constant 0 : index
    %21 = vector.load %arg1[%c0_31, %c1_32, %c2_33, %c0_34] : memref<1x3x32x32xf32, #tpu.memory_space<vmem>>, vector<1x1x28x32xf32>
    %22 = vector.shape_cast %21 : vector<1x1x28x32xf32> to vector<28x32xf32>
    %c0_35 = arith.constant 0 : index
    %c224 = arith.constant 224 : index
    %23 = vector.load %arg19[%c0_35, %c224] : memref<28x480xf32, #tpu.memory_space<vmem>>, vector<28x32xf32>
    tpu.vector_store %arg19[%c0_35, %c224], %22 {strides = array<i32>} : memref<28x480xf32, #tpu.memory_space<vmem>>, vector<28x32xf32>,
    %c0_36 = arith.constant 0 : index
    %c1_37 = arith.constant 1 : index
    %c3_38 = arith.constant 3 : index
    %c0_39 = arith.constant 0 : index
    %24 = vector.load %arg1[%c0_36, %c1_37, %c3_38, %c0_39] : memref<1x3x32x32xf32, #tpu.memory_space<vmem>>, vector<1x1x28x32xf32>
    %25 = vector.shape_cast %24 : vector<1x1x28x32xf32> to vector<28x32xf32>
    %c0_40 = arith.constant 0 : index
    %c256 = arith.constant 256 : index
    %26 = vector.load %arg19[%c0_40, %c256] : memref<28x480xf32, #tpu.memory_space<vmem>>, vector<28x32xf32>
    tpu.vector_store %arg19[%c0_40, %c256], %25 {strides = array<i32>} : memref<28x480xf32, #tpu.memory_space<vmem>>, vector<28x32xf32>,
    %c0_41 = arith.constant 0 : index
    %c1_42 = arith.constant 1 : index
    %c4_43 = arith.constant 4 : index
    %c0_44 = arith.constant 0 : index
    %27 = vector.load %arg1[%c0_41, %c1_42, %c4_43, %c0_44] : memref<1x3x32x32xf32, #tpu.memory_space<vmem>>, vector<1x1x28x32xf32>
    %28 = vector.shape_cast %27 : vector<1x1x28x32xf32> to vector<28x32xf32>
    %c0_45 = arith.constant 0 : index
    %c288 = arith.constant 288 : index
    %29 = vector.load %arg19[%c0_45, %c288] : memref<28x480xf32, #tpu.memory_space<vmem>>, vector<28x32xf32>
    tpu.vector_store %arg19[%c0_45, %c288], %28 {strides = array<i32>} : memref<28x480xf32, #tpu.memory_space<vmem>>, vector<28x32xf32>,
    %c0_46 = arith.constant 0 : index
    %c2_47 = arith.constant 2 : index
    %c0_48 = arith.constant 0 : index
    %c0_49 = arith.constant 0 : index
    %30 = vector.load %arg1[%c0_46, %c2_47, %c0_48, %c0_49] : memref<1x3x32x32xf32, #tpu.memory_space<vmem>>, vector<1x1x28x32xf32>
    %31 = vector.shape_cast %30 : vector<1x1x28x32xf32> to vector<28x32xf32>
    %c0_50 = arith.constant 0 : index
    %c320 = arith.constant 320 : index
    %32 = vector.load %arg19[%c0_50, %c320] : memref<28x480xf32, #tpu.memory_space<vmem>>, vector<28x32xf32>
    tpu.vector_store %arg19[%c0_50, %c320], %31 {strides = array<i32>} : memref<28x480xf32, #tpu.memory_space<vmem>>, vector<28x32xf32>,
    %c0_51 = arith.constant 0 : index
    %c2_52 = arith.constant 2 : index
    %c1_53 = arith.constant 1 : index
    %c0_54 = arith.constant 0 : index
    %33 = vector.load %arg1[%c0_51, %c2_52, %c1_53, %c0_54] : memref<1x3x32x32xf32, #tpu.memory_space<vmem>>, vector<1x1x28x32xf32>
    %34 = vector.shape_cast %33 : vector<1x1x28x32xf32> to vector<28x32xf32>
    %c0_55 = arith.constant 0 : index
    %c352 = arith.constant 352 : index
    %35 = vector.load %arg19[%c0_55, %c352] : memref<28x480xf32, #tpu.memory_space<vmem>>, vector<28x32xf32>
    tpu.vector_store %arg19[%c0_55, %c352], %34 {strides = array<i32>} : memref<28x480xf32, #tpu.memory_space<vmem>>, vector<28x32xf32>,
    %c0_56 = arith.constant 0 : index
    %c2_57 = arith.constant 2 : index
    %c2_58 = arith.constant 2 : index
    %c0_59 = arith.constant 0 : index
    %36 = vector.load %arg1[%c0_56, %c2_57, %c2_58, %c0_59] : memref<1x3x32x32xf32, #tpu.memory_space<vmem>>, vector<1x1x28x32xf32>
    %37 = vector.shape_cast %36 : vector<1x1x28x32xf32> to vector<28x32xf32>
    %c0_60 = arith.constant 0 : index
    %c384 = arith.constant 384 : index
    %38 = vector.load %arg19[%c0_60, %c384] : memref<28x480xf32, #tpu.memory_space<vmem>>, vector<28x32xf32>
    tpu.vector_store %arg19[%c0_60, %c384], %37 {strides = array<i32>} : memref<28x480xf32, #tpu.memory_space<vmem>>, vector<28x32xf32>,
    %c0_61 = arith.constant 0 : index
    %c2_62 = arith.constant 2 : index
    %c3_63 = arith.constant 3 : index
    %c0_64 = arith.constant 0 : index
    %39 = vector.load %arg1[%c0_61, %c2_62, %c3_63, %c0_64] : memref<1x3x32x32xf32, #tpu.memory_space<vmem>>, vector<1x1x28x32xf32>
    %40 = vector.shape_cast %39 : vector<1x1x28x32xf32> to vector<28x32xf32>
    %c0_65 = arith.constant 0 : index
    %c416 = arith.constant 416 : index
    %41 = vector.load %arg19[%c0_65, %c416] : memref<28x480xf32, #tpu.memory_space<vmem>>, vector<28x32xf32>
    tpu.vector_store %arg19[%c0_65, %c416], %40 {strides = array<i32>} : memref<28x480xf32, #tpu.memory_space<vmem>>, vector<28x32xf32>,
    %c0_66 = arith.constant 0 : index
    %c2_67 = arith.constant 2 : index
    %c4_68 = arith.constant 4 : index
    %c0_69 = arith.constant 0 : index
    %42 = vector.load %arg1[%c0_66, %c2_67, %c4_68, %c0_69] : memref<1x3x32x32xf32, #tpu.memory_space<vmem>>, vector<1x1x28x32xf32>
    %43 = vector.shape_cast %42 : vector<1x1x28x32xf32> to vector<28x32xf32>
    %c0_70 = arith.constant 0 : index
    %c448 = arith.constant 448 : index
    %44 = vector.load %arg19[%c0_70, %c448] : memref<28x480xf32, #tpu.memory_space<vmem>>, vector<28x32xf32>
    tpu.vector_store %arg19[%c0_70, %c448], %43 {strides = array<i32>} : memref<28x480xf32, #tpu.memory_space<vmem>>, vector<28x32xf32>,
    %c0_71 = arith.constant 0 : index
    %c0_72 = arith.constant 0 : index
    %45 = vector.load %arg19[%c0_71, %c0_72] : memref<28x480xf32, #tpu.memory_space<vmem>>, vector<28x480xf32>
    %46 = arith.truncf %45 : vector<28x480xf32> to vector<28x480xbf16>
    %c0_73 = arith.constant 0 : index
    %c0_74 = arith.constant 0 : index
    %47 = vector.load %arg2[%c0_73, %c0_74] : memref<480x168xbf16, #tpu.memory_space<vmem>>, vector<480x168xbf16>
    %cst = arith.constant dense<0.000000e+00> : vector<28x168xf32>
    %48 = tpu.matmul %46, %47, %cst {dimension_numbers = #tpu.dot_dimension_numbers<[1], [0], [0], [1], [0, 0, 1, 1], [], []>} : vector<28x480xbf16>, vector<480x168xbf16>, vector<28x168xf32> -> vector<28x168xf32>
    %c0_75 = arith.constant 0 : index
    %c0_76 = arith.constant 0 : index
    %49 = vector.load %arg3[%c0_75, %c0_76] : memref<1x168xf32, #tpu.memory_space<vmem>>, vector<1x168xf32>
    %50 = vector.broadcast %49 : vector<1x168xf32> to vector<28x168xf32>
    %51 = arith.addf %48, %50 : vector<28x168xf32>
    %cst_77 = arith.constant 0.000000e+00 : f32
    %52 = vector.broadcast %cst_77 : f32 to vector<28x168xf32>
    %53 = arith.cmpf oge, %51, %52 : vector<28x168xf32>
    %cst_78 = arith.constant 0.00999999977 : f32
    %54 = vector.broadcast %cst_78 : f32 to vector<28x168xf32>
    %55 = arith.mulf %54, %51 : vector<28x168xf32>
    %56 = arith.select %53, %51, %55 : vector<28x168xi1>, vector<28x168xf32>
    %c0_79 = arith.constant 0 : index
    %c0_80 = arith.constant 0 : index
    %c0_81 = arith.constant 0 : index
    %57 = vector.load %arg4[%c0_79, %c0_80, %c0_81] : memref<2x168x84xf32, #tpu.memory_space<vmem>>, vector<1x168x84xf32>
    %58 = vector.shape_cast %57 : vector<1x168x84xf32> to vector<168x84xf32>
    %cst_82 = arith.constant dense<0.000000e+00> : vector<28x84xf32>
    %59 = tpu.matmul %56, %58, %cst_82 {dimension_numbers = #tpu.dot_dimension_numbers<[1], [0], [0], [1], [0, 0, 1, 1], [], []>} : vector<28x168xf32>, vector<168x84xf32>, vector<28x84xf32> -> vector<28x84xf32>
    %c1_83 = arith.constant 1 : index
    %c0_84 = arith.constant 0 : index
    %c0_85 = arith.constant 0 : index
    %60 = vector.load %arg4[%c1_83, %c0_84, %c0_85] : memref<2x168x84xf32, #tpu.memory_space<vmem>>, vector<1x168x84xf32>
    %61 = vector.shape_cast %60 : vector<1x168x84xf32> to vector<168x84xf32>
    %cst_86 = arith.constant dense<0.000000e+00> : vector<28x84xf32>
    %62 = tpu.matmul %56, %61, %cst_86 {dimension_numbers = #tpu.dot_dimension_numbers<[1], [0], [0], [1], [0, 0, 1, 1], [], []>} : vector<28x168xf32>, vector<168x84xf32>, vector<28x84xf32> -> vector<28x84xf32>
    %63 = arith.maximumf %59, %62 : vector<28x84xf32>
    %c0_87 = arith.constant 0 : index
    %c0_88 = arith.constant 0 : index
    %c0_89 = arith.constant 0 : index
    %64 = vector.load %arg5[%c0_87, %c0_88, %c0_89] : memref<2x14x28xf32, #tpu.memory_space<vmem>>, vector<1x14x28xf32>
    %65 = vector.shape_cast %64 : vector<1x14x28xf32> to vector<14x28xf32>
    %cst_90 = arith.constant dense<0.000000e+00> : vector<14x84xf32>
    %66 = tpu.matmul %65, %63, %cst_90 {dimension_numbers = #tpu.dot_dimension_numbers<[1], [0], [0], [1], [0, 0, 1, 1], [], []>} : vector<14x28xf32>, vector<28x84xf32>, vector<14x84xf32> -> vector<14x84xf32>
    %c1_91 = arith.constant 1 : index
    %c0_92 = arith.constant 0 : index
    %c0_93 = arith.constant 0 : index
    %67 = vector.load %arg5[%c1_91, %c0_92, %c0_93] : memref<2x14x28xf32, #tpu.memory_space<vmem>>, vector<1x14x28xf32>
    %68 = vector.shape_cast %67 : vector<1x14x28xf32> to vector<14x28xf32>
    %cst_94 = arith.constant dense<0.000000e+00> : vector<14x84xf32>
    %69 = tpu.matmul %68, %63, %cst_94 {dimension_numbers = #tpu.dot_dimension_numbers<[1], [0], [0], [1], [0, 0, 1, 1], [], []>} : vector<14x28xf32>, vector<28x84xf32>, vector<14x84xf32> -> vector<14x84xf32>
    %70 = arith.maximumf %66, %69 : vector<14x84xf32>
    %c0_95 = arith.constant 0 : index
    %c0_96 = arith.constant 0 : index
    %71 = vector.load %arg20[%c0_95, %c0_96] : memref<14x84xf32, #tpu.memory_space<vmem>>, vector<14x84xf32>
    tpu.vector_store %arg20[%c0_95, %c0_96], %70 {strides = array<i32>} : memref<14x84xf32, #tpu.memory_space<vmem>>, vector<14x84xf32>,
    %c0_97 = arith.constant 0 : index
    %c0_98 = arith.constant 0 : index
    %72 = vector.load %arg20[%c0_97, %c0_98] : memref<14x84xf32, #tpu.memory_space<vmem>>, vector<10x14xf32>
    %c0_99 = arith.constant 0 : index
    %c0_100 = arith.constant 0 : index
    %73 = vector.load %arg21[%c0_99, %c0_100] : memref<10x420xf32, #tpu.memory_space<vmem>>, vector<10x14xf32>
    tpu.vector_store %arg21[%c0_99, %c0_100], %72 {strides = array<i32>} : memref<10x420xf32, #tpu.memory_space<vmem>>, vector<10x14xf32>,
    %c1_101 = arith.constant 1 : index
    %c0_102 = arith.constant 0 : index
    %74 = vector.load %arg20[%c1_101, %c0_102] : memref<14x84xf32, #tpu.memory_space<vmem>>, vector<10x14xf32>
    %c0_103 = arith.constant 0 : index
    %c14 = arith.constant 14 : index
    %75 = vector.load %arg21[%c0_103, %c14] : memref<10x420xf32, #tpu.memory_space<vmem>>, vector<10x14xf32>
    tpu.vector_store %arg21[%c0_103, %c14], %74 {strides = array<i32>} : memref<10x420xf32, #tpu.memory_space<vmem>>, vector<10x14xf32>,
    %c2_104 = arith.constant 2 : index
    %c0_105 = arith.constant 0 : index
    %76 = vector.load %arg20[%c2_104, %c0_105] : memref<14x84xf32, #tpu.memory_space<vmem>>, vector<10x14xf32>
    %c0_106 = arith.constant 0 : index
    %c28 = arith.constant 28 : index
    %77 = vector.load %arg21[%c0_106, %c28] : memref<10x420xf32, #tpu.memory_space<vmem>>, vector<10x14xf32>
    tpu.vector_store %arg21[%c0_106, %c28], %76 {strides = array<i32>} : memref<10x420xf32, #tpu.memory_space<vmem>>, vector<10x14xf32>,
    %c3_107 = arith.constant 3 : index
    %c0_108 = arith.constant 0 : index
    %78 = vector.load %arg20[%c3_107, %c0_108] : memref<14x84xf32, #tpu.memory_space<vmem>>, vector<10x14xf32>
    %c0_109 = arith.constant 0 : index
    %c42 = arith.constant 42 : index
    %79 = vector.load %arg21[%c0_109, %c42] : memref<10x420xf32, #tpu.memory_space<vmem>>, vector<10x14xf32>
    tpu.vector_store %arg21[%c0_109, %c42], %78 {strides = array<i32>} : memref<10x420xf32, #tpu.memory_space<vmem>>, vector<10x14xf32>,
    %c4_110 = arith.constant 4 : index
    %c0_111 = arith.constant 0 : index
    %80 = vector.load %arg20[%c4_110, %c0_111] : memref<14x84xf32, #tpu.memory_space<vmem>>, vector<10x14xf32>
    %c0_112 = arith.constant 0 : index
    %c56 = arith.constant 56 : index
    %81 = vector.load %arg21[%c0_112, %c56] : memref<10x420xf32, #tpu.memory_space<vmem>>, vector<10x14xf32>
    tpu.vector_store %arg21[%c0_112, %c56], %80 {strides = array<i32>} : memref<10x420xf32, #tpu.memory_space<vmem>>, vector<10x14xf32>,
    %c0_113 = arith.constant 0 : index
    %c14_114 = arith.constant 14 : index
    %82 = vector.load %arg20[%c0_113, %c14_114] : memref<14x84xf32, #tpu.memory_space<vmem>>, vector<10x14xf32>
    %c0_115 = arith.constant 0 : index
    %c70 = arith.constant 70 : index
    %83 = vector.load %arg21[%c0_115, %c70] : memref<10x420xf32, #tpu.memory_space<vmem>>, vector<10x14xf32>
    tpu.vector_store %arg21[%c0_115, %c70], %82 {strides = array<i32>} : memref<10x420xf32, #tpu.memory_space<vmem>>, vector<10x14xf32>,
    %c1_116 = arith.constant 1 : index
    %c14_117 = arith.constant 14 : index
    %84 = vector.load %arg20[%c1_116, %c14_117] : memref<14x84xf32, #tpu.memory_space<vmem>>, vector<10x14xf32>
    %c0_118 = arith.constant 0 : index
    %c84 = arith.constant 84 : index
    %85 = vector.load %arg21[%c0_118, %c84] : memref<10x420xf32, #tpu.memory_space<vmem>>, vector<10x14xf32>
    tpu.vector_store %arg21[%c0_118, %c84], %84 {strides = array<i32>} : memref<10x420xf32, #tpu.memory_space<vmem>>, vector<10x14xf32>,
    %c2_119 = arith.constant 2 : index
    %c14_120 = arith.constant 14 : index
    %86 = vector.load %arg20[%c2_119, %c14_120] : memref<14x84xf32, #tpu.memory_space<vmem>>, vector<10x14xf32>
    %c0_121 = arith.constant 0 : index
    %c98 = arith.constant 98 : index
    %87 = vector.load %arg21[%c0_121, %c98] : memref<10x420xf32, #tpu.memory_space<vmem>>, vector<10x14xf32>
    tpu.vector_store %arg21[%c0_121, %c98], %86 {strides = array<i32>} : memref<10x420xf32, #tpu.memory_space<vmem>>, vector<10x14xf32>,
    %c3_122 = arith.constant 3 : index
    %c14_123 = arith.constant 14 : index
    %88 = vector.load %arg20[%c3_122, %c14_123] : memref<14x84xf32, #tpu.memory_space<vmem>>, vector<10x14xf32>
    %c0_124 = arith.constant 0 : index
    %c112 = arith.constant 112 : index
    %89 = vector.load %arg21[%c0_124, %c112] : memref<10x420xf32, #tpu.memory_space<vmem>>, vector<10x14xf32>
    tpu.vector_store %arg21[%c0_124, %c112], %88 {strides = array<i32>} : memref<10x420xf32, #tpu.memory_space<vmem>>, vector<10x14xf32>,
    %c4_125 = arith.constant 4 : index
    %c14_126 = arith.constant 14 : index
    %90 = vector.load %arg20[%c4_125, %c14_126] : memref<14x84xf32, #tpu.memory_space<vmem>>, vector<10x14xf32>
    %c0_127 = arith.constant 0 : index
    %c126 = arith.constant 126 : index
    %91 = vector.load %arg21[%c0_127, %c126] : memref<10x420xf32, #tpu.memory_space<vmem>>, vector<10x14xf32>
    tpu.vector_store %arg21[%c0_127, %c126], %90 {strides = array<i32>} : memref<10x420xf32, #tpu.memory_space<vmem>>, vector<10x14xf32>,
    %c0_128 = arith.constant 0 : index
    %c28_129 = arith.constant 28 : index
    %92 = vector.load %arg20[%c0_128, %c28_129] : memref<14x84xf32, #tpu.memory_space<vmem>>, vector<10x14xf32>
    %c0_130 = arith.constant 0 : index
    %c140 = arith.constant 140 : index
    %93 = vector.load %arg21[%c0_130, %c140] : memref<10x420xf32, #tpu.memory_space<vmem>>, vector<10x14xf32>
    tpu.vector_store %arg21[%c0_130, %c140], %92 {strides = array<i32>} : memref<10x420xf32, #tpu.memory_space<vmem>>, vector<10x14xf32>,
    %c1_131 = arith.constant 1 : index
    %c28_132 = arith.constant 28 : index
    %94 = vector.load %arg20[%c1_131, %c28_132] : memref<14x84xf32, #tpu.memory_space<vmem>>, vector<10x14xf32>
    %c0_133 = arith.constant 0 : index
    %c154 = arith.constant 154 : index
    %95 = vector.load %arg21[%c0_133, %c154] : memref<10x420xf32, #tpu.memory_space<vmem>>, vector<10x14xf32>
    tpu.vector_store %arg21[%c0_133, %c154], %94 {strides = array<i32>} : memref<10x420xf32, #tpu.memory_space<vmem>>, vector<10x14xf32>,
    %c2_134 = arith.constant 2 : index
    %c28_135 = arith.constant 28 : index
    %96 = vector.load %arg20[%c2_134, %c28_135] : memref<14x84xf32, #tpu.memory_space<vmem>>, vector<10x14xf32>
    %c0_136 = arith.constant 0 : index
    %c168 = arith.constant 168 : index
    %97 = vector.load %arg21[%c0_136, %c168] : memref<10x420xf32, #tpu.memory_space<vmem>>, vector<10x14xf32>
    tpu.vector_store %arg21[%c0_136, %c168], %96 {strides = array<i32>} : memref<10x420xf32, #tpu.memory_space<vmem>>, vector<10x14xf32>,
    %c3_137 = arith.constant 3 : index
    %c28_138 = arith.constant 28 : index
    %98 = vector.load %arg20[%c3_137, %c28_138] : memref<14x84xf32, #tpu.memory_space<vmem>>, vector<10x14xf32>
    %c0_139 = arith.constant 0 : index
    %c182 = arith.constant 182 : index
    %99 = vector.load %arg21[%c0_139, %c182] : memref<10x420xf32, #tpu.memory_space<vmem>>, vector<10x14xf32>
    tpu.vector_store %arg21[%c0_139, %c182], %98 {strides = array<i32>} : memref<10x420xf32, #tpu.memory_space<vmem>>, vector<10x14xf32>,
    %c4_140 = arith.constant 4 : index
    %c28_141 = arith.constant 28 : index
    %100 = vector.load %arg20[%c4_140, %c28_141] : memref<14x84xf32, #tpu.memory_space<vmem>>, vector<10x14xf32>
    %c0_142 = arith.constant 0 : index
    %c196 = arith.constant 196 : index
    %101 = vector.load %arg21[%c0_142, %c196] : memref<10x420xf32, #tpu.memory_space<vmem>>, vector<10x14xf32>
    tpu.vector_store %arg21[%c0_142, %c196], %100 {strides = array<i32>} : memref<10x420xf32, #tpu.memory_space<vmem>>, vector<10x14xf32>,
    %c0_143 = arith.constant 0 : index
    %c42_144 = arith.constant 42 : index
    %102 = vector.load %arg20[%c0_143, %c42_144] : memref<14x84xf32, #tpu.memory_space<vmem>>, vector<10x14xf32>
    %c0_145 = arith.constant 0 : index
    %c210 = arith.constant 210 : index
    %103 = vector.load %arg21[%c0_145, %c210] : memref<10x420xf32, #tpu.memory_space<vmem>>, vector<10x14xf32>
    tpu.vector_store %arg21[%c0_145, %c210], %102 {strides = array<i32>} : memref<10x420xf32, #tpu.memory_space<vmem>>, vector<10x14xf32>,
    %c1_146 = arith.constant 1 : index
    %c42_147 = arith.constant 42 : index
    %104 = vector.load %arg20[%c1_146, %c42_147] : memref<14x84xf32, #tpu.memory_space<vmem>>, vector<10x14xf32>
    %c0_148 = arith.constant 0 : index
    %c224_149 = arith.constant 224 : index
    %105 = vector.load %arg21[%c0_148, %c224_149] : memref<10x420xf32, #tpu.memory_space<vmem>>, vector<10x14xf32>
    tpu.vector_store %arg21[%c0_148, %c224_149], %104 {strides = array<i32>} : memref<10x420xf32, #tpu.memory_space<vmem>>, vector<10x14xf32>,
    %c2_150 = arith.constant 2 : index
    %c42_151 = arith.constant 42 : index
    %106 = vector.load %arg20[%c2_150, %c42_151] : memref<14x84xf32, #tpu.memory_space<vmem>>, vector<10x14xf32>
    %c0_152 = arith.constant 0 : index
    %c238 = arith.constant 238 : index
    %107 = vector.load %arg21[%c0_152, %c238] : memref<10x420xf32, #tpu.memory_space<vmem>>, vector<10x14xf32>
    tpu.vector_store %arg21[%c0_152, %c238], %106 {strides = array<i32>} : memref<10x420xf32, #tpu.memory_space<vmem>>, vector<10x14xf32>,
    %c3_153 = arith.constant 3 : index
    %c42_154 = arith.constant 42 : index
    %108 = vector.load %arg20[%c3_153, %c42_154] : memref<14x84xf32, #tpu.memory_space<vmem>>, vector<10x14xf32>
    %c0_155 = arith.constant 0 : index
    %c252 = arith.constant 252 : index
    %109 = vector.load %arg21[%c0_155, %c252] : memref<10x420xf32, #tpu.memory_space<vmem>>, vector<10x14xf32>
    tpu.vector_store %arg21[%c0_155, %c252], %108 {strides = array<i32>} : memref<10x420xf32, #tpu.memory_space<vmem>>, vector<10x14xf32>,
    %c4_156 = arith.constant 4 : index
    %c42_157 = arith.constant 42 : index
    %110 = vector.load %arg20[%c4_156, %c42_157] : memref<14x84xf32, #tpu.memory_space<vmem>>, vector<10x14xf32>
    %c0_158 = arith.constant 0 : index
    %c266 = arith.constant 266 : index
    %111 = vector.load %arg21[%c0_158, %c266] : memref<10x420xf32, #tpu.memory_space<vmem>>, vector<10x14xf32>
    tpu.vector_store %arg21[%c0_158, %c266], %110 {strides = array<i32>} : memref<10x420xf32, #tpu.memory_space<vmem>>, vector<10x14xf32>,
    %c0_159 = arith.constant 0 : index
    %c56_160 = arith.constant 56 : index
    %112 = vector.load %arg20[%c0_159, %c56_160] : memref<14x84xf32, #tpu.memory_space<vmem>>, vector<10x14xf32>
    %c0_161 = arith.constant 0 : index
    %c280 = arith.constant 280 : index
    %113 = vector.load %arg21[%c0_161, %c280] : memref<10x420xf32, #tpu.memory_space<vmem>>, vector<10x14xf32>
    tpu.vector_store %arg21[%c0_161, %c280], %112 {strides = array<i32>} : memref<10x420xf32, #tpu.memory_space<vmem>>, vector<10x14xf32>,
    %c1_162 = arith.constant 1 : index
    %c56_163 = arith.constant 56 : index
    %114 = vector.load %arg20[%c1_162, %c56_163] : memref<14x84xf32, #tpu.memory_space<vmem>>, vector<10x14xf32>
    %c0_164 = arith.constant 0 : index
    %c294 = arith.constant 294 : index
    %115 = vector.load %arg21[%c0_164, %c294] : memref<10x420xf32, #tpu.memory_space<vmem>>, vector<10x14xf32>
    tpu.vector_store %arg21[%c0_164, %c294], %114 {strides = array<i32>} : memref<10x420xf32, #tpu.memory_space<vmem>>, vector<10x14xf32>,
    %c2_165 = arith.constant 2 : index
    %c56_166 = arith.constant 56 : index
    %116 = vector.load %arg20[%c2_165, %c56_166] : memref<14x84xf32, #tpu.memory_space<vmem>>, vector<10x14xf32>
    %c0_167 = arith.constant 0 : index
    %c308 = arith.constant 308 : index
    %117 = vector.load %arg21[%c0_167, %c308] : memref<10x420xf32, #tpu.memory_space<vmem>>, vector<10x14xf32>
    tpu.vector_store %arg21[%c0_167, %c308], %116 {strides = array<i32>} : memref<10x420xf32, #tpu.memory_space<vmem>>, vector<10x14xf32>,
    %c3_168 = arith.constant 3 : index
    %c56_169 = arith.constant 56 : index
    %118 = vector.load %arg20[%c3_168, %c56_169] : memref<14x84xf32, #tpu.memory_space<vmem>>, vector<10x14xf32>
    %c0_170 = arith.constant 0 : index
    %c322 = arith.constant 322 : index
    %119 = vector.load %arg21[%c0_170, %c322] : memref<10x420xf32, #tpu.memory_space<vmem>>, vector<10x14xf32>
    tpu.vector_store %arg21[%c0_170, %c322], %118 {strides = array<i32>} : memref<10x420xf32, #tpu.memory_space<vmem>>, vector<10x14xf32>,
    %c4_171 = arith.constant 4 : index
    %c56_172 = arith.constant 56 : index
    %120 = vector.load %arg20[%c4_171, %c56_172] : memref<14x84xf32, #tpu.memory_space<vmem>>, vector<10x14xf32>
    %c0_173 = arith.constant 0 : index
    %c336 = arith.constant 336 : index
    %121 = vector.load %arg21[%c0_173, %c336] : memref<10x420xf32, #tpu.memory_space<vmem>>, vector<10x14xf32>
    tpu.vector_store %arg21[%c0_173, %c336], %120 {strides = array<i32>} : memref<10x420xf32, #tpu.memory_space<vmem>>, vector<10x14xf32>,
    %c0_174 = arith.constant 0 : index
    %c70_175 = arith.constant 70 : index
    %122 = vector.load %arg20[%c0_174, %c70_175] : memref<14x84xf32, #tpu.memory_space<vmem>>, vector<10x14xf32>
    %c0_176 = arith.constant 0 : index
    %c350 = arith.constant 350 : index
    %123 = vector.load %arg21[%c0_176, %c350] : memref<10x420xf32, #tpu.memory_space<vmem>>, vector<10x14xf32>
    tpu.vector_store %arg21[%c0_176, %c350], %122 {strides = array<i32>} : memref<10x420xf32, #tpu.memory_space<vmem>>, vector<10x14xf32>,
    %c1_177 = arith.constant 1 : index
    %c70_178 = arith.constant 70 : index
    %124 = vector.load %arg20[%c1_177, %c70_178] : memref<14x84xf32, #tpu.memory_space<vmem>>, vector<10x14xf32>
    %c0_179 = arith.constant 0 : index
    %c364 = arith.constant 364 : index
    %125 = vector.load %arg21[%c0_179, %c364] : memref<10x420xf32, #tpu.memory_space<vmem>>, vector<10x14xf32>
    tpu.vector_store %arg21[%c0_179, %c364], %124 {strides = array<i32>} : memref<10x420xf32, #tpu.memory_space<vmem>>, vector<10x14xf32>,
    %c2_180 = arith.constant 2 : index
    %c70_181 = arith.constant 70 : index
    %126 = vector.load %arg20[%c2_180, %c70_181] : memref<14x84xf32, #tpu.memory_space<vmem>>, vector<10x14xf32>
    %c0_182 = arith.constant 0 : index
    %c378 = arith.constant 378 : index
    %127 = vector.load %arg21[%c0_182, %c378] : memref<10x420xf32, #tpu.memory_space<vmem>>, vector<10x14xf32>
    tpu.vector_store %arg21[%c0_182, %c378], %126 {strides = array<i32>} : memref<10x420xf32, #tpu.memory_space<vmem>>, vector<10x14xf32>,
    %c3_183 = arith.constant 3 : index
    %c70_184 = arith.constant 70 : index
    %128 = vector.load %arg20[%c3_183, %c70_184] : memref<14x84xf32, #tpu.memory_space<vmem>>, vector<10x14xf32>
    %c0_185 = arith.constant 0 : index
    %c392 = arith.constant 392 : index
    %129 = vector.load %arg21[%c0_185, %c392] : memref<10x420xf32, #tpu.memory_space<vmem>>, vector<10x14xf32>
    tpu.vector_store %arg21[%c0_185, %c392], %128 {strides = array<i32>} : memref<10x420xf32, #tpu.memory_space<vmem>>, vector<10x14xf32>,
    %c4_186 = arith.constant 4 : index
    %c70_187 = arith.constant 70 : index
    %130 = vector.load %arg20[%c4_186, %c70_187] : memref<14x84xf32, #tpu.memory_space<vmem>>, vector<10x14xf32>
    %c0_188 = arith.constant 0 : index
    %c406 = arith.constant 406 : index
    %131 = vector.load %arg21[%c0_188, %c406] : memref<10x420xf32, #tpu.memory_space<vmem>>, vector<10x14xf32>
    tpu.vector_store %arg21[%c0_188, %c406], %130 {strides = array<i32>} : memref<10x420xf32, #tpu.memory_space<vmem>>, vector<10x14xf32>,
    %c0_189 = arith.constant 0 : index
    %c0_190 = arith.constant 0 : index
    %132 = vector.load %arg21[%c0_189, %c0_190] : memref<10x420xf32, #tpu.memory_space<vmem>>, vector<10x420xf32>
    %133 = arith.truncf %132 : vector<10x420xf32> to vector<10x420xbf16>
    %c0_191 = arith.constant 0 : index
    %c0_192 = arith.constant 0 : index
    %134 = vector.load %arg6[%c0_191, %c0_192] : memref<420x160xbf16, #tpu.memory_space<vmem>>, vector<420x160xbf16>
    %cst_193 = arith.constant dense<0.000000e+00> : vector<10x160xf32>
    %135 = tpu.matmul %133, %134, %cst_193 {dimension_numbers = #tpu.dot_dimension_numbers<[1], [0], [0], [1], [0, 0, 1, 1], [], []>} : vector<10x420xbf16>, vector<420x160xbf16>, vector<10x160xf32> -> vector<10x160xf32>
    %c0_194 = arith.constant 0 : index
    %c0_195 = arith.constant 0 : index
    %136 = vector.load %arg7[%c0_194, %c0_195] : memref<1x160xf32, #tpu.memory_space<vmem>>, vector<1x160xf32>
    %137 = vector.broadcast %136 : vector<1x160xf32> to vector<10x160xf32>
    %138 = arith.addf %135, %137 : vector<10x160xf32>
    %cst_196 = arith.constant 0.000000e+00 : f32
    %139 = vector.broadcast %cst_196 : f32 to vector<10x160xf32>
    %140 = arith.cmpf oge, %138, %139 : vector<10x160xf32>
    %cst_197 = arith.constant 0.00999999977 : f32
    %141 = vector.broadcast %cst_197 : f32 to vector<10x160xf32>
    %142 = arith.mulf %141, %138 : vector<10x160xf32>
    %143 = arith.select %140, %138, %142 : vector<10x160xi1>, vector<10x160xf32>
    %c0_198 = arith.constant 0 : index
    %c0_199 = arith.constant 0 : index
    %c0_200 = arith.constant 0 : index
    %144 = vector.load %arg8[%c0_198, %c0_199, %c0_200] : memref<2x160x80xf32, #tpu.memory_space<vmem>>, vector<1x160x80xf32>
    %145 = vector.shape_cast %144 : vector<1x160x80xf32> to vector<160x80xf32>
    %cst_201 = arith.constant dense<0.000000e+00> : vector<10x80xf32>
    %146 = tpu.matmul %143, %145, %cst_201 {dimension_numbers = #tpu.dot_dimension_numbers<[1], [0], [0], [1], [0, 0, 1, 1], [], []>} : vector<10x160xf32>, vector<160x80xf32>, vector<10x80xf32> -> vector<10x80xf32>
    %c1_202 = arith.constant 1 : index
    %c0_203 = arith.constant 0 : index
    %c0_204 = arith.constant 0 : index
    %147 = vector.load %arg8[%c1_202, %c0_203, %c0_204] : memref<2x160x80xf32, #tpu.memory_space<vmem>>, vector<1x160x80xf32>
    %148 = vector.shape_cast %147 : vector<1x160x80xf32> to vector<160x80xf32>
    %cst_205 = arith.constant dense<0.000000e+00> : vector<10x80xf32>
    %149 = tpu.matmul %143, %148, %cst_205 {dimension_numbers = #tpu.dot_dimension_numbers<[1], [0], [0], [1], [0, 0, 1, 1], [], []>} : vector<10x160xf32>, vector<160x80xf32>, vector<10x80xf32> -> vector<10x80xf32>
    %150 = arith.maximumf %146, %149 : vector<10x80xf32>
    %c0_206 = arith.constant 0 : index
    %c0_207 = arith.constant 0 : index
    %c0_208 = arith.constant 0 : index
    %151 = vector.load %arg9[%c0_206, %c0_207, %c0_208] : memref<2x5x10xf32, #tpu.memory_space<vmem>>, vector<1x5x10xf32>
    %152 = vector.shape_cast %151 : vector<1x5x10xf32> to vector<5x10xf32>
    %cst_209 = arith.constant dense<0.000000e+00> : vector<5x80xf32>
    %153 = tpu.matmul %152, %150, %cst_209 {dimension_numbers = #tpu.dot_dimension_numbers<[1], [0], [0], [1], [0, 0, 1, 1], [], []>} : vector<5x10xf32>, vector<10x80xf32>, vector<5x80xf32> -> vector<5x80xf32>
    %c1_210 = arith.constant 1 : index
    %c0_211 = arith.constant 0 : index
    %c0_212 = arith.constant 0 : index
    %154 = vector.load %arg9[%c1_210, %c0_211, %c0_212] : memref<2x5x10xf32, #tpu.memory_space<vmem>>, vector<1x5x10xf32>
    %155 = vector.shape_cast %154 : vector<1x5x10xf32> to vector<5x10xf32>
    %cst_213 = arith.constant dense<0.000000e+00> : vector<5x80xf32>
    %156 = tpu.matmul %155, %150, %cst_213 {dimension_numbers = #tpu.dot_dimension_numbers<[1], [0], [0], [1], [0, 0, 1, 1], [], []>} : vector<5x10xf32>, vector<10x80xf32>, vector<5x80xf32> -> vector<5x80xf32>
    %157 = arith.maximumf %153, %156 : vector<5x80xf32>
    %c0_214 = arith.constant 0 : index
    %c0_215 = arith.constant 0 : index
    %158 = vector.load %arg11[%c0_214, %c0_215] : memref<1x128xf32, #tpu.memory_space<vmem>>, vector<1x128xf32>
    %159 = vector.extract_strided_slice %157 {offsets = [0, 0], sizes = [1, 80], strides = [1, 1]} : vector<5x80xf32> to vector<1x80xf32>
    %160 = arith.truncf %159 : vector<1x80xf32> to vector<1x80xbf16>
    %c0_216 = arith.constant 0 : index
    %c0_217 = arith.constant 0 : index
    %161 = vector.load %arg10[%c0_216, %c0_217] : memref<400x128xbf16, #tpu.memory_space<vmem>>, vector<80x128xbf16>
    %cst_218 = arith.constant dense<0.000000e+00> : vector<1x128xf32>
    %162 = tpu.matmul %160, %161, %cst_218 {dimension_numbers = #tpu.dot_dimension_numbers<[1], [0], [0], [1], [0, 0, 1, 1], [], []>} : vector<1x80xbf16>, vector<80x128xbf16>, vector<1x128xf32> -> vector<1x128xf32>
    %163 = arith.addf %158, %162 : vector<1x128xf32>
    %164 = vector.extract_strided_slice %157 {offsets = [1, 0], sizes = [1, 80], strides = [1, 1]} : vector<5x80xf32> to vector<1x80xf32>
    %165 = arith.truncf %164 : vector<1x80xf32> to vector<1x80xbf16>
    %c80 = arith.constant 80 : index
    %c0_219 = arith.constant 0 : index
    %166 = vector.load %arg10[%c80, %c0_219] : memref<400x128xbf16, #tpu.memory_space<vmem>>, vector<80x128xbf16>
    %cst_220 = arith.constant dense<0.000000e+00> : vector<1x128xf32>
    %167 = tpu.matmul %165, %166, %cst_220 {dimension_numbers = #tpu.dot_dimension_numbers<[1], [0], [0], [1], [0, 0, 1, 1], [], []>} : vector<1x80xbf16>, vector<80x128xbf16>, vector<1x128xf32> -> vector<1x128xf32>
    %168 = arith.addf %163, %167 : vector<1x128xf32>
    %169 = vector.extract_strided_slice %157 {offsets = [2, 0], sizes = [1, 80], strides = [1, 1]} : vector<5x80xf32> to vector<1x80xf32>
    %170 = arith.truncf %169 : vector<1x80xf32> to vector<1x80xbf16>
    %c160_221 = arith.constant 160 : index
    %c0_222 = arith.constant 0 : index
    %171 = vector.load %arg10[%c160_221, %c0_222] : memref<400x128xbf16, #tpu.memory_space<vmem>>, vector<80x128xbf16>
    %cst_223 = arith.constant dense<0.000000e+00> : vector<1x128xf32>
    %172 = tpu.matmul %170, %171, %cst_223 {dimension_numbers = #tpu.dot_dimension_numbers<[1], [0], [0], [1], [0, 0, 1, 1], [], []>} : vector<1x80xbf16>, vector<80x128xbf16>, vector<1x128xf32> -> vector<1x128xf32>
    %173 = arith.addf %168, %172 : vector<1x128xf32>
    %174 = vector.extract_strided_slice %157 {offsets = [3, 0], sizes = [1, 80], strides = [1, 1]} : vector<5x80xf32> to vector<1x80xf32>
    %175 = arith.truncf %174 : vector<1x80xf32> to vector<1x80xbf16>
    %c240 = arith.constant 240 : index
    %c0_224 = arith.constant 0 : index
    %176 = vector.load %arg10[%c240, %c0_224] : memref<400x128xbf16, #tpu.memory_space<vmem>>, vector<80x128xbf16>
    %cst_225 = arith.constant dense<0.000000e+00> : vector<1x128xf32>
    %177 = tpu.matmul %175, %176, %cst_225 {dimension_numbers = #tpu.dot_dimension_numbers<[1], [0], [0], [1], [0, 0, 1, 1], [], []>} : vector<1x80xbf16>, vector<80x128xbf16>, vector<1x128xf32> -> vector<1x128xf32>
    %178 = arith.addf %173, %177 : vector<1x128xf32>
    %179 = vector.extract_strided_slice %157 {offsets = [4, 0], sizes = [1, 80], strides = [1, 1]} : vector<5x80xf32> to vector<1x80xf32>
    %180 = arith.truncf %179 : vector<1x80xf32> to vector<1x80xbf16>
    %c320_226 = arith.constant 320 : index
    %c0_227 = arith.constant 0 : index
    %181 = vector.load %arg10[%c320_226, %c0_227] : memref<400x128xbf16, #tpu.memory_space<vmem>>, vector<80x128xbf16>
    %cst_228 = arith.constant dense<0.000000e+00> : vector<1x128xf32>
    %182 = tpu.matmul %180, %181, %cst_228 {dimension_numbers = #tpu.dot_dimension_numbers<[1], [0], [0], [1], [0, 0, 1, 1], [], []>} : vector<1x80xbf16>, vector<80x128xbf16>, vector<1x128xf32> -> vector<1x128xf32>
    %183 = arith.addf %178, %182 : vector<1x128xf32>
    %cst_229 = arith.constant 0.000000e+00 : f32
    %184 = vector.broadcast %cst_229 : f32 to vector<1x128xf32>
    %185 = arith.maximumf %183, %184 : vector<1x128xf32>
    %186 = arith.truncf %185 : vector<1x128xf32> to vector<1x128xbf16>
    %c0_230 = arith.constant 0 : index
    %c0_231 = arith.constant 0 : index
    %187 = vector.load %arg12[%c0_230, %c0_231] : memref<128x128xbf16, #tpu.memory_space<vmem>>, vector<128x128xbf16>
    %cst_232 = arith.constant dense<0.000000e+00> : vector<1x128xf32>
    %188 = tpu.matmul %186, %187, %cst_232 {dimension_numbers = #tpu.dot_dimension_numbers<[1], [0], [0], [1], [0, 0, 1, 1], [], []>} : vector<1x128xbf16>, vector<128x128xbf16>, vector<1x128xf32> -> vector<1x128xf32>
    %c0_233 = arith.constant 0 : index
    %c0_234 = arith.constant 0 : index
    %189 = vector.load %arg13[%c0_233, %c0_234] : memref<1x128xf32, #tpu.memory_space<vmem>>, vector<1x128xf32>
    %190 = arith.addf %188, %189 : vector<1x128xf32>
    %cst_235 = arith.constant 0.000000e+00 : f32
    %191 = vector.broadcast %cst_235 : f32 to vector<1x128xf32>
    %192 = arith.maximumf %190, %191 : vector<1x128xf32>
    %193 = arith.truncf %192 : vector<1x128xf32> to vector<1x128xbf16>
    %c0_236 = arith.constant 0 : index
    %c0_237 = arith.constant 0 : index
    %194 = vector.load %arg14[%c0_236, %c0_237] : memref<128x128xbf16, #tpu.memory_space<vmem>>, vector<128x128xbf16>
    %cst_238 = arith.constant dense<0.000000e+00> : vector<1x128xf32>
    %195 = tpu.matmul %193, %194, %cst_238 {dimension_numbers = #tpu.dot_dimension_numbers<[1], [0], [0], [1], [0, 0, 1, 1], [], []>} : vector<1x128xbf16>, vector<128x128xbf16>, vector<1x128xf32> -> vector<1x128xf32>
    %c0_239 = arith.constant 0 : index
    %c0_240 = arith.constant 0 : index
    %196 = vector.load %arg15[%c0_239, %c0_240] : memref<1x128xf32, #tpu.memory_space<vmem>>, vector<1x128xf32>
    %197 = arith.addf %195, %196 : vector<1x128xf32>
    %cst_241 = arith.constant 0.000000e+00 : f32
    %198 = vector.broadcast %cst_241 : f32 to vector<1x128xf32>
    %199 = arith.maximumf %197, %198 : vector<1x128xf32>
    %200 = arith.truncf %199 : vector<1x128xf32> to vector<1x128xbf16>
    %c0_242 = arith.constant 0 : index
    %c0_243 = arith.constant 0 : index
    %201 = vector.load %arg16[%c0_242, %c0_243] : memref<128x128xbf16, #tpu.memory_space<vmem>>, vector<128x128xbf16>
    %cst_244 = arith.constant dense<0.000000e+00> : vector<1x128xf32>
    %202 = tpu.matmul %200, %201, %cst_244 {dimension_numbers = #tpu.dot_dimension_numbers<[1], [0], [0], [1], [0, 0, 1, 1], [], []>} : vector<1x128xbf16>, vector<128x128xbf16>, vector<1x128xf32> -> vector<1x128xf32>
    %c0_245 = arith.constant 0 : index
    %c0_246 = arith.constant 0 : index
    %203 = vector.load %arg17[%c0_245, %c0_246] : memref<1x128xf32, #tpu.memory_space<vmem>>, vector<1x128xf32>
    %204 = arith.addf %202, %203 : vector<1x128xf32>
    %c0_247 = arith.constant 0 : index
    %c0_248 = arith.constant 0 : index
    %c0_249 = arith.constant 0 : index
    %205 = vector.load %arg18[%c0_247, %c0_248, %c0_249] : memref<1x1x128xf32, #tpu.memory_space<vmem>>, vector<1x1x128xf32>
    %206 = vector.shape_cast %205 : vector<1x1x128xf32> to vector<1x128xf32>
    %207 = vector.shape_cast %204 : vector<1x128xf32> to vector<1x1x128xf32>
    tpu.vector_store %arg18[%c0_247, %c0_248, %c0_249], %207 {strides = array<i32>} : memref<1x1x128xf32, #tpu.memory_space<vmem>>, vector<1x1x128xf32>,
    return
  }
  func.func @transform_0(%arg0: i32) -> (i32, i32, i32, i32) {
    %c0_i32 = arith.constant 0 : i32
    %c0_i32_0 = arith.constant 0 : i32
    %c0_i32_1 = arith.constant 0 : i32
    %c0_i32_2 = arith.constant 0 : i32
    return %arg0, %c0_i32, %c0_i32_0, %c0_i32_1 : i32, i32, i32, i32
  }
  func.func @transform_1(%arg0: i32) -> (i32, i32) {
    %c0_i32 = arith.constant 0 : i32
    %c0_i32_0 = arith.constant 0 : i32
    %c0_i32_1 = arith.constant 0 : i32
    return %c0_i32, %c0_i32_0 : i32, i32
  }
  func.func @transform_2(%arg0: i32) -> (i32, i32) {
    %c0_i32 = arith.constant 0 : i32
    %c0_i32_0 = arith.constant 0 : i32
    %c0_i32_1 = arith.constant 0 : i32
    return %c0_i32, %c0_i32_0 : i32, i32
  }
  func.func @transform_3(%arg0: i32) -> (i32, i32, i32) {
    %c0_i32 = arith.constant 0 : i32
    %c0_i32_0 = arith.constant 0 : i32
    %c0_i32_1 = arith.constant 0 : i32
    %c0_i32_2 = arith.constant 0 : i32
    return %c0_i32, %c0_i32_0, %c0_i32_1 : i32, i32, i32
  }
  func.func @transform_4(%arg0: i32) -> (i32, i32, i32) {
    %c0_i32 = arith.constant 0 : i32
    %c0_i32_0 = arith.constant 0 : i32
    %c0_i32_1 = arith.constant 0 : i32
    %c0_i32_2 = arith.constant 0 : i32
    return %c0_i32, %c0_i32_0, %c0_i32_1 : i32, i32, i32
  }
  func.func @transform_5(%arg0: i32) -> (i32, i32) {
    %c0_i32 = arith.constant 0 : i32
    %c0_i32_0 = arith.constant 0 : i32
    %c0_i32_1 = arith.constant 0 : i32
    return %c0_i32, %c0_i32_0 : i32, i32
  }
  func.func @transform_6(%arg0: i32) -> (i32, i32) {
    %c0_i32 = arith.constant 0 : i32
    %c0_i32_0 = arith.constant 0 : i32
    %c0_i32_1 = arith.constant 0 : i32
    return %c0_i32, %c0_i32_0 : i32, i32
  }
  func.func @transform_7(%arg0: i32) -> (i32, i32, i32) {
    %c0_i32 = arith.constant 0 : i32
    %c0_i32_0 = arith.constant 0 : i32
    %c0_i32_1 = arith.constant 0 : i32
    %c0_i32_2 = arith.constant 0 : i32
    return %c0_i32, %c0_i32_0, %c0_i32_1 : i32, i32, i32
  }
  func.func @transform_8(%arg0: i32) -> (i32, i32, i32) {
    %c0_i32 = arith.constant 0 : i32
    %c0_i32_0 = arith.constant 0 : i32
    %c0_i32_1 = arith.constant 0 : i32
    %c0_i32_2 = arith.constant 0 : i32
    return %c0_i32, %c0_i32_0, %c0_i32_1 : i32, i32, i32
  }
  func.func @transform_9(%arg0: i32) -> (i32, i32) {
    %c0_i32 = arith.constant 0 : i32
    %c0_i32_0 = arith.constant 0 : i32
    %c0_i32_1 = arith.constant 0 : i32
    return %c0_i32, %c0_i32_0 : i32, i32
  }
  func.func @transform_10(%arg0: i32) -> (i32, i32) {
    %c0_i32 = arith.constant 0 : i32
    %c0_i32_0 = arith.constant 0 : i32
    %c0_i32_1 = arith.constant 0 : i32
    return %c0_i32, %c0_i32_0 : i32, i32
  }
  func.func @transform_11(%arg0: i32) -> (i32, i32) {
    %c0_i32 = arith.constant 0 : i32
    %c0_i32_0 = arith.constant 0 : i32
    %c0_i32_1 = arith.constant 0 : i32
    return %c0_i32, %c0_i32_0 : i32, i32
  }
  func.func @transform_12(%arg0: i32) -> (i32, i32) {
    %c0_i32 = arith.constant 0 : i32
    %c0_i32_0 = arith.constant 0 : i32
    %c0_i32_1 = arith.constant 0 : i32
    return %c0_i32, %c0_i32_0 : i32, i32
  }
  func.func @transform_13(%arg0: i32) -> (i32, i32) {
    %c0_i32 = arith.constant 0 : i32
    %c0_i32_0 = arith.constant 0 : i32
    %c0_i32_1 = arith.constant 0 : i32
    return %c0_i32, %c0_i32_0 : i32, i32
  }
  func.func @transform_14(%arg0: i32) -> (i32, i32) {
    %c0_i32 = arith.constant 0 : i32
    %c0_i32_0 = arith.constant 0 : i32
    %c0_i32_1 = arith.constant 0 : i32
    return %c0_i32, %c0_i32_0 : i32, i32
  }
  func.func @transform_15(%arg0: i32) -> (i32, i32) {
    %c0_i32 = arith.constant 0 : i32
    %c0_i32_0 = arith.constant 0 : i32
    %c0_i32_1 = arith.constant 0 : i32
    return %c0_i32, %c0_i32_0 : i32, i32
  }
  func.func @transform_16(%arg0: i32) -> (i32, i32) {
    %c0_i32 = arith.constant 0 : i32
    %c0_i32_0 = arith.constant 0 : i32
    %c0_i32_1 = arith.constant 0 : i32
    return %c0_i32, %c0_i32_0 : i32, i32
  }
  func.func @transform_17(%arg0: i32) -> (i32, i32, i32) {
    %c0_i32 = arith.constant 0 : i32
    %c0_i32_0 = arith.constant 0 : i32
    %c0_i32_1 = arith.constant 0 : i32
    return %arg0, %c0_i32, %c0_i32_0 : i32, i32, i32
  }
}

</mosaic_0001>

<bundles_post_ra>
// kernel: _lambda_.1
= control target key start
LH: loop header
LB: loop body
LE: loop exit
PB: predicated region body
PF: predicated region fallthrough
CT: control target
= control target key end

     0   :  { %s6290_s0 = inlined_call_operand.vmem [shape: f32[2,3,32,32], index: 0, kind: input, shape index: {}]   ;;  %s6291_s1 = inlined_call_operand.vmem [shape: bf16[480,168], index: 1, kind: input, shape index: {}]   ;;  %s6292_s2 = inlined_call_operand.vmem [shape: f32[1,168], index: 2, kind: input, shape index: {}]   ;;  %s6293_s3 = inlined_call_operand.vmem [shape: f32[2,168,84], index: 3, kind: input, shape index: {}]   ;;  %s6294_s4 = inlined_call_operand.vmem [shape: f32[2,14,28], index: 4, kind: input, shape index: {}]   ;;  %s6295_s5 = inlined_call_operand.vmem [shape: bf16[420,160], index: 5, kind: input, shape index: {}]   ;;  %s6296_s6 = inlined_call_operand.vmem [shape: f32[1,160], index: 6, kind: input, shape index: {}]   ;;  %s6297_s7 = inlined_call_operand.vmem [shape: f32[2,160,80], index: 7, kind: input, shape index: {}]   ;;  %s6298_s8 = inlined_call_operand.vmem [shape: f32[2,5,10], index: 8, kind: input, shape index: {}]   ;;  %s6299_s9 = inlined_call_operand.vmem [shape: bf16[400,128], index: 9, kind: input, shape index: {}]   ;;  %s6300_s10 = inlined_call_operand.vmem [shape: f32[1,128], index: 10, kind: input, shape index: {}]   ;;  %s6301_s11 = inlined_call_operand.vmem [shape: bf16[128,128], index: 11, kind: input, shape index: {}]   ;;  %s6302_s12 = inlined_call_operand.vmem [shape: f32[1,128], index: 12, kind: input, shape index: {}]   ;;  %s6303_s13 = inlined_call_operand.vmem [shape: bf16[128,128], index: 13, kind: input, shape index: {}]   ;;  %s6304_s14 = inlined_call_operand.vmem [shape: f32[1,128], index: 14, kind: input, shape index: {}]   ;;  %s6305_s15 = inlined_call_operand.vmem [shape: bf16[128,128], index: 15, kind: input, shape index: {}]   ;;  %s6306_s16 = inlined_call_operand.vmem [shape: f32[1,128], index: 16, kind: input, shape index: {}]   ;;  %s6307_s17 = inlined_call_operand.hbm [shape: f32[2,1,128], index: 17, kind: output, shape index: {}]  }
   0x1   :  { %6316 = sst [smem:[#allocation14_spill]] %s6290_s0 }
   0x2   :  { %6317 = sst [smem:[#allocation15_spill]] %s6291_s1 }
   0x3   :  { %6318 = sst [smem:[#allocation16_spill]] %s6307_s17 }
   0x4   :  { %22 = vsyncpa [#allocation6], 0 }
   0x5   :  { %24 = vsyncpa [#allocation6 + $0x1], 0  ;;  %s5030_s24 = smov 0   ;;  %s5032_s25 = smov 0  }
   0x6   :  { %s5034_s26 = smov 0   ;;  %s5036_s27 = smov 0  }
   0x7 LB: > { %6319 = sst [smem:[#allocation8_spill]] %s4895_s24  ;;  %s5051_s28 = sadd.s32 4294967295, %s4907_s27   ;;  %s4907_s27 = sphi %s5036_s27, %s6334_s27   ;;  %s4903_s26 = sphi %s5034_s26, %s6336_s26   ;;  %s4899_s25 = sphi %s5032_s25, %s6338_s25   ;;  %s4895_s24 = sphi %s5030_s24, %s6337_s24  }
   0x8   : > { %6320 = sst [smem:[#allocation9_spill]] %s4903_s26  ;;  %s3840_s29 = sadd.s32 4294967294, %s4907_s27  }
   0x9   : > { %6321 = sst [smem:[#allocation10_spill]] %s4907_s27  ;;  %s5055_s0 = sadd.s32 1, %s4907_s27  }
   0xa   : > { %6322 = sst [smem:[#allocation11_spill]] %s5055_s0  ;;  %s399_s30 = sadd.s32 1, %s4903_s26 }
   0xb   : > { %s396_s18 = ssub.s32 %s4907_s27, %s5055_s0  ;;  %p409_p0 = scmp.ne.s32.totalorder %s4903_s26, %s4899_s25 }
   0xc   : > { %p397_p1 = scmp.eq.s32.totalorder %s396_s18, 0  ;;  %p410_p2 = scmp.eq.s32.totalorder %s5051_s28, 1 }
   0xd   : > { %p415_p3 = scmp.ne.s32.totalorder %s4899_s25, %s4895_s24  ;;  %p416_p4 = scmp.eq.s32.totalorder %s3840_s29, 1 }
   0xe   : > { %s5066_s19 = scalar_select %p397_p1, %s4903_s26, %s399_s30  }
   0xf   : > { %p5068_p5 = por %p410_p2, %p409_p0  ;;  %p5072_p6 = por %p416_p4, %p415_p3 }
  0x10   : > { %6323 = sst [smem:[#allocation12_spill]] %s5066_s19  ;;  %p3843_p7 = scmp.ge.s32.totalorder %s4907_s27, 1 }
  0x11   : > { %s6325_s20 = scalar_select %p5072_p6, 1, 0 }
  0x12   : > { %p490_p8 = scmp.lt.s32.totalorder %s4907_s27, 3 }
  0x13   : > { %6326 = sst [smem:[#allocation13_spill]] %s6325_s20 }
  0x14   : > { %p491_p9 = pnand %p3843_p7, %p490_p8 }
  0x15   : > { %p541_p10 = scmp.lt.s32.totalorder (!%p491_p9), %s5051_s28, 1  ;;  %s6327_s23 = sld [smem:[#allocation15_spill]] (!%p491_p9)  ;;  %vm551_vm0 = vcmask (!%p491_p9), 261120   ;;  %vm555_vm1 = vcmask (!%p491_p9), 257024   ;;  %vm577_vm2 = vcmask (!%p491_p9), 523520   ;;  %vm603_vm3 = vcmask (!%p491_p9), 785920  }
  0x16   : > { %494 = sbr.rel (%p491_p9) target bundleno = 2864 (0xb30), region = 88  ;;  %s6328_s30 = sld [smem:[#allocation14_spill]] (!%p491_p9)  ;;  %vm629_vm4 = vcmask (!%p491_p9), 1048320   ;;  %vm581_vm5 = vcmask (!%p491_p9), 519424   ;;  %vm607_vm6 = vcmask (!%p491_p9), 781824   ;;  %vm633_vm7 = vcmask (!%p491_p9), 1044224  }
  0x17   : > { %s4909_s27 = smov (!%p491_p9), 32   ;;  %s4910_s26 = smov (!%p491_p9), 64   ;;  %vm1249_vm8 = vcmask (!%p491_p9), 785408   ;;  %vm1407_vm9 = vcmask (!%p491_p9), 326656  }
  0x18   : > { %s4915_s19 = smov (!%p491_p9), 112   ;;  %s4916_s20 = smov (!%p491_p9), 14  }
  0x19   : > { %s4917_s29 = smov (!%p491_p9), 126   ;;  %s4918_s21 = smov (!%p491_p9), 28  }
  0x1a   : > { %s4923_s22 = smov (!%p491_p9), 40   ;;  %s4924_s0 = smov (!%p491_p9), 70  }
  0x1b   : > { %v4626_v0 = vld [vmem:[%s6327_s23 + $0x4] ss:$8 sps:$4 sm:$0xff] (!%p491_p9)   ;;  %v4628_v1 = vld [vmem:[%s6327_s23] ss:$8 sps:$4 sm:$0xff] (!%p491_p9)   ;;  %v4629_v2 = vld [vmem:[%s6327_s23 + $0x14] ss:$8 sps:$4 sm:$0xff] (!%p491_p9)  }
  0x1c   : > { %1256 = vmatprep.subr.bf16.mxu0 (!%p491_p9), %v4626_v0  ;;  %v4631_v3 = vld [vmem:[%s6327_s23 + $0x10] ss:$8 sps:$4 sm:$0xff] (!%p491_p9)   ;;  %v4632_v4 = vld [vmem:[%s6327_s23 + $0x24] ss:$8 sps:$4 sm:$0xff] (!%p491_p9)   ;;  %v4634_v7 = vld [vmem:[%s6327_s23 + $0x20] ss:$8 sps:$4 sm:$0xff] (!%p491_p9)  }
  0x1d   : > { %s542_s18 = scalar_select %p541_p10, %s5051_s28, 1  ;;  %1257 = vmatpush1.bf16.msra.mxu0 %v4628_v1  ;;  %v4635_v10 = vld [vmem:[%s6327_s23 + $0x34] ss:$8 sps:$4 sm:$0xff]   ;;  %v4637_v11 = vld [vmem:[%s6327_s23 + $0x30] ss:$8 sps:$4 sm:$0xff]  }
  0x1e   : > { %1258 = vmatprep.subr.bf16.mxu0 %v4629_v2  ;;  %v4638_v14 = vld [vmem:[%s6327_s23 + $0x44] ss:$8 sps:$4 sm:$0xff]   ;;  %v4640_v15 = vld [vmem:[%s6327_s23 + $0x40] ss:$8 sps:$4 sm:$0xff]   ;;  %v4641_v21 = vld [vmem:[%s6327_s23 + $0x54] ss:$8 sps:$4 sm:$0xff]  }
  0x1f   : > { %s4556_s24 = smul.u32 96, %s542_s18  ;;  %v4643_v22 = vld [vmem:[%s6327_s23 + $0x50] ss:$8 sps:$4 sm:$0xff]   ;;  %s4911_s18 = smov 96   ;;  %v4644_v24 = vld [vmem:[%s6327_s23 + $0x64] ss:$8 sps:$4 sm:$0xff]  }
  0x20   : > { %v4646_v25 = vld [vmem:[%s6327_s23 + $0x60] ss:$8 sps:$4 sm:$0xff]   ;;  %v4647_v27 = vld [vmem:[%s6327_s23 + $0x74] ss:$8 sps:$4 sm:$0xff]   ;;  %v4649_v31 = vld [vmem:[%s6327_s23 + $0x70] ss:$8 sps:$4 sm:$0xff]  }
  0x21   : > { %s5098_s17 = scalar_lea.vmem %s6328_s30, %s4556_s24  ;;  %1259 = vmatpush1.bf16.msra.mxu0 %v4631_v3  ;;  %v4650_v32 = vld [vmem:[%s6327_s23 + $0x84] ss:$8 sps:$4 sm:$0xff]   ;;  %v4652_v37 = vld [vmem:[%s6327_s23 + $0x80] ss:$8 sps:$4 sm:$0xff]   ;;  %v4653_v38 = vld [vmem:[%s6327_s23 + $0x94] ss:$8 sps:$4 sm:$0xff]  }
  0x22   : > { %v3845_v5 = vld [vmem:[%s5098_s17 + $0x20] sm:$0xff]  ;;  %v3846_v8 = vld [vmem:[%s5098_s17 + $0x28] sm:$0xff]  ;;  %1260 = vmatprep.subr.bf16.mxu0 %v4632_v4  ;;  %v3847_v26 = vld [vmem:[%s5098_s17 + $0x30] sm:$0xff]  ;;  %s4919_s30 = smov 12   ;;  %s4935_s24 = smov 66  }
  0x23   : > { %v557_v6 = vld [vmem:[%s5098_s17 + $0x1] sm:$0xff]  ;;  %652 = vrot.lane.b32.xlu0 %v3845_v5, %s4909_s27  ;;  %v558_v9 = vld [vmem:[%s5098_s17 + $0x9] sm:$0xff]  ;;  %v3848_v28 = vld [vmem:[%s5098_s17 + $0x38] sm:$0xf] }
  0x24   : > { %565 = vrot.lane.b32.xlu1 %v557_v6, %s4909_s27  ;;  %v3849_v12 = vld [vmem:[%s5098_s17 + $0x21] sm:$0xff]  ;;  %v3850_v13 = vld [vmem:[%s5098_s17 + $0x29] sm:$0xff]  ;;  %v559_v35 = vld [vmem:[%s5098_s17 + $0x11] sm:$0xff] }
  0x25   : > { %1261 = vmatpush1.bf16.msra.mxu0 %v4634_v7  ;;  %v583_v16 = vld [vmem:[%s5098_s17 + $0x2] sm:$0xff]  ;;  %v584_v17 = vld [vmem:[%s5098_s17 + $0xa] sm:$0xff]  ;;  %v560_v36 = vld [vmem:[%s5098_s17 + $0x19] sm:$0xf] }
  0x26   : > { %1262 = vmatprep.subr.bf16.mxu0 %v4635_v10  ;;  %v3853_v18 = vld [vmem:[%s5098_s17 + $0x22] sm:$0xff]  ;;  %v3854_v19 = vld [vmem:[%s5098_s17 + $0x2a] sm:$0xff]  ;;  %v3852_v40 = vld [vmem:[%s5098_s17 + $0x39] sm:$0xf] }
  0x27   : > { %654 = vrot.lane.b32.xlu0 %v3846_v8, %s4909_s27  ;;  %v609_v20 = vld [vmem:[%s5098_s17 + $0x3] sm:$0xff]  ;;  %v610_v23 = vld [vmem:[%s5098_s17 + $0xb] sm:$0xff]  ;;  %v637_v43 = vld [vmem:[%s5098_s17 + $0x14] sm:$0xff] }
  0x28   : > { %567 = vrot.lane.b32.xlu1 %v558_v9, %s4909_s27  ;;  %v635_v29 = vld [vmem:[%s5098_s17 + $0x4] sm:$0xff]  ;;  %v636_v33 = vld [vmem:[%s5098_s17 + $0xc] sm:$0xff]  ;;  %641 = vst.msk [vmem:[#allocation2 + $0x48] sm:$0xff] %vm551_vm0, %v637_v43  ;;  %v638_v44 = vld [vmem:[%s5098_s17 + $0x1c] sm:$0xf] }
  0x29   : > { %1263 = vmatpush1.bf16.msra.mxu0 %v4637_v11  ;;  %639 = vst.msk [vmem:[#allocation2 + $0x8] sm:$0xff] %vm551_vm0, %v635_v29  ;;  %v547_v30 = vld [vmem:[%s5098_s17] sm:$0xff]  ;;  %640 = vst.msk [vmem:[#allocation2 + $0x28] sm:$0xff] %vm551_vm0, %v636_v33  ;;  %v548_v34 = vld [vmem:[%s5098_s17 + $0x8] sm:$0xff] }
  0x2a   : > { %1264 = vmatprep.subr.bf16.mxu0 %v4638_v14  ;;  %552 = vst.msk [vmem:[#allocation2] sm:$0xff] %vm551_vm0, %v547_v30  ;;  %553 = vst.msk [vmem:[#allocation2 + $0x20] sm:$0xff] %vm551_vm0, %v548_v34  ;;  %v3851_v39 = vld [vmem:[%s5098_s17 + $0x31] sm:$0xff]  ;;  %v4656_v42 = vld [vmem:[%s6327_s23 + $0xa4] ss:$8 sps:$4 sm:$0xff]  }
  0x2b   : > { %676 = vrot.lane.b32.xlu0 %v3849_v12, %s4910_s26  ;;  %v4655_v41 = vld [vmem:[%s6327_s23 + $0x90] ss:$8 sps:$4 sm:$0xff]   ;;  %642 = vst.msk [vmem:[#allocation2 + $0x68] sm:$0xf] %vm555_vm1, %v638_v44  ;;  %v4658_v49 = vld [vmem:[%s6327_s23 + $0xa0] ss:$8 sps:$4 sm:$0xff]  }
  0x2c   : > { %678 = vrot.lane.b32.xlu1 %v3850_v13, %s4910_s26  ;;  %v585_v45 = vld [vmem:[%s5098_s17 + $0x12] sm:$0xff]  ;;  %v586_v46 = vld [vmem:[%s5098_s17 + $0x1a] sm:$0xf]  ;;  %v4662_v54 = vld [vmem:[%s6327_s23 + $0xc4] ss:$8 sps:$4 sm:$0xff]  }
  0x2d   : > { %1265 = vmatpush1.bf16.msra.mxu0 %v4640_v15  ;;  %v549_v47 = vld [vmem:[%s5098_s17 + $0x10] sm:$0xff]  ;;  %v550_v48 = vld [vmem:[%s5098_s17 + $0x18] sm:$0xf]  ;;  %v3857_v57 = vld [vmem:[%s5098_s17 + $0x23] sm:$0xff] }
  0x2e   : > { %1266 = vmatprep.subr.bf16.mxu0 %v4641_v21  ;;  %554 = vst.msk [vmem:[#allocation2 + $0x40] sm:$0xff] %vm551_vm0, %v549_v47  ;;  %v4659_v50 = vld [vmem:[%s6327_s23 + $0xb4] ss:$8 sps:$4 sm:$0xff]   ;;  %v4661_v53 = vld [vmem:[%s6327_s23 + $0xb0] ss:$8 sps:$4 sm:$0xff]   ;;  %720 = vst.msk [vmem:[#allocation2 + $0x10] sm:$0xff] %vm551_vm0, %v3857_v57 }
  0x2f   : > { %591 = vrot.lane.b32.xlu0 %v583_v16, %s4910_s26  ;;  %556 = vst.msk [vmem:[#allocation2 + $0x60] sm:$0xf] %vm555_vm1, %v550_v48  ;;  %v3855_v51 = vld [vmem:[%s5098_s17 + $0x32] sm:$0xff]  ;;  %v3856_v52 = vld [vmem:[%s5098_s17 + $0x3a] sm:$0xf]  ;;  %v3873_v61 = vld [vmem:[%s5098_s17 + $0x42] sm:$0xff] }
  0x30   : > { %593 = vrot.lane.b32.xlu1 %v584_v17, %s4910_s26  ;;  %v611_v55 = vld [vmem:[%s5098_s17 + $0x13] sm:$0xff]  ;;  %v612_v56 = vld [vmem:[%s5098_s17 + $0x1b] sm:$0xf]  ;;  %v3858_v58 = vld [vmem:[%s5098_s17 + $0x2b] sm:$0xff]  ;;  %801 = vst.msk [vmem:[#allocation2 + $0x18] sm:$0xff] %vm551_vm0, %v3873_v61 }
  0x31   : > { %1267 = vmatpush1.bf16.msra.mxu0 %v4643_v22  ;;  %v4664_v59 = vld [vmem:[%s6327_s23 + $0xc0] ss:$8 sps:$4 sm:$0xff]   ;;  %v4665_v60 = vld [vmem:[%s6327_s23 + $0xd4] ss:$8 sps:$4 sm:$0xff]   ;;  %721 = vst.msk [vmem:[#allocation2 + $0x30] sm:$0xff] %vm551_vm0, %v3858_v58  ;;  %v3862_v0 = vld [vmem:[%s5098_s17 + $0x2c] sm:$0xff] }
  0x32   : > { %1268 = vmatprep.subr.bf16.mxu0 %v4644_v24  ;;  %v3874_v62 = vld [vmem:[%s5098_s17 + $0x4a] sm:$0xff]  ;;  %v3865_v6 = vld [vmem:[%s5098_s17 + $0x40] sm:$0xff]  ;;  %v4671_v8 = vld [vmem:[%s6327_s23 + $0xf4] ss:$8 sps:$4 sm:$0xff]  }
  0x33   : > { %700 = vrot.lane.b32.xlu0 %v3853_v18, %s4911_s18  ;;  %v3861_v63 = vld [vmem:[%s5098_s17 + $0x24] sm:$0xff]  ;;  %802 = vst.msk [vmem:[#allocation2 + $0x38] sm:$0xff] %vm551_vm0, %v3874_v62  ;;  %v4667_v1 = vld [vmem:[%s6327_s23 + $0xd0] ss:$8 sps:$4 sm:$0xff]  }
  0x34   : > { %702 = vrot.lane.b32.xlu1 %v3854_v19, %s4911_s18  ;;  %v3877_v2 = vld [vmem:[%s5098_s17 + $0x43] sm:$0xff]  ;;  %v3878_v3 = vld [vmem:[%s5098_s17 + $0x4b] sm:$0xff]  ;;  %v3859_v10 = vld [vmem:[%s5098_s17 + $0x33] sm:$0xff] }
  0x35   : > { %1269 = vmatpush1.bf16.msra.mxu0 %v4646_v25  ;;  %v4668_v4 = vld [vmem:[%s6327_s23 + $0xe4] ss:$8 sps:$4 sm:$0xff]   ;;  %v4670_v5 = vld [vmem:[%s6327_s23 + $0xe0] ss:$8 sps:$4 sm:$0xff]   ;;  %v4673_v9 = vld [vmem:[%s6327_s23 + $0xf0] ss:$8 sps:$4 sm:$0xff]  }
  0x36   : > { %1270 = vmatprep.subr.bf16.mxu0 %v4647_v27  ;;  %v3866_v7 = vld [vmem:[%s5098_s17 + $0x48] sm:$0xff]  ;;  %722 = vst.msk [vmem:[#allocation2 + $0x50] sm:$0xff] %vm551_vm0, %v3859_v10  ;;  %v3860_v14 = vld [vmem:[%s5098_s17 + $0x3b] sm:$0xf]  ;;  %v3875_v15 = vld [vmem:[%s5098_s17 + $0x52] sm:$0xff] }
  0x37   : > { %617 = vrot.lane.b32.xlu0 %v609_v20, %s4911_s18  ;;  %v3881_v11 = vld [vmem:[%s5098_s17 + $0x44] sm:$0xff]  ;;  %v3882_v12 = vld [vmem:[%s5098_s17 + $0x4c] sm:$0xff]  ;;  %723 = vst.msk [vmem:[#allocation2 + $0x70] sm:$0xf] %vm555_vm1, %v3860_v14  ;;  %v3876_v18 = vld [vmem:[%s5098_s17 + $0x5a] sm:$0xf] }
  0x38   : > { %619 = vrot.lane.b32.xlu1 %v610_v23, %s4911_s18  ;;  %v4676_v13 = vld [vmem:[%s6327_s23 + $0x104] ss:$8 sps:$4 sm:$0xff]   ;;  %803 = vst.msk [vmem:[#allocation2 + $0x58] sm:$0xff] %vm551_vm0, %v3875_v15  ;;  %v3863_v19 = vld [vmem:[%s5098_s17 + $0x34] sm:$0xff]  ;;  %v3864_v20 = vld [vmem:[%s5098_s17 + $0x3c] sm:$0xf] }
  0x39   : > { %1271 = vmatpush1.bf16.msra.mxu0 %v4649_v31  ;;  %v3869_v16 = vld [vmem:[%s5098_s17 + $0x41] sm:$0xff]  ;;  %v3870_v17 = vld [vmem:[%s5098_s17 + $0x49] sm:$0xff]  ;;  %804 = vst.msk [vmem:[#allocation2 + $0x78] sm:$0xf] %vm555_vm1, %v3876_v18  ;;  %v3879_v21 = vld [vmem:[%s5098_s17 + $0x53] sm:$0xff]  ;;  %v4912_v31 = vmov 0.0|0.0  }
  0x3a   : > { %1272 = vmatprep.subr.bf16.mxu0 %v4650_v32  ;;  %v3880_v22 = vld [vmem:[%s5098_s17 + $0x5b] sm:$0xf]  ;;  %v3867_v23 = vld [vmem:[%s5098_s17 + $0x50] sm:$0xff]  ;;  %v1386_v29 = vld [vmem:[%s6293_s3] sm:$0xff]  ;;  %4367 = vmatprep.subr.bf16.mxu1 %v4912_v31 }
  0x3b   : > { %656 = vrot.lane.b32.xlu0 %v3847_v26, %s4909_s27  ;;  %v3868_v24 = vld [vmem:[%s5098_s17 + $0x58] sm:$0xf]  ;;  %v3884_v26 = vld [vmem:[%s5098_s17 + $0x5c] sm:$0xf]  ;;  %v1387_v30 = vld [vmem:[%s6293_s3 + $0x8] sm:$0xff] }
  0x3c   : > { %658 = vrot.lane.b32.xlu1 %v3848_v28, %s4909_s27  ;;  %v3883_v25 = vld [vmem:[%s5098_s17 + $0x54] sm:$0xff]  ;;  %v4368_v32 = vpack.c.bf16 %v1387_v30, %v1386_v29  ;;  %v1398_v47 = vld [vmem:[%s6293_s3 + $0x60] sm:$0xff]  ;;  %v1399_v48 = vld [vmem:[%s6293_s3 + $0x68] sm:$0xff] }
  0x3d   : > { %1273 = vmatpush1.bf16.msra.mxu0 %v4652_v37  ;;  %v3871_v27 = vld [vmem:[%s5098_s17 + $0x51] sm:$0xff]  ;;  %v3872_v28 = vld [vmem:[%s5098_s17 + $0x59] sm:$0xf]  ;;  %v1391_v37 = vld [vmem:[%s6293_s3 + $0x28] sm:$0xff]  ;;  %s539_s17 = sand.u32 1, %s4899_s25  }
  0x3e   : > { %1274 = vmatprep.subr.bf16.mxu0 %v4653_v38  ;;  %v1388_v33 = vld [vmem:[%s6293_s3 + $0x10] sm:$0xff]  ;;  %v1389_v34 = vld [vmem:[%s6293_s3 + $0x18] sm:$0xff]  ;;  %4369 = vmatpush1.bf16.msra.mxu1 %v4368_v32  ;;  %v4686_v32 = vld [vmem:[%s6327_s23 + $0x140] ss:$8 sps:$4 sm:$0xff]  }
  0x3f   : > { %569 = vrot.lane.b32.xlu0 %v559_v35, %s4909_s27  ;;  %v4371_v35 = vpack.c.bf16 %v1389_v34, %v1388_v33  ;;  %4370 = vmatprep.subr.bf16.mxu1 %v4912_v31  ;;  %v1392_v38 = vld [vmem:[%s6293_s3 + $0x30] sm:$0xff] }
  0x40   : > { %571 = vrot.lane.b32.xlu1 %v560_v36, %s4909_s27  ;;  %v1390_v36 = vld [vmem:[%s6293_s3 + $0x20] sm:$0xff]  ;;  %v1396_v44 = vld [vmem:[%s6293_s3 + $0x50] sm:$0xff] }
  0x41   : > { %1275 = vmatpush1.bf16.msra.mxu0 %v4655_v41  ;;  %v1394_v41 = vld [vmem:[%s6293_s3 + $0x40] sm:$0xff]  ;;  %v4691_v33 = vld [vmem:[%s6327_s23 + $0x154] ss:$8 sps:$4 sm:$0xff]  }
  0x42   : > { %1276 = vmatprep.subr.bf16.mxu0 %v4656_v42  ;;  %4372 = vmatpush1.bf16.msra.mxu1 %v4371_v35  ;;  %v1395_v42 = vld [vmem:[%s6293_s3 + $0x48] sm:$0xff] }
  0x43   : > { %680 = vrot.lane.b32.xlu0 %v3851_v39, %s4910_s26  ;;  %v1393_v39 = vld [vmem:[%s6293_s3 + $0x38] sm:$0xff]  ;;  %4373 = vmatprep.subr.bf16.mxu1 %v4912_v31 }
  0x44   : > { %682 = vrot.lane.b32.xlu1 %v3852_v40, %s4910_s26  ;;  %v4374_v40 = vpack.c.bf16 %v1391_v37, %v1390_v36  ;;  %v4377_v43 = vpack.c.bf16 %v1393_v39, %v1392_v38  ;;  %v4689_v36 = vld [vmem:[%s6327_s23 + $0x150] ss:$8 sps:$4 sm:$0xff]   ;;  %v4694_v39 = vld [vmem:[%s6327_s23 + $0x164] ss:$8 sps:$4 sm:$0xff]  }
  0x45   : > { %1277 = vmatpush1.bf16.msra.mxu0 %v4658_v49 }
  0x46   : > { %1278 = vmatprep.subr.bf16.mxu0 %v4659_v50  ;;  %4375 = vmatpush1.bf16.msra.mxu1 %v4374_v40  ;;  %v1400_v50 = vld [vmem:[%s6293_s3 + $0x70] sm:$0xff] }
  0x47   : > { %595 = vrot.lane.b32.xlu0 %v585_v45, %s4910_s26  ;;  %4376 = vmatprep.subr.bf16.mxu1 %v4912_v31  ;;  %v1397_v45 = vld [vmem:[%s6293_s3 + $0x58] sm:$0xff] }
  0x48   : > { %597 = vrot.lane.b32.xlu1 %v586_v46, %s4910_s26  ;;  %v4380_v46 = vpack.c.bf16 %v1395_v42, %v1394_v41  ;;  %v4383_v49 = vpack.c.bf16 %v1397_v45, %v1396_v44 }
  0x49   : > { %1279 = vmatpush1.bf16.msra.mxu0 %v4661_v53  ;;  %v1402_v53 = vld [vmem:[%s6293_s3 + $0x80] sm:$0xff] }
  0x4a   : > { %1280 = vmatprep.subr.bf16.mxu0 %v4662_v54  ;;  %4378 = vmatpush1.bf16.msra.mxu1 %v4377_v43  ;;  %v1403_v54 = vld [vmem:[%s6293_s3 + $0x88] sm:$0xff] }
  0x4b   : > { %704 = vrot.lane.b32.xlu0 %v3855_v51, %s4911_s18  ;;  %4379 = vmatprep.subr.bf16.mxu1 %v4912_v31  ;;  %v1401_v51 = vld [vmem:[%s6293_s3 + $0x78] sm:$0xff]  ;;  %v4692_v43 = vld [vmem:[%s6327_s23 + $0x160] ss:$8 sps:$4 sm:$0xff]  }
  0x4c   : > { %706 = vrot.lane.b32.xlu1 %v3856_v52, %s4911_s18  ;;  %v4386_v52 = vpack.c.bf16 %v1399_v48, %v1398_v47 }
  0x4d   : > { %1281 = vmatpush1.bf16.msra.mxu0 %v4664_v59 }
  0x4e   : > { %1282 = vmatprep.subr.bf16.mxu0 %v4665_v60  ;;  %4381 = vmatpush1.bf16.msra.mxu1 %v4380_v46  ;;  %v4697_v46 = vld [vmem:[%s6327_s23 + $0x174] ss:$8 sps:$4 sm:$0xff]  }
  0x4f   : > { %621 = vrot.lane.b32.xlu0 %v611_v55, %s4911_s18  ;;  %4382 = vmatprep.subr.bf16.mxu1 %v4912_v31  ;;  %v4389_v55 = vpack.c.bf16 %v1401_v51, %v1400_v50  ;;  %v4695_v50 = vld [vmem:[%s6327_s23 + $0x170] ss:$8 sps:$4 sm:$0xff]   ;;  %v4700_v51 = vld [vmem:[%s6327_s23 + $0x184] ss:$8 sps:$4 sm:$0xff]  }
  0x50   : > { %623 = vrot.lane.b32.xlu1 %v612_v56, %s4911_s18  ;;  %v4392_v56 = vpack.c.bf16 %v1403_v54, %v1402_v53  ;;  %v4698_v54 = vld [vmem:[%s6327_s23 + $0x180] ss:$8 sps:$4 sm:$0xff]  }
  0x51   : > { %1283 = vmatpush1.bf16.msra.mxu0 %v4667_v1 }
  0x52   : > { %1284 = vmatprep.subr.bf16.mxu0 %v4668_v4  ;;  %4384 = vmatpush1.bf16.msra.mxu1 %v4383_v49 }
  0x53   : > { %732 = vrot.lane.b32.xlu0 %v3861_v63, %s4909_s27  ;;  %4385 = vmatprep.subr.bf16.mxu1 %v4912_v31 }
  0x54   : > { %734 = vrot.lane.b32.xlu1 %v3862_v0, %s4909_s27 }
  0x55   : > { %1285 = vmatpush1.bf16.msra.mxu0 %v4670_v5 }
  0x56   : > { %1286 = vmatprep.subr.bf16.mxu0 %v4671_v8  ;;  %4387 = vmatpush1.bf16.msra.mxu1 %v4386_v52 }
  0x57   : > { %813 = vrot.lane.b32.xlu0 %v3877_v2, %s4909_s27  ;;  %4388 = vmatprep.subr.bf16.mxu1 %v4912_v31 }
  0x58   : > { %815 = vrot.lane.b32.xlu1 %v3878_v3, %s4909_s27 }
  0x59   : > { %1287 = vmatpush1.bf16.msra.mxu0 %v4673_v9 }
  0x5a   : > { %1309 = vmatprep.subr.bf16.mxu0 %v4676_v13  ;;  %4390 = vmatpush1.bf16.msra.mxu1 %v4389_v55  ;;  %v4703_v55 = vld [vmem:[%s6327_s23 + $0x194] ss:$8 sps:$4 sm:$0xff]  }
  0x5b   : > { %757 = vrot.lane.b32.xlu0 %v3865_v6, %s4910_s26  ;;  %4391 = vmatprep.subr.bf16.mxu1 %v4912_v31 }
  0x5c   : > { %759 = vrot.lane.b32.xlu1 %v3866_v7, %s4910_s26 }
  0x5e   : > { %4393 = vmatpush1.bf16.msra.mxu1 %v4392_v56 }
  0x5f   : > { %837 = vrot.lane.b32.xlu0 %v3881_v11, %s4910_s26  ;;  %4394 = vmatprep.subr.bf16.mxu1 %v4912_v31 }
  0x60   : > { %839 = vrot.lane.b32.xlu1 %v3882_v12, %s4910_s26  ;;  %v4674_v12 = vld [vmem:[%s6327_s23 + $0x100] ss:$8 sps:$4 sm:$0xff]  }
  0x63   : > { %781 = vrot.lane.b32.xlu0 %v3869_v16, %s4911_s18  ;;  %v4679_v16 = vld [vmem:[%s6327_s23 + $0x114] ss:$8 sps:$4 sm:$0xff]  }
  0x64   : > { %783 = vrot.lane.b32.xlu1 %v3870_v17, %s4911_s18 }
  0x67   : > { %736 = vrot.lane.b32.xlu0 %v3863_v19, %s4909_s27  ;;  %v4677_v19 = vld [vmem:[%s6327_s23 + $0x110] ss:$8 sps:$4 sm:$0xff]  }
  0x68   : > { %738 = vrot.lane.b32.xlu1 %v3864_v20, %s4909_s27  ;;  %v4682_v20 = vld [vmem:[%s6327_s23 + $0x124] ss:$8 sps:$4 sm:$0xff]  }
  0x6b   : > { %817 = vrot.lane.b32.xlu0 %v3879_v21, %s4909_s27 }
  0x6c   : > { %819 = vrot.lane.b32.xlu1 %v3880_v22, %s4909_s27  ;;  %s4936_s27 = smov 38  }
  0x6f   : > { %761 = vrot.lane.b32.xlu0 %v3867_v23, %s4910_s26  ;;  %v4680_v23 = vld [vmem:[%s6327_s23 + $0x120] ss:$8 sps:$4 sm:$0xff]  }
  0x70   : > { %763 = vrot.lane.b32.xlu1 %v3868_v24, %s4910_s26  ;;  %v4685_v24 = vld [vmem:[%s6327_s23 + $0x134] ss:$8 sps:$4 sm:$0xff]  }
  0x73   : > { %841 = vrot.lane.b32.xlu0 %v3883_v25, %s4910_s26 }
  0x74   : > { %843 = vrot.lane.b32.xlu1 %v3884_v26, %s4910_s26  ;;  %s4939_s26 = smov [#allocation5]  }
  0x77   : > { %785 = vrot.lane.b32.xlu0 %v3871_v27, %s4911_s18  ;;  %v4683_v27 = vld [vmem:[%s6327_s23 + $0x130] ss:$8 sps:$4 sm:$0xff]  }
  0x78   : > { %787 = vrot.lane.b32.xlu1 %v3872_v28, %s4911_s18  ;;  %v4688_v28 = vld [vmem:[%s6327_s23 + $0x144] ss:$8 sps:$4 sm:$0xff]  }
  0x95   : > { %v653_v57 = vpop.permute.xlu0 %652 }
  0x96   : > { %v566_v58 = vpop.permute.xlu1 %565  ;;  %664 = vst.msk [vmem:[#allocation2 + $0x8] sm:$0xff] %vm577_vm2, %v653_v57 }
  0x97   : > { %578 = vst.msk [vmem:[#allocation2] sm:$0xff] %vm577_vm2, %v566_v58  ;;  %v4701_v58 = vld [vmem:[%s6327_s23 + $0x190] ss:$8 sps:$4 sm:$0xff]  }
  0x99   : > { %v655_v59 = vpop.permute.xlu0 %654 }
  0x9a   : > { %v568_v60 = vpop.permute.xlu1 %567  ;;  %665 = vst.msk [vmem:[#allocation2 + $0x28] sm:$0xff] %vm577_vm2, %v655_v59  ;;  %v4706_v59 = vld [vmem:[%s6327_s23 + $0x1a4] ss:$8 sps:$4 sm:$0xff]  }
  0x9b   : > { %579 = vst.msk [vmem:[#allocation2 + $0x20] sm:$0xff] %vm577_vm2, %v568_v60 }
  0x9d   : > { %v677_v61 = vpop.permute.xlu0 %676 }
  0x9e   : > { %v679_v62 = vpop.permute.xlu1 %678  ;;  %688 = vst.msk [vmem:[#allocation2 + $0x8] sm:$0xff] %vm603_vm3, %v677_v61 }
  0x9f   : > { %689 = vst.msk [vmem:[#allocation2 + $0x28] sm:$0xff] %vm603_vm3, %v679_v62  ;;  %v4704_v62 = vld [vmem:[%s6327_s23 + $0x1a0] ss:$8 sps:$4 sm:$0xff]  }
  0xa1   : > { %v592_v63 = vpop.permute.xlu0 %591 }
  0xa2   : > { %v594_v0 = vpop.permute.xlu1 %593  ;;  %604 = vst.msk [vmem:[#allocation2] sm:$0xff] %vm603_vm3, %v592_v63 }
  0xa3   : > { %605 = vst.msk [vmem:[#allocation2 + $0x20] sm:$0xff] %vm603_vm3, %v594_v0 }
  0xa5   : > { %v701_v1 = vpop.permute.xlu0 %700 }
  0xa6   : > { %v703_v2 = vpop.permute.xlu1 %702  ;;  %712 = vst.msk [vmem:[#allocation2 + $0x8] sm:$0xff] %vm629_vm4, %v701_v1  ;;  %v4709_v1 = vld [vmem:[%s6327_s23 + $0x1b4] ss:$8 sps:$4 sm:$0xff]  }
  0xa7   : > { %713 = vst.msk [vmem:[#allocation2 + $0x28] sm:$0xff] %vm629_vm4, %v703_v2 }
  0xa9   : > { %v618_v3 = vpop.permute.xlu0 %617 }
  0xaa   : > { %v620_v4 = vpop.permute.xlu1 %619  ;;  %630 = vst.msk [vmem:[#allocation2] sm:$0xff] %vm629_vm4, %v618_v3 }
  0xab   : > { %631 = vst.msk [vmem:[#allocation2 + $0x20] sm:$0xff] %vm629_vm4, %v620_v4 }
  0xad   : > { %v657_v5 = vpop.permute.xlu0 %656  ;;  %v854_v7 = vld [vmem:[#allocation2 + $0x8] sm:$0xff] }
  0xae   : > { %v659_v6 = vpop.permute.xlu1 %658  ;;  %v858_v8 = vld [vmem:[#allocation2 + $0x28] sm:$0xff]  ;;  %666 = vst.msk [vmem:[#allocation2 + $0x48] sm:$0xff] %vm577_vm2, %v657_v5  ;;  %v4707_v5 = vld [vmem:[%s6327_s23 + $0x1b0] ss:$8 sps:$4 sm:$0xff]  }
  0xaf   : > { %667 = vst.msk [vmem:[#allocation2 + $0x68] sm:$0xf] %vm581_vm5, %v659_v6  ;;  %v870_v9 = vpack.c.bf16 %v858_v8, %v854_v7  ;;  %v4712_v6 = vld [vmem:[%s6327_s23 + $0x1c4] ss:$8 sps:$4 sm:$0xff]  }
  0xb1   : > { %1288 = vmatprep.mubr.bf16.mxu0 %v870_v9  ;;  %v570_v10 = vpop.permute.xlu0 %569  ;;  %v853_v13 = vld [vmem:[#allocation2] sm:$0xff] }
  0xb2   : > { %v572_v11 = vpop.permute.xlu1 %571  ;;  %v857_v14 = vld [vmem:[#allocation2 + $0x20] sm:$0xff]  ;;  %580 = vst.msk [vmem:[#allocation2 + $0x40] sm:$0xff] %vm577_vm2, %v570_v10  ;;  %v4715_v10 = vld [vmem:[%s6327_s23 + $0x1d4] ss:$8 sps:$4 sm:$0xff]  }
  0xb3   : > { %582 = vst.msk [vmem:[#allocation2 + $0x60] sm:$0xf] %vm581_vm5, %v572_v11  ;;  %v869_v15 = vpack.c.bf16 %v857_v14, %v853_v13  ;;  %v4710_v9 = vld [vmem:[%s6327_s23 + $0x1c0] ss:$8 sps:$4 sm:$0xff]   ;;  %v4713_v13 = vld [vmem:[%s6327_s23 + $0x1d0] ss:$8 sps:$4 sm:$0xff]  }
  0xb5   : > { %1289 = vmatmul.mubr.bf16.vlgmr.msra.gmra.mrb[0].mxu0 %v869_v15  ;;  %v681_v17 = vpop.permute.xlu0 %680 }
  0xb6   : > { %1310 = vmatpush1.bf16.msra.mxu0 %v4674_v12  ;;  %v683_v18 = vpop.permute.xlu1 %682  ;;  %690 = vst.msk [vmem:[#allocation2 + $0x48] sm:$0xff] %vm603_vm3, %v681_v17 }
  0xb7   : > { %691 = vst.msk [vmem:[#allocation2 + $0x68] sm:$0xf] %vm607_vm6, %v683_v18  ;;  %1311 = vmatprep.subr.bf16.mxu0 %v4679_v16 }
  0xb9   : > { %v596_v21 = vpop.permute.xlu0 %595 }
  0xba   : > { %1312 = vmatpush1.bf16.msra.mxu0 %v4677_v19  ;;  %v598_v22 = vpop.permute.xlu1 %597  ;;  %606 = vst.msk [vmem:[#allocation2 + $0x40] sm:$0xff] %vm603_vm3, %v596_v21 }
  0xbb   : > { %608 = vst.msk [vmem:[#allocation2 + $0x60] sm:$0xf] %vm607_vm6, %v598_v22  ;;  %1313 = vmatprep.subr.bf16.mxu0 %v4682_v20 }
  0xbd   : > { %v705_v25 = vpop.permute.xlu0 %704 }
  0xbe   : > { %1314 = vmatpush1.bf16.msra.mxu0 %v4680_v23  ;;  %v707_v26 = vpop.permute.xlu1 %706  ;;  %714 = vst.msk [vmem:[#allocation2 + $0x48] sm:$0xff] %vm629_vm4, %v705_v25  ;;  %v1404_v25 = vld [vmem:[%s6293_s3 + $0x90] sm:$0xff] }
  0xbf   : > { %715 = vst.msk [vmem:[#allocation2 + $0x68] sm:$0xf] %vm633_vm7, %v707_v26  ;;  %1315 = vmatprep.subr.bf16.mxu0 %v4685_v24  ;;  %v1405_v26 = vld [vmem:[%s6293_s3 + $0x98] sm:$0xff] }
  0xc1   : > { %v622_v29 = vpop.permute.xlu0 %621 }
  0xc2   : > { %1316 = vmatpush1.bf16.msra.mxu0 %v4683_v27  ;;  %v624_v30 = vpop.permute.xlu1 %623  ;;  %632 = vst.msk [vmem:[#allocation2 + $0x40] sm:$0xff] %vm629_vm4, %v622_v29  ;;  %v4395_v27 = vpack.c.bf16 %v1405_v26, %v1404_v25  ;;  %v1406_v29 = vld [vmem:[%s6293_s3 + $0xa0] sm:$0xff]  ;;  %v3964_v25 = vld [vmem:[%s6293_s3 + $0x110] sm:$0xff] }
  0xc3   : > { %634 = vst.msk [vmem:[#allocation2 + $0x60] sm:$0xf] %vm633_vm7, %v624_v30  ;;  %1317 = vmatprep.subr.bf16.mxu0 %v4688_v28  ;;  %v4913_v28 = vmov 0.0   ;;  %v939_v30 = vlaneseq }
  0xc4   : > { %4396 = vmatpush1.bf16.msra.mxu1 %v4395_v27  ;;  %v3965_v27 = vld [vmem:[%s6293_s3 + $0x118] sm:$0xff] }
  0xc5   : > { %v733_v34 = vpop.permute.xlu0 %732  ;;  %v862_v37 = vld [vmem:[#allocation2 + $0x48] sm:$0xff]  ;;  %1460 = vmatprep.subr.mxu1 %v4913_v28 }
  0xc6   : > { %1318 = vmatpush1.bf16.msra.mxu0 %v4686_v32  ;;  %v735_v35 = vpop.permute.xlu1 %734  ;;  %v866_v38 = vld [vmem:[#allocation2 + $0x68] sm:$0xf]  ;;  %744 = vst.msk [vmem:[#allocation2 + $0x10] sm:$0xff] %vm577_vm2, %v733_v34  ;;  %v5507_v32 = vshrl.u32 %v939_v30, 7  ;;  %v937_v34 = vld [vmem:[%s6292_s2] sm:$0x3] }
  0xc7   : > { %745 = vst.msk [vmem:[#allocation2 + $0x30] sm:$0xff] %vm577_vm2, %v735_v35  ;;  %1319 = vmatprep.subr.bf16.mxu0 %v4691_v33  ;;  %v874_v40 = vpack.c.bf16 %v866_v38, %v862_v37 }
  0xc8   : > { %1461 = vmatpush1.msra.mxu1 %v1406_v29  ;;  %v941_v33 = vsub.s32 0, %v5507_v32  ;;  %v945_v35 = vsub.s32 1, %v5507_v32  ;;  %v3966_v29 = vld [vmem:[%s6293_s3 + $0x120] sm:$0xff] }
  0xc9   : > { %1298 = vmatprep.mubr.bf16.mxu0 %v874_v40  ;;  %v814_v41 = vpop.permute.xlu0 %813  ;;  %v861_v44 = vld [vmem:[#allocation2 + $0x40] sm:$0xff]  ;;  %4397 = vmatprep.subr.bf16.mxu1 %v4912_v31  ;;  %v4419_v30 = vpack.c.bf16 %v3966_v29, %v3965_v27  ;;  %v4727_v27 = vld [vmem:[%s6295_s5 + $0x34] ss:$8 sps:$4 sm:$0xff]   ;;  %v4725_v29 = vld [vmem:[%s6295_s5 + $0x30] ss:$8 sps:$4 sm:$0xff]  }
  0xca   : > { %1320 = vmatpush1.bf16.msra.mxu0 %v4689_v36  ;;  %v816_v42 = vpop.permute.xlu1 %815  ;;  %v865_v45 = vld [vmem:[#allocation2 + $0x60] sm:$0xf]  ;;  %825 = vst.msk [vmem:[#allocation2 + $0x18] sm:$0xff] %vm577_vm2, %v814_v41  ;;  %v942_v36 = vrot.slane %v937_v34, %v941_v33  ;;  %v946_v37 = vrot.slane %v937_v34, %v945_v35  ;;  %v3967_v34 = vld [vmem:[%s6293_s3 + $0x128] sm:$0xff] }
  0xcb   : > { %826 = vst.msk [vmem:[#allocation2 + $0x38] sm:$0xff] %vm577_vm2, %v816_v42  ;;  %1321 = vmatprep.subr.bf16.mxu0 %v4694_v39  ;;  %v873_v47 = vpack.c.bf16 %v865_v45, %v861_v44  ;;  %v3952_v44 = vld [vmem:[%s6293_s3 + $0xb0] sm:$0xff] }
  0xcd   : > { %1299 = vmatmul.mubr.bf16.gmra.mrb[4].mxu0 %v873_v47  ;;  %v758_v48 = vpop.permute.xlu0 %757 }
  0xce   : > { %1322 = vmatpush1.bf16.msra.mxu0 %v4692_v43  ;;  %v760_v49 = vpop.permute.xlu1 %759  ;;  %769 = vst.msk [vmem:[#allocation2 + $0x10] sm:$0xff] %vm603_vm3, %v758_v48  ;;  %v3951_v43 = vld [vmem:[%s6293_s3 + $0xa8] sm:$0xff] }
  0xcf   : > { %770 = vst.msk [vmem:[#allocation2 + $0x30] sm:$0xff] %vm603_vm3, %v760_v49  ;;  %1323 = vmatprep.subr.bf16.mxu0 %v4697_v46 }
  0xd1   : > { %v838_v52 = vpop.permute.xlu0 %837 }
  0xd2   : > { %1324 = vmatpush1.bf16.msra.mxu0 %v4695_v50  ;;  %v840_v53 = vpop.permute.xlu1 %839  ;;  %849 = vst.msk [vmem:[#allocation2 + $0x18] sm:$0xff] %vm603_vm3, %v838_v52  ;;  %v4398_v50 = vpack.c.bf16 %v3952_v44, %v3951_v43 }
  0xd3   : > { %850 = vst.msk [vmem:[#allocation2 + $0x38] sm:$0xff] %vm603_vm3, %v840_v53  ;;  %1325 = vmatprep.subr.bf16.mxu0 %v4700_v51  ;;  %v3953_v53 = vld [vmem:[%s6293_s3 + $0xb8] sm:$0xff] }
  0xd5   : > { %v782_v56 = vpop.permute.xlu0 %781 }
  0xd6   : > { %1326 = vmatpush1.bf16.msra.mxu0 %v4698_v54  ;;  %v784_v57 = vpop.permute.xlu1 %783  ;;  %793 = vst.msk [vmem:[#allocation2 + $0x10] sm:$0xff] %vm629_vm4, %v782_v56  ;;  %v3954_v54 = vld [vmem:[%s6293_s3 + $0xc0] sm:$0xff] }
  0xd7   : > { %794 = vst.msk [vmem:[#allocation2 + $0x30] sm:$0xff] %vm629_vm4, %v784_v57  ;;  %1327 = vmatprep.subr.bf16.mxu0 %v4703_v55 }
  0xd9   : > { %v737_v60 = vpop.permute.xlu0 %736  ;;  %v856_v63 = vld [vmem:[#allocation2 + $0x18] sm:$0xff] }
  0xda   : > { %1328 = vmatpush1.bf16.msra.mxu0 %v4701_v58  ;;  %v739_v61 = vpop.permute.xlu1 %738  ;;  %v860_v0 = vld [vmem:[#allocation2 + $0x38] sm:$0xff]  ;;  %746 = vst.msk [vmem:[#allocation2 + $0x50] sm:$0xff] %vm577_vm2, %v737_v60 }
  0xdb   : > { %747 = vst.msk [vmem:[#allocation2 + $0x70] sm:$0xf] %vm581_vm5, %v739_v61  ;;  %1329 = vmatprep.subr.bf16.mxu0 %v4706_v59  ;;  %v872_v2 = vpack.c.bf16 %v860_v0, %v856_v63  ;;  %v4401_v61 = vpack.c.bf16 %v3954_v54, %v3953_v53  ;;  %v3955_v0 = vld [vmem:[%s6293_s3 + $0xc8] sm:$0xff] }
  0xdd   : > { %3945 = vmatprep.mubr.msk.bf16.mxu0 %vm1249_vm8, %v872_v2  ;;  %v818_v3 = vpop.permute.xlu0 %817  ;;  %v855_v14 = vld [vmem:[#allocation2 + $0x10] sm:$0xff] }
  0xde   : > { %1330 = vmatpush1.bf16.msra.mxu0 %v4704_v62  ;;  %v820_v4 = vpop.permute.xlu1 %819  ;;  %827 = vst.msk [vmem:[#allocation2 + $0x58] sm:$0xff] %vm577_vm2, %v818_v3  ;;  %v859_v15 = vld [vmem:[#allocation2 + $0x30] sm:$0xff] }
  0xdf   : > { %828 = vst.msk [vmem:[#allocation2 + $0x78] sm:$0xf] %vm581_vm5, %v820_v4  ;;  %1331 = vmatprep.subr.bf16.mxu0 %v4709_v1  ;;  %v871_v16 = vpack.c.bf16 %v859_v15, %v855_v14  ;;  %v3956_v1 = vld [vmem:[%s6293_s3 + $0xd0] sm:$0xff]  ;;  %vm4914_vm5 = vmmov 1  }
  0xe1   : > { %v762_v7 = vpop.permute.xlu0 %761 }
  0xe2   : > { %1332 = vmatpush1.bf16.msra.mxu0 %v4707_v5  ;;  %v764_v8 = vpop.permute.xlu1 %763  ;;  %771 = vst.msk [vmem:[#allocation2 + $0x50] sm:$0xff] %vm603_vm3, %v762_v7 }
  0xe3   : > { %772 = vst.msk [vmem:[#allocation2 + $0x70] sm:$0xf] %vm607_vm6, %v764_v8  ;;  %1333 = vmatprep.subr.bf16.mxu0 %v4712_v6  ;;  %v4404_v8 = vpack.c.bf16 %v3956_v1, %v3955_v0  ;;  %v1617_v1 = vld [vmem:[%s6294_s4 + $0x8] sm:$0x3f] }
  0xe5   : > { %v842_v11 = vpop.permute.xlu0 %841 }
  0xe6   : > { %1334 = vmatpush1.bf16.msra.mxu0 %v4710_v9  ;;  %v844_v12 = vpop.permute.xlu1 %843  ;;  %851 = vst.msk [vmem:[#allocation2 + $0x58] sm:$0xff] %vm603_vm3, %v842_v11  ;;  %v3957_v11 = vld [vmem:[%s6293_s3 + $0xd8] sm:$0xff]  ;;  %vm1618_vm3 = vcmask 228352  }
  0xe7   : > { %852 = vst.msk [vmem:[#allocation2 + $0x78] sm:$0xf] %vm607_vm6, %v844_v12  ;;  %1335 = vmatprep.subr.bf16.mxu0 %v4715_v10  ;;  %v3958_v12 = vld [vmem:[%s6293_s3 + $0xe0] sm:$0xff] }
  0xe9   : > { %v786_v17 = vpop.permute.xlu0 %785 }
  0xea   : > { %1336 = vmatpush1.bf16.msra.mxu0 %v4713_v13  ;;  %v788_v18 = vpop.permute.xlu1 %787  ;;  %795 = vst.msk [vmem:[#allocation2 + $0x50] sm:$0xff] %vm629_vm4, %v786_v17  ;;  %v3959_v17 = vld [vmem:[%s6293_s3 + $0xe8] sm:$0xff]  ;;  %vm1625_vm4 = vcmask 1043456  }
  0xeb   : > { %796 = vst.msk [vmem:[#allocation2 + $0x70] sm:$0xf] %vm633_vm7, %v788_v18  ;;  %4447 = vmatprep.subr.bf16.mxu0 %v4912_v31  ;;  %v3960_v18 = vld [vmem:[%s6293_s3 + $0xf0] sm:$0xff]  ;;  %vm4432_vm6 = vmpackc.low %vm1625_vm4, %vm4914_vm5  ;;  %vm1792_vm7 = vcmask 685056   ;;  %vm1826_vm4 = vcmask 337120  }
  0xed   : > { %1342 = vmatmul.mubr.bf16.vlgmr.msra.gmra.mrb[0].mxu0 %v871_v16  ;;  %v864_v19 = vld [vmem:[#allocation2 + $0x58] sm:$0xff]  ;;  %v4407_v16 = vpack.c.bf16 %v3958_v12, %v3957_v11 }
  0xee   : > { %v868_v20 = vld [vmem:[#allocation2 + $0x78] sm:$0xf] }
  0xef   : > { %v876_v21 = vpack.c.bf16 %v868_v20, %v864_v19  ;;  %v4410_v20 = vpack.c.bf16 %v3960_v18, %v3959_v17  ;;  %v4716_v17 = vld [vmem:[%s6295_s5] ss:$8 sps:$4 sm:$0xff]  }
  0xf1   : > { %3946 = vmatprep.mubr.msk.bf16.mxu0 %vm1249_vm8, %v876_v21  ;;  %v863_v22 = vld [vmem:[#allocation2 + $0x50] sm:$0xff]  ;;  %v3961_v21 = vld [vmem:[%s6293_s3 + $0xf8] sm:$0xff]  ;;  %vm1790_vm8 = vcmask 687104  }
  0xf2   : > { %v867_v23 = vld [vmem:[#allocation2 + $0x70] sm:$0xf] }
  0xf3   : > { %v875_v24 = vpack.c.bf16 %v867_v23, %v863_v22  ;;  %v3962_v22 = vld [vmem:[%s6293_s3 + $0x100] sm:$0xff] }
  0xf4   : > { %v4413_v23 = vpack.c.bf16 %v3962_v22, %v3961_v21  ;;  %v4719_v21 = vld [vmem:[%s6295_s5 + $0x10] ss:$8 sps:$4 sm:$0xff]  }
  0xf5   : > { %1352 = vmatmul.mubr.bf16.gmra.mrb[4].mxu0 %v875_v24  ;;  %v3963_v24 = vld [vmem:[%s6293_s3 + $0x108] sm:$0xff] }
  0xf6   : > { %v4416_v26 = vpack.c.bf16 %v3964_v25, %v3963_v24  ;;  %v4722_v25 = vld [vmem:[%s6295_s5 + $0x20] ss:$8 sps:$4 sm:$0xff]  }
 0x1c0   : > { %v1343_v38 = vpop.f32.mrb[0].mxu0 }
 0x1c1   : > { %v4515_v39 = vadd.f32 %v1343_v38, %v942_v36  ;;  %v1345_v40 = vpop.f32.mrb[1].mxu0  ;;  %v3969_v38 = vld [vmem:[%s6293_s3 + $0x138] sm:$0xff] }
 0x1c2   : > { %v4516_v41 = vadd.f32 %v1345_v40, %v946_v37  ;;  %v1347_v42 = vpop.f32.mrb[2].mxu0 }
 0x1c3   : > { %v1370_v45 = vmul.f32 0.01, %v4515_v39  ;;  %v4517_v46 = vadd.f32 %v1347_v42, %v942_v36  ;;  %v1349_v47 = vpop.f32.mrb[3].mxu0  ;;  %vm1362_vm11 = vcmp.ge.f32.partialorder %v4515_v39, 0.0  ;;  %v1616_v42 = vld [vmem:[%s6294_s4] sm:$0xff] }
 0x1c4   : > { %v4518_v48 = vadd.f32 %v1349_v47, %v946_v37  ;;  %vm1363_vm10 = vcmp.ge.f32.partialorder %v4516_v41, 0.0  ;;  %v1371_v49 = vmul.f32 0.01, %v4516_v41 }
 0x1c5   : > { %v1372_v55 = vmul.f32 0.01, %v4517_v46  ;;  %v5531_v56 = vsel %vm1362_vm11, %v4515_v39, %v1370_v45  ;;  %vm1364_vm13 = vcmp.ge.f32.partialorder %v4517_v46, 0.0  ;;  %v3970_v39 = vld [vmem:[%s6293_s3 + $0x140] sm:$0xff]  ;;  %vm1928_vm11 = vcmask 91136  }
 0x1c6   : > { %vm1365_vm12 = vcmp.ge.f32.partialorder %v4518_v48, 0.0  ;;  %v1373_v51 = vmul.f32 0.01, %v4518_v48  ;;  %v1379_v52 = vsel %vm1363_vm10, %v4516_v41, %v1371_v49  ;;  %v4425_v40 = vpack.c.bf16 %v3970_v39, %v3969_v38  ;;  %v3971_v41 = vld [vmem:[%s6293_s3 + $0x148] sm:$0xff]  ;;  %v4733_v39 = vld [vmem:[%s6295_s5 + $0x54] ss:$8 sps:$4 sm:$0xff]  }
 0x1c7   : > { %3947 = vmatprep.mubr.msk.f32.mxu1 %vm1407_vm9, %v1379_v52  ;;  %v5545_v5 = vsel %vm1364_vm13, %v4517_v46, %v1372_v55  ;;  %vm1798_vm10 = vcmask 107520   ;;  %vm1942_vm13 = vcmask 205920  }
 0x1c8   : > { %1485 = vmatmul.mubr.f32.vlgmr.msra.gmra.mrb[0].mxu1 %v5531_v56  ;;  %v1353_v57 = vpop.f32.mrb[4].mxu0  ;;  %v5534_v58 = vsel %vm1365_vm12, %v4518_v48, %v1373_v51  ;;  %vm1924_vm12 = vcmask 97280  }
 0x1c9   : > { %4399 = vmatpush1.bf16.msra.mxu1 %v4398_v50  ;;  %v4519_v59 = vadd.f32 %v1353_v57, %v942_v36  ;;  %3948 = vmatprep.mubr.msk.f32.mxu1 %vm1407_vm9, %v5534_v58  ;;  %v1355_v60 = vpop.f32.mrb[5].mxu0 }
 0x1ca   : > { %v4520_v62 = vadd.f32 %v1355_v60, %v946_v37  ;;  %v1357_v63 = vpop.f32.mrb[6].mxu0  ;;  %4400 = vmatprep.subr.bf16.mxu1 %v4912_v31 }
 0x1cb   : > { %v1374_v2 = vmul.f32 0.01, %v4519_v59  ;;  %v4521_v3 = vadd.f32 %v1357_v63, %v942_v36  ;;  %v1359_v4 = vpop.f32.mrb[7].mxu0  ;;  %vm1366_vm15 = vcmp.ge.f32.partialorder %v4519_v59, 0.0  ;;  %v3968_v36 = vld [vmem:[%s6293_s3 + $0x130] sm:$0xff] }
 0x1cc   : > { %vm1367_vm14 = vcmp.ge.f32.partialorder %v4520_v62, 0.0  ;;  %v1375_v6 = vmul.f32 0.01, %v4520_v62  ;;  %v4522_v7 = vadd.f32 %v1359_v4, %v946_v37  ;;  %1490 = vmatmul.mubr.f32.gmra.mrb[2].mxu1 %v5545_v5  ;;  %v4422_v37 = vpack.c.bf16 %v3968_v36, %v3967_v34  ;;  %v4730_v34 = vld [vmem:[%s6295_s5 + $0x44] ss:$8 sps:$4 sm:$0xff]  }
 0x1cd   : > { %4402 = vmatpush1.bf16.msra.mxu1 %v4401_v61  ;;  %v1376_v13 = vmul.f32 0.01, %v4521_v3  ;;  %v1382_v14 = vsel %vm1366_vm15, %v4519_v59, %v1374_v2  ;;  %vm1368_vm2 = vcmp.ge.f32.partialorder %v4521_v3, 0.0  ;;  %v3979_v2 = vld [vmem:[%s6294_s4 + $0x10] sm:$0xff]  ;;  %vm1812_vm15 = vcmask 222320  }
 0x1ce   : > { %vm1369_vm1 = vcmp.ge.f32.partialorder %v4522_v7, 0.0  ;;  %v1377_v9 = vmul.f32 0.01, %v4522_v7  ;;  %4403 = vmatprep.subr.bf16.mxu1 %v4912_v31  ;;  %v1383_v10 = vsel %vm1367_vm14, %v4520_v62, %v1375_v6  ;;  %vm1940_vm14 = vcmask 212064  }
 0x1cf   : > { %3949 = vmatprep.mubr.msk.f32.mxu1 %vm1407_vm9, %v1383_v10  ;;  %v1384_v19 = vsel %vm1368_vm2, %v4521_v3, %v1376_v13  ;;  %v3980_v3 = vld [vmem:[%s6294_s4 + $0x18] sm:$0x3f]  ;;  %vm1956_vm2 = vcmask 320720  }
 0x1d0   : > { %1495 = vmatmul.mubr.f32.gmra.mrb[4].mxu1 %v1382_v14  ;;  %v1385_v15 = vsel %vm1369_vm1, %v4522_v7, %v1377_v9  ;;  %vm1810_vm1 = vcmask 228464  }
 0x1d1   : > { %4405 = vmatpush1.bf16.msra.mxu1 %v4404_v8  ;;  %3950 = vmatprep.mubr.msk.f32.mxu1 %vm1407_vm9, %v1385_v15 }
 0x1d2   : > { %4406 = vmatprep.subr.bf16.mxu1 %v4912_v31 }
 0x1d4   : > { %1500 = vmatmul.mubr.f32.gmra.mrb[6].mxu1 %v1384_v19 }
 0x1d5   : > { %4408 = vmatpush1.bf16.msra.mxu1 %v4407_v16  ;;  %3972 = vmatprep.mubr.msk.f32.mxu1 %vm1407_vm9, %v1379_v52 }
 0x1d6   : > { %4409 = vmatprep.subr.bf16.mxu1 %v4912_v31 }
 0x1d9   : > { %4411 = vmatpush1.bf16.msra.mxu1 %v4410_v20  ;;  %v4721_v20 = vld [vmem:[%s6295_s5 + $0x14] ss:$8 sps:$4 sm:$0xff]  }
 0x1da   : > { %4412 = vmatprep.subr.bf16.mxu1 %v4912_v31 }
 0x1dd   : > { %4414 = vmatpush1.bf16.msra.mxu1 %v4413_v23  ;;  %v4724_v23 = vld [vmem:[%s6295_s5 + $0x24] ss:$8 sps:$4 sm:$0xff]  }
 0x1de   : > { %4415 = vmatprep.subr.bf16.mxu1 %v4912_v31 }
 0x1e1   : > { %4417 = vmatpush1.bf16.msra.mxu1 %v4416_v26 }
 0x1e2   : > { %4418 = vmatprep.subr.bf16.mxu1 %v4912_v31 }
 0x1e5   : > { %4420 = vmatpush1.bf16.msra.mxu1 %v4419_v30 }
 0x1e6   : > { %4421 = vmatprep.subr.bf16.mxu1 %v4912_v31 }
 0x1e9   : > { %4423 = vmatpush1.bf16.msra.mxu1 %v4422_v37  ;;  %v4728_v37 = vld [vmem:[%s6295_s5 + $0x40] ss:$8 sps:$4 sm:$0xff]  }
 0x1ea   : > { %4424 = vmatprep.subr.bf16.mxu1 %v4912_v31 }
 0x1ed   : > { %4426 = vmatpush1.bf16.msra.mxu1 %v4425_v40  ;;  %v4731_v40 = vld [vmem:[%s6295_s5 + $0x50] ss:$8 sps:$4 sm:$0xff]  }
 0x1ee   : > { %1567 = vmatprep.subr.mxu1 %v4913_v28 }
 0x1f1   : > { %1568 = vmatpush1.msra.mxu1 %v3971_v41 }
 0x1f2   : > { %1592 = vmatmul.mubr.f32.vlgmr.msra.gmra.mrb[8].mxu1 %v5531_v56 }
 0x1f3   : > { %3973 = vmatprep.mubr.msk.f32.mxu1 %vm1407_vm9, %v5534_v58 }
 0x1f6   : > { %1597 = vmatmul.mubr.f32.gmra.mrb[10].mxu1 %v5545_v5 }
 0x1f7   : > { %3974 = vmatprep.mubr.msk.f32.mxu1 %vm1407_vm9, %v1383_v10 }
 0x1fa   : > { %1602 = vmatmul.mubr.f32.gmra.mrb[12].mxu1 %v1382_v14 }
 0x1fb   : > { %3975 = vmatprep.mubr.msk.f32.mxu1 %vm1407_vm9, %v1385_v15  ;;  %vm1796_vm9 = vcmask 113664  }
 0x1fe   : > { %1607 = vmatmul.mubr.f32.gmra.mrb[14].mxu1 %v1384_v19  ;;  %v4718_v19 = vld [vmem:[%s6295_s5 + $0x4] ss:$8 sps:$4 sm:$0xff]  }
 0x1ff   : > { %4209 = vmatprep.mubr.msk.f32.mxu1 %vm1618_vm3, %v1616_v42  ;;  %v4736_v42 = vld [vmem:[%s6295_s5 + $0x64] ss:$8 sps:$4 sm:$0xff]  }
 0x29b   : > { %v1486_v43 = vpop.f32.mrb[0].mxu1 }
 0x29c   : > { %v1488_v44 = vpop.f32.mrb[1].mxu1 }
 0x29f   : > { %v1491_v45 = vpop.f32.mrb[2].mxu1 }
 0x2a0   : > { %v1493_v46 = vpop.f32.mrb[3].mxu1 }
 0x2a1   : > { %v4737_v46 = vld [vmem:[%s6295_s5 + $0x70] ss:$8 sps:$4 sm:$0xff]  }
 0x2a3   : > { %v1496_v47 = vpop.f32.mrb[4].mxu1 }
 0x2a4   : > { %v1498_v48 = vpop.f32.mrb[5].mxu1 }
 0x2a5   : > { %v4742_v48 = vld [vmem:[%s6295_s5 + $0x84] ss:$8 sps:$4 sm:$0xff]  }
 0x2a7   : > { %v1501_v49 = vpop.f32.mrb[6].mxu1 }
 0x2a8   : > { %v1503_v50 = vpop.f32.mrb[7].mxu1 }
 0x2c5   : > { %v1593_v51 = vpop.f32.mrb[8].mxu1 }
 0x2c6   : > { %v1612_v52 = vmax.f32 %v1486_v43, %v1593_v51  ;;  %v1595_v53 = vpop.f32.mrb[9].mxu1  ;;  %v4734_v43 = vld [vmem:[%s6295_s5 + $0x60] ss:$8 sps:$4 sm:$0xff]   ;;  %v4745_v51 = vld [vmem:[%s6295_s5 + $0x94] ss:$8 sps:$4 sm:$0xff]  }
 0x2c9   : > { %v1598_v54 = vpop.f32.mrb[10].mxu1 }
 0x2ca   : > { %v1613_v55 = vmax.f32 %v1491_v45, %v1598_v54  ;;  %v1600_v56 = vpop.f32.mrb[11].mxu1  ;;  %v4739_v45 = vld [vmem:[%s6295_s5 + $0x74] ss:$8 sps:$4 sm:$0xff]   ;;  %v4748_v54 = vld [vmem:[%s6295_s5 + $0xa4] ss:$8 sps:$4 sm:$0xff]  }
 0x2cc   : > { %v4427_v57 = vpack.c.bf16 %v1613_v55, %v1612_v52  ;;  %v4743_v52 = vld [vmem:[%s6295_s5 + $0x90] ss:$8 sps:$4 sm:$0xff]   ;;  %v4746_v55 = vld [vmem:[%s6295_s5 + $0xa0] ss:$8 sps:$4 sm:$0xff]  }
 0x2cd   : > { %v1603_v58 = vpop.f32.mrb[12].mxu1 }
 0x2ce   : > { %v1614_v59 = vmax.f32 %v1496_v47, %v1603_v58  ;;  %v1605_v60 = vpop.f32.mrb[13].mxu1  ;;  %4428 = vmatprep.subr.bf16.mxu1 %v4427_v57  ;;  %v4749_v58 = vld [vmem:[%s6295_s5 + $0xb0] ss:$8 sps:$4 sm:$0xff]  }
 0x2cf   : > { %4430 = vmatpush3.bf16.msra.mxu1 %v4427_v57  ;;  %v4754_v60 = vld [vmem:[%s6295_s5 + $0xc4] ss:$8 sps:$4 sm:$0xff]  }
 0x2d1   : > { %v1608_v61 = vpop.f32.mrb[14].mxu1 }
 0x2d2   : > { %v1615_v62 = vmax.f32 %v1501_v49, %v1608_v61  ;;  %v1610_v63 = vpop.f32.mrb[15].mxu1  ;;  %v4740_v49 = vld [vmem:[%s6295_s5 + $0x80] ss:$8 sps:$4 sm:$0xff]  }
 0x2d3   : > { %v4752_v61 = vld [vmem:[%s6295_s5 + $0xc0] ss:$8 sps:$4 sm:$0xff]   ;;  %v4757_v63 = vld [vmem:[%s6295_s5 + $0xd4] ss:$8 sps:$4 sm:$0xff]  }
 0x2d4   : > { %v4431_v0 = vpack.c.bf16 %v1615_v62, %v1614_v59 }
 0x2d6   : > { %4433 = vmatprep.subr.msk.bf16.mxu1 %vm4432_vm6, %v4431_v0 }
 0x2d7   : > { %4436 = vmatpush3.bf16.msk.msra.mxu1 %vm4432_vm6, %v4431_v0 }
 0x2d8   : > { %4438 = vmatprep.subr.bf16.mxu1 %v4427_v57 }
 0x2da   : > { %4210 = vmatmul.mubr.msk.f32.vlgmr.msra.gmra.mrb[16].mxu1 %vm1618_vm3, %v1617_v1 }
 0x2db   : > { %4440 = vmatpush3.bf16.msra.mxu1 %v4427_v57  ;;  %4220 = vmatprep.mubr.msk.f32.mxu1 %vm1618_vm3, %v3979_v2  ;;  %v4751_v57 = vld [vmem:[%s6295_s5 + $0xb4] ss:$8 sps:$4 sm:$0xff]   ;;  %v4760_v2 = vld [vmem:[%s6295_s5 + $0xe4] ss:$8 sps:$4 sm:$0xff]  }
 0x2dc   : > { %4443 = vmatprep.subr.msk.bf16.mxu1 %vm4432_vm6, %v4431_v0 }
 0x2df   : > { %4446 = vmatpush3.bf16.msk.msra.mxu1 %vm4432_vm6, %v4431_v0  ;;  %v4755_v0 = vld [vmem:[%s6295_s5 + $0xd0] ss:$8 sps:$4 sm:$0xff]   ;;  %vm1824_vm6 = vcmask 343264  }
 0x2e0   : > { %2571 = vmatprep.subr.bf16.mxu1 %v4718_v19 }
 0x2e2   : > { %4221 = vmatmul.mubr.msk.f32.vlgmr.msra.gmra.mrb[18].mxu1 %vm1618_vm3, %v3980_v3  ;;  %v4758_v3 = vld [vmem:[%s6295_s5 + $0xe0] ss:$8 sps:$4 sm:$0xff]   ;;  %vm1954_vm3 = vcmask 326864  }
 0x2e3   : > { %2572 = vmatpush1.bf16.msra.mxu1 %v4716_v17 }
 0x2e4   : > { %2573 = vmatprep.subr.bf16.mxu1 %v4721_v20 }
 0x2e7   : > { %2574 = vmatpush1.bf16.msra.mxu1 %v4719_v21 }
 0x2e8   : > { %2575 = vmatprep.subr.bf16.mxu1 %v4724_v23  ;;  %v2670_v23 = vld [vmem:[%s6297_s7 + $0x8] sm:$0xff] }
 0x2eb   : > { %2576 = vmatpush1.bf16.msra.mxu1 %v4722_v25 }
 0x2ec   : > { %2577 = vmatprep.subr.bf16.mxu1 %v4727_v27 }
 0x2ef   : > { %2578 = vmatpush1.bf16.msra.mxu1 %v4725_v29  ;;  %v2673_v29 = vld [vmem:[%s6297_s7 + $0x20] sm:$0xff] }
 0x2f0   : > { %2579 = vmatprep.subr.bf16.mxu1 %v4730_v34 }
 0x2f3   : > { %2580 = vmatpush1.bf16.msra.mxu1 %v4728_v37  ;;  %v2675_v37 = vld [vmem:[%s6297_s7 + $0x30] sm:$0xff] }
 0x2f4   : > { %2581 = vmatprep.subr.bf16.mxu1 %v4733_v39 }
 0x2f7   : > { %2582 = vmatpush1.bf16.msra.mxu1 %v4731_v40 }
 0x2f8   : > { %2583 = vmatprep.subr.bf16.mxu1 %v4736_v42  ;;  %v2677_v42 = vld [vmem:[%s6297_s7 + $0x40] sm:$0xff] }
 0x2fb   : > { %2584 = vmatpush1.bf16.msra.mxu1 %v4734_v43  ;;  %v2678_v43 = vld [vmem:[%s6297_s7 + $0x48] sm:$0xff] }
 0x2fc   : > { %2585 = vmatprep.subr.bf16.mxu1 %v4739_v45  ;;  %v4460_v45 = vpack.c.bf16 %v2678_v43, %v2677_v42  ;;  %v4770_v43 = vld [vmem:[%s6295_s5 + $0x120] ss:$8 sps:$4 sm:$0xff]  }
 0x2ff   : > { %2586 = vmatpush1.bf16.msra.mxu1 %v4737_v46 }
 0x300   : > { %2587 = vmatprep.subr.bf16.mxu1 %v4742_v48  ;;  %v2680_v48 = vld [vmem:[%s6297_s7 + $0x58] sm:$0xff] }
 0x303   : > { %2588 = vmatpush1.bf16.msra.mxu1 %v4740_v49 }
 0x304   : > { %2589 = vmatprep.subr.bf16.mxu1 %v4745_v51 }
 0x307   : > { %2590 = vmatpush1.bf16.msra.mxu1 %v4743_v52  ;;  %v2681_v52 = vld [vmem:[%s6297_s7 + $0x60] sm:$0xff] }
 0x308   : > { %2591 = vmatprep.subr.bf16.mxu1 %v4748_v54 }
 0x30b   : > { %2592 = vmatpush1.bf16.msra.mxu1 %v4746_v55 }
 0x30c   : > { %2593 = vmatprep.subr.bf16.mxu1 %v4751_v57  ;;  %v2683_v57 = vld [vmem:[%s6297_s7 + $0x70] sm:$0xff] }
 0x30f   : > { %2594 = vmatpush1.bf16.msra.mxu1 %v4749_v58  ;;  %v2684_v58 = vld [vmem:[%s6297_s7 + $0x78] sm:$0xff] }
 0x310   : > { %2595 = vmatprep.subr.bf16.mxu1 %v4754_v60  ;;  %v4469_v60 = vpack.c.bf16 %v2684_v58, %v2683_v57 }
 0x313   : > { %2596 = vmatpush1.bf16.msra.mxu1 %v4752_v61 }
 0x314   : > { %2597 = vmatprep.subr.bf16.mxu1 %v4757_v63 }
 0x317   : > { %2598 = vmatpush1.bf16.msra.mxu1 %v4755_v0 }
 0x318   : > { %2599 = vmatprep.subr.bf16.mxu1 %v4760_v2 }
 0x31b   : > { %2600 = vmatpush1.bf16.msra.mxu1 %v4758_v3 }
 0x3ad   : > { %v4211_v4 = vpop.f32.mrb[16].mxu1 }
 0x3ae   : > { %v1695_v5 = vpop.f32.mrb[17].mxu1 }
 0x3b5   : > { %v4222_v6 = vpop.f32.mrb[18].mxu1 }
 0x3b6   : > { %v1789_v7 = vmax.f32 %v4211_v4, %v4222_v6  ;;  %v1779_v8 = vpop.f32.mrb[19].mxu1  ;;  %v4761_v6 = vld [vmem:[%s6295_s5 + $0xf0] ss:$8 sps:$4 sm:$0xff]  }
 0x3b7   : > { %v1788_v9 = vmax.f32 %v1695_v5, %v1779_v8  ;;  %v4763_v5 = vld [vmem:[%s6295_s5 + $0xf4] ss:$8 sps:$4 sm:$0xff]   ;;  %v4766_v8 = vld [vmem:[%s6295_s5 + $0x104] ss:$8 sps:$4 sm:$0xff]  }
 0x3b8   : > { %1793 = vst.msk [vmem:[#allocation3 + $0x8] sm:$0x3f] %vm1792_vm7, %v1789_v7  ;;  %2601 = vmatprep.subr.bf16.mxu1 %v4763_v5  ;;  %vm1970_vm7 = vcmask 435520  }
 0x3b9   : > { %1791 = vst.msk [vmem:[#allocation3] sm:$0xff] %vm1790_vm8, %v1788_v9  ;;  %2602 = vmatpush1.bf16.msra.mxu1 %v4761_v6  ;;  %vm1968_vm8 = vcmask 441664  }
 0x3ba   : > { %2614 = vmatprep.subr.bf16.mxu1 %v4766_v8 }
 0x3bf   : > { %v1913_v10 = vld [vmem:[#allocation3 + $0xc] sm:$0x3]  ;;  %v1931_v13 = vld [vmem:[#allocation3 + $0x8] sm:$0x3]  ;;  %v1815_v22 = vld [vmem:[#allocation3 + $0xa] sm:$0x3] }
 0x3c0   : > { %1918 = vrot.lane.b32.xlu1 %v1913_v10, %s4915_s19  ;;  %v5628_v11 = vld [vmem:[#allocation3 + $0x4] sm:$0xff]  ;;  %v1843_v41 = vld [vmem:[#allocation3 + $0xc] sm:$0x3] }
 0x3c1   : > { %v5630_v12 = vld [vmem:[#allocation3] sm:$0xff]  ;;  %1916 = vrot.lane.b32.xlu0 %v5628_v11, %s4915_s19  ;;  %v1801_v14 = vld [vmem:[#allocation3 + $0x9] sm:$0x3]  ;;  %v1829_v30 = vld [vmem:[#allocation3 + $0xb] sm:$0x3] }
 0x3c2   : > { %1797 = vst.msk [vmem:[#allocation4] sm:$0xff] %vm1796_vm9, %v5630_v12  ;;  %v5635_v15 = vld [vmem:[#allocation3 + $0x1] sm:$0xff]  ;;  %v1945_v18 = vld [vmem:[#allocation3 + $0x9] sm:$0x3]  ;;  %v1973_v38 = vld [vmem:[#allocation3 + $0xb] sm:$0x3] }
 0x3c3   : > { %v1795_v16 = vld [vmem:[#allocation3 + $0x8] sm:$0x3]  ;;  %v1959_v26 = vld [vmem:[#allocation3 + $0xa] sm:$0x3]  ;;  %v1987_v44 = vld [vmem:[#allocation3 + $0xc] sm:$0x3] }
 0x3c4   : > { %1936 = vrot.lane.b32.xlu1 %v1931_v13, %s4915_s19  ;;  %1799 = vst.msk [vmem:[#allocation4 + $0x20] sm:$0x3] %vm1798_vm10, %v1795_v16  ;;  %v5654_v24 = vld [vmem:[#allocation3 + $0x2] sm:$0xff]  ;;  %v1885_v59 = vld [vmem:[#allocation3 + $0xa] sm:$0x3]  ;;  %vm1840_vm9 = vcmask 451920  }
 0x3c5   : > { %1934 = vrot.lane.b32.xlu0 %v5630_v12, %s4915_s19  ;;  %v5670_v36 = vld [vmem:[#allocation3 + $0x3] sm:$0xff]  ;;  %s4922_s19 = smov 56   ;;  %v1899_v1 = vld [vmem:[#allocation3 + $0xb] sm:$0x3]  ;;  %vm1838_vm10 = vcmask 458064  }
 0x3c6   : > { %v1857_v47 = vld [vmem:[#allocation3 + $0x8] sm:$0x3]  ;;  %v2029_v62 = vld [vmem:[#allocation3 + $0xa] sm:$0x3]  ;;  %v2061_v7 = vld [vmem:[#allocation3 + $0xc] sm:$0x3] }
 0x3c7   : > { %v2001_v50 = vld [vmem:[#allocation3 + $0x8] sm:$0x3]  ;;  %v2043_v4 = vld [vmem:[#allocation3 + $0xb] sm:$0x3] }
 0x3c8   : > { %1806 = vrot.lane.b32.xlu1 %v1801_v14, %s4916_s20  ;;  %v1871_v53 = vld [vmem:[#allocation3 + $0x9] sm:$0x3]  ;;  %v2117_v14 = vld [vmem:[#allocation3 + $0xb] sm:$0x3] }
 0x3c9   : > { %1804 = vrot.lane.b32.xlu0 %v5635_v15, %s4916_s20  ;;  %s4920_s20 = smov 42   ;;  %v2015_v56 = vld [vmem:[#allocation3 + $0x9] sm:$0x3]  ;;  %v2131_v16 = vld [vmem:[#allocation3 + $0xc] sm:$0x3] }
 0x3ca   : > { %v2075_v9 = vld [vmem:[#allocation3 + $0x8] sm:$0x3]  ;;  %v2103_v13 = vld [vmem:[#allocation3 + $0xa] sm:$0x3]  ;;  %v2205_v21 = vld [vmem:[#allocation3 + $0xc] sm:$0x3] }
 0x3cb   : > { %v2089_v10 = vld [vmem:[#allocation3 + $0x9] sm:$0x3]  ;;  %v2191_v19 = vld [vmem:[#allocation3 + $0xb] sm:$0x3] }
 0x3cc   : > { %1950 = vrot.lane.b32.xlu1 %v1945_v18, %s4917_s29  ;;  %v2173_v17 = vld [vmem:[#allocation3 + $0xa] sm:$0x3]  ;;  %v2145_v18 = vld [vmem:[#allocation3 + $0x8] sm:$0x3] }
 0x3cd   : > { %1948 = vrot.lane.b32.xlu0 %v5635_v15, %s4917_s29  ;;  %s4921_s29 = smov 26   ;;  %v2159_v20 = vld [vmem:[#allocation3 + $0x9] sm:$0x3] }
 0x3d0   : > { %1820 = vrot.lane.b32.xlu1 %v1815_v22, %s4918_s21  ;;  %v2669_v22 = vld [vmem:[%s6297_s7] sm:$0xff] }
 0x3d1   : > { %1818 = vrot.lane.b32.xlu0 %v5654_v24, %s4918_s21  ;;  %s4925_s21 = smov 54  }
 0x3d4   : > { %1964 = vrot.lane.b32.xlu1 %v1959_v26, %s4919_s30 }
 0x3d5   : > { %1962 = vrot.lane.b32.xlu0 %v5654_v24, %s4919_s30  ;;  %s4926_s30 = smov 84  }
 0x3d8   : > { %1834 = vrot.lane.b32.xlu1 %v1829_v30, %s4920_s20  ;;  %v2674_v30 = vld [vmem:[%s6297_s7 + $0x28] sm:$0xff] }
 0x3d9   : > { %1832 = vrot.lane.b32.xlu0 %v5670_v36, %s4920_s20  ;;  %s4927_s20 = smov 68   ;;  %v4454_v34 = vpack.c.bf16 %v2674_v30, %v2673_v29 }
 0x3dc   : > { %1978 = vrot.lane.b32.xlu1 %v1973_v38, %s4921_s29  ;;  %v2676_v38 = vld [vmem:[%s6297_s7 + $0x38] sm:$0xff] }
 0x3dd   : > { %1976 = vrot.lane.b32.xlu0 %v5670_v36, %s4921_s29  ;;  %s4930_s29 = smov 110   ;;  %v4457_v40 = vpack.c.bf16 %v2676_v38, %v2675_v37 }
 0x3e0   : > { %1848 = vrot.lane.b32.xlu1 %v1843_v41, %s4922_s19 }
 0x3e1   : > { %1846 = vrot.lane.b32.xlu0 %v5628_v11, %s4922_s19 }
 0x3e4   : > { %1992 = vrot.lane.b32.xlu1 %v1987_v44, %s4923_s22 }
 0x3e5   : > { %1990 = vrot.lane.b32.xlu0 %v5628_v11, %s4923_s22 }
 0x3e8   : > { %1862 = vrot.lane.b32.xlu1 %v1857_v47, %s4922_s19  ;;  %v2679_v47 = vld [vmem:[%s6297_s7 + $0x50] sm:$0xff] }
 0x3e9   : > { %1860 = vrot.lane.b32.xlu0 %v5630_v12, %s4922_s19  ;;  %s4928_s19 = smov 98  }
 0x3ec   : > { %2006 = vrot.lane.b32.xlu1 %v2001_v50, %s4923_s22  ;;  %v4463_v50 = vpack.c.bf16 %v2680_v48, %v2679_v47  ;;  %v4773_v47 = vld [vmem:[%s6295_s5 + $0x130] ss:$8 sps:$4 sm:$0xff]   ;;  %v4778_v48 = vld [vmem:[%s6295_s5 + $0x144] ss:$8 sps:$4 sm:$0xff]  }
 0x3ed   : > { %2004 = vrot.lane.b32.xlu0 %v5630_v12, %s4923_s22  ;;  %s4929_s22 = smov 82  }
 0x3f0   : > { %1876 = vrot.lane.b32.xlu1 %v1871_v53, %s4924_s0  ;;  %v2682_v53 = vld [vmem:[%s6297_s7 + $0x68] sm:$0xff] }
 0x3f1   : > { %1874 = vrot.lane.b32.xlu0 %v5635_v15, %s4924_s0  ;;  %s4933_s0 = smov 24   ;;  %v4466_v55 = vpack.c.bf16 %v2682_v53, %v2681_v52  ;;  %v4781_v52 = vld [vmem:[%s6295_s5 + $0x154] ss:$8 sps:$4 sm:$0xff]  }
 0x3f4   : > { %2020 = vrot.lane.b32.xlu1 %v2015_v56, %s4925_s21 }
 0x3f5   : > { %2018 = vrot.lane.b32.xlu0 %v5635_v15, %s4925_s21  ;;  %s3773_s21 = scalar_lea.sflag [#allocation6], %s539_s17 }
 0x3f8   : > { %1890 = vrot.lane.b32.xlu1 %v1885_v59, %s4926_s30 }
 0x3f9   : > { %1888 = vrot.lane.b32.xlu0 %v5654_v24, %s4926_s30  ;;  %s4932_s30 = smov 10  }
 0x3fc   : > { %2034 = vrot.lane.b32.xlu1 %v2029_v62, %s4927_s20 }
 0x3fd   : > { %2032 = vrot.lane.b32.xlu0 %v5654_v24, %s4927_s20 }
 0x400   : > { %1904 = vrot.lane.b32.xlu1 %v1899_v1, %s4928_s19 }
 0x401   : > { %1902 = vrot.lane.b32.xlu0 %v5670_v36, %s4928_s19  ;;  %s4931_s19 = smov 124  }
 0x404   : > { %2048 = vrot.lane.b32.xlu1 %v2043_v4, %s4929_s22 }
 0x405   : > { %2046 = vrot.lane.b32.xlu0 %v5670_v36, %s4929_s22 }
 0x408   : > { %2066 = vrot.lane.b32.xlu1 %v2061_v7, %s4911_s18 }
 0x409   : > { %2064 = vrot.lane.b32.xlu0 %v5628_v11, %s4911_s18 }
 0x40c   : > { %2080 = vrot.lane.b32.xlu1 %v2075_v9, %s4911_s18 }
 0x40d   : > { %2078 = vrot.lane.b32.xlu0 %v5630_v12, %s4911_s18  ;;  %s4934_s18 = smov 52  }
 0x410   : > { %2094 = vrot.lane.b32.xlu1 %v2089_v10, %s4930_s29 }
 0x411   : > { %2092 = vrot.lane.b32.xlu0 %v5635_v15, %s4930_s29  ;;  %s4849_s29 = sshll.u32 %s4939_s26, 4  ;;  %s4850_s29 = int_to_ptr.vmem [resolvable:$false] %s4849_s29 }
 0x414   : > { %2108 = vrot.lane.b32.xlu1 %v2103_v13, %s4931_s19 }
 0x415   : > { %2106 = vrot.lane.b32.xlu0 %v5654_v24, %s4931_s19  ;;  %s4937_s19 = smov 80  }
 0x418   : > { %2122 = vrot.lane.b32.xlu1 %v2117_v14, %s4932_s30 }
 0x419   : > { %2120 = vrot.lane.b32.xlu0 %v5670_v36, %s4932_s30  ;;  %s540_s30 = scalar_lea.vmem [#allocation5], %s539_s17 }
 0x41c   : > { %2136 = vrot.lane.b32.xlu1 %v2131_v16, %s4933_s0 }
 0x41d   : > { %2134 = vrot.lane.b32.xlu0 %v5628_v11, %s4933_s0 }
 0x420   : > { %2178 = vrot.lane.b32.xlu1 %v2173_v17, %s4934_s18 }
 0x421   : > { %2176 = vrot.lane.b32.xlu0 %v5654_v24, %s4934_s18  ;;  %v4448_v24 = vpack.c.bf16 %v2670_v23, %v2669_v22  ;;  %s4851_s18 = scalar_lea.vmem %s4850_s29, 32 }
 0x423   : > { %4449 = vmatpush1.bf16.msra.mxu0 %v4448_v24 }
 0x424   : > { %2150 = vrot.lane.b32.xlu1 %v2145_v18, %s4933_s0  ;;  %4450 = vmatprep.subr.bf16.mxu0 %v4912_v31 }
 0x425   : > { %2148 = vrot.lane.b32.xlu0 %v5630_v12, %s4933_s0  ;;  %v2671_v12 = vld [vmem:[%s6297_s7 + $0x10] sm:$0xff]  ;;  %s3785_s0 = sshll.u32 %s540_s30, 4  ;;  %s6250_s0 = int_to_ptr.vmem [resolvable:$true] %s3785_s0 }
 0x426   : > { %p4852_p0 = scmp.lt.s32.totalorder %s6250_s0, %s4850_s29 }
 0x428   : > { %2196 = vrot.lane.b32.xlu1 %v2191_v19, %s4935_s24 }
 0x429   : > { %2194 = vrot.lane.b32.xlu0 %v5670_v36, %s4935_s24 }
 0x42c   : > { %2164 = vrot.lane.b32.xlu1 %v2159_v20, %s4936_s27 }
 0x42d   : > { %2162 = vrot.lane.b32.xlu0 %v5635_v15, %s4936_s27  ;;  %v2672_v15 = vld [vmem:[%s6297_s7 + $0x18] sm:$0xff]  ;;  %s6329_s27 = sld [smem:[#allocation16_spill]] }
 0x42e   : > { %v4451_v26 = vpack.c.bf16 %v2672_v15, %v2671_v12 }
 0x430   : > { %2210 = vrot.lane.b32.xlu1 %v2205_v21, %s4937_s19  ;;  %4452 = vmatpush1.bf16.msra.mxu0 %v4451_v26 }
 0x431   : > { %2208 = vrot.lane.b32.xlu0 %v5628_v11, %s4937_s19  ;;  %4453 = vmatprep.subr.bf16.mxu0 %v4912_v31  ;;  %s4123_s19 = sshll.u32 %s5051_s28, 4  ;;  %s4845_s28 = scalar_lea.vmem %s6250_s0, 16 }
 0x432   : > { %v5783_v25 = vpop.permute.xlu1 %1918  ;;  %p4846_p11 = scmp.ne.s32.totalorder %s6250_s0, %s4845_s28  ;;  %p4853_p1 = scmp.lt.s32.totalorder %s4851_s18, %s4845_s28 }
 0x433   : > { %1929 = vst.msk [vmem:[#allocation4 + $0x28] sm:$0x3] %vm1928_vm11, %v5783_v25  ;;  %v5786_v27 = vpop.permute.xlu0 %1916  ;;  %vm1984_vm11 = vcmask 550320   ;;  %s6330_s22 = smov %s6329_s27  ;;  %s6248_s20 = scalar_lea.hbm %s6329_s27, %s4123_s19 }
 0x434   : > { %1925 = vst.msk [vmem:[#allocation4 + $0x8] sm:$0xff] %vm1924_vm12, %v5786_v27  ;;  %4455 = vmatpush1.bf16.msra.mxu0 %v4454_v34  ;;  %vm1982_vm12 = vcmask 556464   ;;  %p4847_p12 = pnand %p4846_p11, %p5068_p5  ;;  %p4854_p2 = por %p4853_p1, %p4852_p0 }
 0x435   : > { %4456 = vmatprep.subr.bf16.mxu0 %v4912_v31 }
 0x436   : > { %v1937_v11 = vpop.permute.xlu1 %1936  ;;  %p4848_p13 = pneg %p4847_p12 }
 0x437   : > { %1943 = vst.msk [vmem:[#allocation4 + $0x28] sm:$0x3] %vm1942_vm13, %v1937_v11  ;;  %v1935_v36 = vpop.permute.xlu0 %1934  ;;  %vm1854_vm13 = vcmask 566720   ;;  %v4764_v11 = vld [vmem:[%s6295_s5 + $0x100] ss:$8 sps:$4 sm:$0xff]  }
 0x438   : > { %1941 = vst.msk [vmem:[#allocation4 + $0x8] sm:$0xff] %vm1940_vm14, %v1935_v36  ;;  %4458 = vmatpush1.bf16.msra.mxu0 %v4457_v40  ;;  %vm1852_vm14 = vcmask 572864   ;;  %v4769_v36 = vld [vmem:[%s6295_s5 + $0x114] ss:$8 sps:$4 sm:$0xff]   ;;  %v4772_v40 = vld [vmem:[%s6295_s5 + $0x124] ss:$8 sps:$4 sm:$0xff]   ;;  %p4855_p3 = pnand %p4854_p2, %p4848_p13 }
 0x439   : > { %4459 = vmatprep.subr.bf16.mxu0 %v4912_v31 }
 0x43a   : > { %v1807_v39 = vpop.permute.xlu1 %1806 }
 0x43b   : > { %1813 = vst.msk [vmem:[#allocation4 + $0x20] sm:$0x3] %vm1812_vm15, %v1807_v39  ;;  %v1805_v41 = vpop.permute.xlu0 %1804  ;;  %vm1998_vm15 = vcmask 665120   ;;  %v4767_v39 = vld [vmem:[%s6295_s5 + $0x110] ss:$8 sps:$4 sm:$0xff]  }
 0x43c   : > { %1811 = vst.msk [vmem:[#allocation4] sm:$0xff] %vm1810_vm1, %v1805_v41  ;;  %4461 = vmatpush1.bf16.msra.mxu0 %v4460_v45  ;;  %vm1996_vm1 = vcmask 671264  }
 0x43d   : > { %4462 = vmatprep.subr.bf16.mxu0 %v4912_v31 }
 0x43e   : > { %v1951_v44 = vpop.permute.xlu1 %1950 }
 0x43f   : > { %1957 = vst.msk [vmem:[#allocation4 + $0x28] sm:$0x3] %vm1956_vm2, %v1951_v44  ;;  %v1949_v46 = vpop.permute.xlu0 %1948  ;;  %vm1868_vm2 = vcmask 681520   ;;  %v4775_v44 = vld [vmem:[%s6295_s5 + $0x134] ss:$8 sps:$4 sm:$0xff]  }
 0x440   : > { %1955 = vst.msk [vmem:[#allocation4 + $0x8] sm:$0xff] %vm1954_vm3, %v1949_v46  ;;  %4464 = vmatpush1.bf16.msra.mxu0 %v4463_v50  ;;  %vm1866_vm3 = vcmask 687664  }
 0x441   : > { %4465 = vmatprep.subr.bf16.mxu0 %v4912_v31 }
 0x442   : > { %v1821_v49 = vpop.permute.xlu1 %1820 }
 0x443   : > { %1827 = vst.msk [vmem:[#allocation4 + $0x20] sm:$0x3] %vm1826_vm4, %v1821_v49  ;;  %v1819_v51 = vpop.permute.xlu0 %1818  ;;  %vm2012_vm4 = vcmask 779920  }
 0x444   : > { %1825 = vst.msk [vmem:[#allocation4] sm:$0xff] %vm1824_vm6, %v1819_v51  ;;  %4467 = vmatpush1.bf16.msra.mxu0 %v4466_v55  ;;  %vm2010_vm6 = vcmask 786064   ;;  %v4776_v51 = vld [vmem:[%s6295_s5 + $0x140] ss:$8 sps:$4 sm:$0xff]   ;;  %v4779_v55 = vld [vmem:[%s6295_s5 + $0x150] ss:$8 sps:$4 sm:$0xff]  }
 0x445   : > { %4468 = vmatprep.subr.bf16.mxu0 %v4912_v31 }
 0x446   : > { %v1965_v54 = vpop.permute.xlu1 %1964 }
 0x447   : > { %1971 = vst.msk [vmem:[#allocation4 + $0x28] sm:$0x3] %vm1970_vm7, %v1965_v54  ;;  %v1963_v56 = vpop.permute.xlu0 %1962  ;;  %vm1882_vm7 = vcmask 796320  }
 0x448   : > { %1969 = vst.msk [vmem:[#allocation4 + $0x8] sm:$0xff] %vm1968_vm8, %v1963_v56  ;;  %4470 = vmatpush1.bf16.msra.mxu0 %v4469_v60  ;;  %vm1880_vm8 = vcmask 802464   ;;  %v4784_v56 = vld [vmem:[%s6295_s5 + $0x164] ss:$8 sps:$4 sm:$0xff]   ;;  %v4787_v60 = vld [vmem:[%s6295_s5 + $0x174] ss:$8 sps:$4 sm:$0xff]  }
 0x449   : > { %4471 = vmatprep.subr.bf16.mxu0 %v4912_v31 }
 0x44a   : > { %v1835_v59 = vpop.permute.xlu1 %1834 }
 0x44b   : > { %1841 = vst.msk [vmem:[#allocation4 + $0x20] sm:$0x3] %vm1840_vm9, %v1835_v59  ;;  %v1833_v61 = vpop.permute.xlu0 %1832  ;;  %vm2026_vm9 = vcmask 894720   ;;  %v4782_v59 = vld [vmem:[%s6295_s5 + $0x160] ss:$8 sps:$4 sm:$0xff]  }
 0x44c   : > { %1839 = vst.msk [vmem:[#allocation4] sm:$0xff] %vm1838_vm10, %v1833_v61  ;;  %vm2024_vm10 = vcmask 900864  }
 0x44e   : > { %v1979_v62 = vpop.permute.xlu1 %1978 }
 0x44f   : > { %1985 = vst.msk [vmem:[#allocation4 + $0x28] sm:$0x3] %vm1984_vm11, %v1979_v62  ;;  %v1977_v63 = vpop.permute.xlu0 %1976  ;;  %vm1896_vm11 = vcmask 911120  }
 0x450   : > { %1983 = vst.msk [vmem:[#allocation4 + $0x8] sm:$0xff] %vm1982_vm12, %v1977_v63  ;;  %vm1894_vm12 = vcmask 917264   ;;  %v4785_v63 = vld [vmem:[%s6295_s5 + $0x170] ss:$8 sps:$4 sm:$0xff]  }
 0x452   : > { %v1849_v0 = vpop.permute.xlu1 %1848 }
 0x453   : > { %1855 = vst.msk [vmem:[#allocation4 + $0x20] sm:$0x3] %vm1854_vm13, %v1849_v0  ;;  %v1847_v1 = vpop.permute.xlu0 %1846  ;;  %vm2040_vm13 = vcmask 1009520   ;;  %v4790_v0 = vld [vmem:[%s6295_s5 + $0x184] ss:$8 sps:$4 sm:$0xff]  }
 0x454   : > { %1853 = vst.msk [vmem:[#allocation4] sm:$0xff] %vm1852_vm14, %v1847_v1  ;;  %vm2038_vm14 = vcmask 1015664  }
 0x456   : > { %v1993_v2 = vpop.permute.xlu1 %1992 }
 0x457   : > { %1999 = vst.msk [vmem:[#allocation4 + $0x28] sm:$0x3] %vm1998_vm15, %v1993_v2  ;;  %v1991_v3 = vpop.permute.xlu0 %1990  ;;  %vm1910_vm15 = vcmask 1025920  }
 0x458   : > { %1997 = vst.msk [vmem:[#allocation4 + $0x8] sm:$0xff] %vm1996_vm1, %v1991_v3  ;;  %vm1926_vm1 = vcmask 1042416   ;;  %v4788_v3 = vld [vmem:[%s6295_s5 + $0x180] ss:$8 sps:$4 sm:$0xff]  }
 0x45a   : > { %v1863_v4 = vpop.permute.xlu1 %1862 }
 0x45b   : > { %1869 = vst.msk [vmem:[#allocation4 + $0x20] sm:$0x3] %vm1868_vm2, %v1863_v4  ;;  %v1861_v5 = vpop.permute.xlu0 %1860  ;;  %vm1908_vm2 = vcmask 1032064   ;;  %v4793_v4 = vld [vmem:[%s6295_s5 + $0x194] ss:$8 sps:$4 sm:$0xff]  }
 0x45c   : > { %1867 = vst.msk [vmem:[#allocation4] sm:$0xff] %vm1866_vm3, %v1861_v5  ;;  %vm1922_vm3 = vcmask 1048560  }
 0x45e   : > { %v2007_v6 = vpop.permute.xlu1 %2006 }
 0x45f   : > { %2013 = vst.msk [vmem:[#allocation4 + $0x28] sm:$0x3] %vm2012_vm4, %v2007_v6  ;;  %v2005_v7 = vpop.permute.xlu0 %2004  ;;  %vm2056_vm4 = vcmask 1042400   ;;  %v2282_v6 = vld [vmem:[%s6295_s5 + $0x1a0] sm:$0x33] }
 0x460   : > { %2011 = vst.msk [vmem:[#allocation4 + $0x8] sm:$0xff] %vm2010_vm6, %v2005_v7  ;;  %vm2058_vm6 = vcmask 74752  }
 0x462   : > { %v1877_v8 = vpop.permute.xlu1 %1876 }
 0x463   : > { %1883 = vst.msk [vmem:[#allocation4 + $0x20] sm:$0x3] %vm1882_vm7, %v1877_v8  ;;  %v1875_v9 = vpop.permute.xlu0 %1874  ;;  %vm2052_vm7 = vcmask 1048544   ;;  %v4791_v8 = vld [vmem:[%s6295_s5 + $0x190] ss:$8 sps:$4 sm:$0xff]  }
 0x464   : > { %1881 = vst.msk [vmem:[#allocation4] sm:$0xff] %vm1880_vm8, %v1875_v9  ;;  %vm2054_vm8 = vcmask 80896   ;;  %v4037_v9 = vcombine.high %v2282_v6, %v2282_v6 }
 0x466   : > { %v2021_v10 = vpop.permute.xlu1 %2020 }
 0x467   : > { %2027 = vst.msk [vmem:[#allocation4 + $0x28] sm:$0x3] %vm2026_vm9, %v2021_v10  ;;  %v2019_v13 = vpop.permute.xlu0 %2018  ;;  %vm2072_vm9 = vcmask 189520   ;;  %v4036_v10 = vcombine.low %v2282_v6, %v2282_v6  ;;  %v4059_v6 = vld [vmem:[%s6297_s7 + $0x128] sm:$0xff] }
 0x468   : > { %2025 = vst.msk [vmem:[#allocation4 + $0x8] sm:$0xff] %vm2024_vm10, %v2019_v13  ;;  %vm2070_vm10 = vcmask 195664  }
 0x46a   : > { %v1891_v14 = vpop.permute.xlu1 %1890 }
 0x46b   : > { %1897 = vst.msk [vmem:[#allocation4 + $0x20] sm:$0x3] %vm1896_vm11, %v1891_v14  ;;  %v1889_v16 = vpop.permute.xlu0 %1888  ;;  %vm2086_vm11 = vcmask 304320  }
 0x46c   : > { %1895 = vst.msk [vmem:[#allocation4] sm:$0xff] %vm1894_vm12, %v1889_v16  ;;  %vm2084_vm12 = vcmask 310464  }
 0x46e   : > { %v2035_v17 = vpop.permute.xlu1 %2034 }
 0x46f   : > { %2041 = vst.msk [vmem:[#allocation4 + $0x28] sm:$0x3] %vm2040_vm13, %v2035_v17  ;;  %v2033_v18 = vpop.permute.xlu0 %2032  ;;  %vm2100_vm13 = vcmask 419120  }
 0x470   : > { %2039 = vst.msk [vmem:[#allocation4 + $0x8] sm:$0xff] %vm2038_vm14, %v2033_v18  ;;  %vm2098_vm14 = vcmask 425264  }
 0x472   : > { %v1905_v19 = vpop.permute.xlu1 %1904 }
 0x473   : > { %1911 = vst.msk [vmem:[#allocation4 + $0x20] sm:$0x3] %vm1910_vm15, %v1905_v19  ;;  %v1903_v20 = vpop.permute.xlu0 %1902  ;;  %vm2114_vm15 = vcmask 533920  }
 0x474   : > { %1927 = vst.msk [vmem:[#allocation4 + $0x20] sm:$0x3] %vm1926_vm1, %v5783_v25  ;;  %vm2112_vm1 = vcmask 540064  }
 0x475   : > { %1909 = vst.msk [vmem:[#allocation4] sm:$0xff] %vm1908_vm2, %v1903_v20  ;;  %vm2128_vm2 = vcmask 648720  }
 0x476   : > { %1923 = vst.msk [vmem:[#allocation4] sm:$0xff] %vm1922_vm3, %v5786_v27  ;;  %v2049_v21 = vpop.permute.xlu1 %2048  ;;  %vm2126_vm3 = vcmask 654864  }
 0x477   : > { %2057 = vst.msk [vmem:[#allocation4 + $0x28] sm:$0x3] %vm2056_vm4, %v2049_v21  ;;  %v2047_v22 = vpop.permute.xlu0 %2046  ;;  %vm2142_vm4 = vcmask 763520  }
 0x478   : > { %2059 = vst.msk [vmem:[#allocation4 + $0x30] sm:$0x3] %vm2058_vm6, %v2049_v21  ;;  %vm2140_vm6 = vcmask 769664   ;;  %v2685_v21 = vld [vmem:[%s6297_s7 + $0x80] sm:$0xff] }
 0x479   : > { %2053 = vst.msk [vmem:[#allocation4 + $0x8] sm:$0xff] %vm2052_vm7, %v2047_v22  ;;  %vm2188_vm7 = vcmask 58368  }
 0x47a   : > { %2055 = vst.msk [vmem:[#allocation4 + $0x10] sm:$0xff] %vm2054_vm8, %v2047_v22  ;;  %v2067_v23 = vpop.permute.xlu1 %2066  ;;  %v2686_v22 = vld [vmem:[%s6297_s7 + $0x88] sm:$0xff] }
 0x47b   : > { %2073 = vst.msk [vmem:[#allocation4 + $0x30] sm:$0x3] %vm2072_vm9, %v2067_v23  ;;  %v2065_v12 = vpop.permute.xlu0 %2064  ;;  %v2222_v26 = vld [vmem:[#allocation4 + $0x20] sm:$0x3]  ;;  %vm2184_vm9 = vcmask 64512   ;;  %v4472_v23 = vpack.c.bf16 %v2686_v22, %v2685_v21 }
 0x47c   : > { %2071 = vst.msk [vmem:[#allocation4 + $0x10] sm:$0xff] %vm2070_vm10, %v2065_v12  ;;  %vm2156_vm10 = vcmask 878320   ;;  %v2687_v12 = vld [vmem:[%s6297_s7 + $0x90] sm:$0xff] }
 0x47d   : > { %v2218_v25 = vld [vmem:[#allocation4] sm:$0xff]  ;;  %4473 = vmatpush1.bf16.msra.mxu0 %v4472_v23 }
 0x47e   : > { %v2081_v24 = vpop.permute.xlu1 %2080  ;;  %v2223_v15 = vld [vmem:[#allocation4 + $0x28] sm:$0x3]  ;;  %v2226_v34 = vpack.c.bf16 %v2222_v26, %v2218_v25  ;;  %4474 = vmatprep.subr.bf16.mxu0 %v4912_v31  ;;  %v2283_v25 = vld [vmem:[%s6296_s6] sm:$0x3] }
 0x47f   : > { %2087 = vst.msk [vmem:[#allocation4 + $0x30] sm:$0x3] %vm2086_vm11, %v2081_v24  ;;  %v2079_v27 = vpop.permute.xlu0 %2078  ;;  %vm2154_vm11 = vcmask 884464   ;;  %v2688_v24 = vld [vmem:[%s6297_s7 + $0x98] sm:$0xff]  ;;  %v2288_v26 = vrot.slane %v2283_v25, %v941_v33 }
 0x480   : > { %v2219_v29 = vld [vmem:[#allocation4 + $0x8] sm:$0xff]  ;;  %2085 = vst.msk [vmem:[#allocation4 + $0x10] sm:$0xff] %vm2084_vm12, %v2079_v27  ;;  %vm2202_vm12 = vcmask 173120   ;;  %v2292_v27 = vrot.slane %v2283_v25, %v945_v35  ;;  %v4796_v25 = vld [vmem:[%s6299_s9] sm:$0xff]  }
 0x481   : > { %v2227_v30 = vpack.c.bf16 %v2223_v15, %v2219_v29  ;;  %v4475_v15 = vpack.c.bf16 %v2688_v24, %v2687_v12  ;;  %v2868_v24 = vld [vmem:[%s6298_s8] sm:$0x1f] }
 0x482   : > { %v2095_v37 = vpop.permute.xlu1 %2094 }
 0x483   : > { %2603 = vmatprep.mubr.bf16.mxu1 %v2227_v30  ;;  %2101 = vst.msk [vmem:[#allocation4 + $0x30] sm:$0x3] %vm2100_vm13, %v2095_v37  ;;  %v2093_v38 = vpop.permute.xlu0 %2092  ;;  %vm2200_vm13 = vcmask 179264   ;;  %4476 = vmatpush1.bf16.msra.mxu0 %v4475_v15  ;;  %v4042_v37 = vld [vmem:[%s6297_s7 + $0xa0] sm:$0xff]  ;;  %v4066_v15 = vld [vmem:[%s6298_s8 + $0x8] sm:$0x1f] }
 0x484   : > { %2604 = vmatmul.mubr.bf16.vlgmr.msra.gmra.mrb[20].mxu1 %v2226_v34  ;;  %2099 = vst.msk [vmem:[#allocation4 + $0x10] sm:$0xff] %vm2098_vm14, %v2093_v38  ;;  %vm2170_vm14 = vcmask 993120   ;;  %4477 = vmatprep.subr.bf16.mxu0 %v4912_v31  ;;  %v4043_v38 = vld [vmem:[%s6297_s7 + $0xa8] sm:$0xff] }
 0x485   : > { %2615 = vmatpush1.bf16.msra.mxu1 %v4764_v11  ;;  %v4478_v35 = vpack.c.bf16 %v4043_v38, %v4042_v37  ;;  %v4825_v37 = vld [vmem:[%s6301_s11 + $0x20] sm:$0xff]   ;;  %v4826_v38 = vld [vmem:[%s6301_s11 + $0x28] sm:$0xff]  }
 0x486   : > { %2616 = vmatprep.subr.bf16.mxu1 %v4769_v36  ;;  %v2109_v41 = vpop.permute.xlu1 %2108 }
 0x487   : > { %2115 = vst.msk [vmem:[#allocation4 + $0x30] sm:$0x3] %vm2114_vm15, %v2109_v41  ;;  %v2107_v42 = vpop.permute.xlu0 %2106  ;;  %vm2186_vm15 = vcmask 1042384  }
 0x488   : > { %2113 = vst.msk [vmem:[#allocation4 + $0x10] sm:$0xff] %vm2112_vm1, %v2107_v42  ;;  %vm2168_vm1 = vcmask 999264  }
 0x489   : > { %2617 = vmatpush1.bf16.msra.mxu1 %v4767_v39 }
 0x48a   : > { %2618 = vmatprep.subr.bf16.mxu1 %v4772_v40  ;;  %v2123_v45 = vpop.permute.xlu1 %2122 }
 0x48b   : > { %2129 = vst.msk [vmem:[#allocation4 + $0x30] sm:$0x3] %vm2128_vm2, %v2123_v45  ;;  %v2121_v46 = vpop.permute.xlu0 %2120  ;;  %vm2182_vm2 = vcmask 1048528   ;;  %v4045_v45 = vld [vmem:[%s6297_s7 + $0xb8] sm:$0xff] }
 0x48c   : > { %2127 = vst.msk [vmem:[#allocation4 + $0x10] sm:$0xff] %vm2126_vm3, %v2121_v46  ;;  %vm2216_vm3 = vcmask 287920  }
 0x48d   : > { %2619 = vmatpush1.bf16.msra.mxu1 %v4770_v43 }
 0x48e   : > { %2620 = vmatprep.subr.bf16.mxu1 %v4775_v44  ;;  %v2137_v49 = vpop.permute.xlu1 %2136  ;;  %v4044_v44 = vld [vmem:[%s6297_s7 + $0xb0] sm:$0xff] }
 0x48f   : > { %2143 = vst.msk [vmem:[#allocation4 + $0x30] sm:$0x3] %vm2142_vm4, %v2137_v49  ;;  %v2135_v50 = vpop.permute.xlu0 %2134  ;;  %vm2214_vm4 = vcmask 294064   ;;  %v4481_v49 = vpack.c.bf16 %v4045_v45, %v4044_v44  ;;  %v4803_v44 = vld [vmem:[%s6299_s9 + $0x38] sm:$0xff]   ;;  %v4804_v45 = vld [vmem:[%s6299_s9 + $0x40] sm:$0xff]  }
 0x490   : > { %2141 = vst.msk [vmem:[#allocation4 + $0x10] sm:$0xff] %vm2140_vm6, %v2135_v50  ;;  %vm2564_vm6 = vcmask 1041408   ;;  %v4046_v50 = vld [vmem:[%s6297_s7 + $0xc0] sm:$0xff] }
 0x491   : > { %2621 = vmatpush1.bf16.msra.mxu1 %v4773_v47  ;;  %v2566_v13 = vsel %vm2564_vm6, %v4036_v10, 0 }
 0x492   : > { %2622 = vmatprep.subr.bf16.mxu1 %v4778_v48  ;;  %v2179_v53 = vpop.permute.xlu1 %2178 }
 0x493   : > { %2189 = vst.msk [vmem:[#allocation4 + $0x38] sm:$0x3] %vm2188_vm7, %v2179_v53  ;;  %v2177_v54 = vpop.permute.xlu0 %2176  ;;  %vm2560_vm7 = vcmask 293888  }
 0x494   : > { %2185 = vst.msk [vmem:[#allocation4 + $0x18] sm:$0xff] %vm2184_vm9, %v2177_v54 }
 0x495   : > { %2623 = vmatpush1.bf16.msra.mxu1 %v4776_v51  ;;  %v4047_v51 = vld [vmem:[%s6297_s7 + $0xc8] sm:$0xff] }
 0x496   : > { %2624 = vmatprep.subr.bf16.mxu1 %v4781_v52  ;;  %v2151_v57 = vpop.permute.xlu1 %2150 }
 0x497   : > { %2157 = vst.msk [vmem:[#allocation4 + $0x30] sm:$0x3] %vm2156_vm10, %v2151_v57  ;;  %v2149_v58 = vpop.permute.xlu0 %2148  ;;  %v4050_v57 = vld [vmem:[%s6297_s7 + $0xe0] sm:$0xff] }
 0x498   : > { %2155 = vst.msk [vmem:[#allocation4 + $0x10] sm:$0xff] %vm2154_vm11, %v2149_v58  ;;  %v4051_v58 = vld [vmem:[%s6297_s7 + $0xe8] sm:$0xff] }
 0x499   : > { %2625 = vmatpush1.bf16.msra.mxu1 %v4779_v55  ;;  %v4049_v55 = vld [vmem:[%s6297_s7 + $0xd8] sm:$0xff] }
 0x49a   : > { %2626 = vmatprep.subr.bf16.mxu1 %v4784_v56  ;;  %v2197_v61 = vpop.permute.xlu1 %2196 }
 0x49b   : > { %2203 = vst.msk [vmem:[#allocation4 + $0x38] sm:$0x3] %vm2202_vm12, %v2197_v61  ;;  %v2195_v62 = vpop.permute.xlu0 %2194  ;;  %v4053_v61 = vld [vmem:[%s6297_s7 + $0xf8] sm:$0xff] }
 0x49c   : > { %2201 = vst.msk [vmem:[#allocation4 + $0x18] sm:$0xff] %vm2200_vm13, %v2195_v62  ;;  %vm4938_vm13 = vmmov 0  }
 0x49d   : > { %2627 = vmatpush1.bf16.msra.mxu1 %v4782_v59  ;;  %v4490_v59 = vpack.c.bf16 %v4051_v58, %v4050_v57  ;;  %v4814_v57 = vld [vmem:[%s6299_s9 + $0x90] sm:$0xff]   ;;  %v4815_v58 = vld [vmem:[%s6299_s9 + $0x98] sm:$0xff]  }
 0x49e   : > { %2628 = vmatprep.subr.bf16.mxu1 %v4787_v60  ;;  %v2165_v1 = vpop.permute.xlu1 %2164  ;;  %v4052_v60 = vld [vmem:[%s6297_s7 + $0xf0] sm:$0xff] }
 0x49f   : > { %2171 = vst.msk [vmem:[#allocation4 + $0x30] sm:$0x3] %vm2170_vm14, %v2165_v1  ;;  %v2163_v2 = vpop.permute.xlu0 %2162  ;;  %v4493_v62 = vpack.c.bf16 %v4053_v61, %v4052_v60  ;;  %v4817_v61 = vld [vmem:[%s6299_s9 + $0xa8] sm:$0xff]  }
 0x4a0   : > { %2187 = vst.msk [vmem:[#allocation4 + $0x30] sm:$0x3] %vm2186_vm15, %v2179_v53  ;;  %v4484_v53 = vpack.c.bf16 %v4047_v51, %v4046_v50  ;;  %v4808_v50 = vld [vmem:[%s6299_s9 + $0x60] sm:$0xff]   ;;  %v4809_v51 = vld [vmem:[%s6299_s9 + $0x68] sm:$0xff]  }
 0x4a1   : > { %2169 = vst.msk [vmem:[#allocation4 + $0x10] sm:$0xff] %vm2168_vm1, %v2163_v2  ;;  %2629 = vmatpush1.bf16.msra.mxu1 %v4785_v63  ;;  %v4054_v63 = vld [vmem:[%s6297_s7 + $0x100] sm:$0xff]  ;;  %v4056_v2 = vld [vmem:[%s6297_s7 + $0x110] sm:$0xff] }
 0x4a2   : > { %2183 = vst.msk [vmem:[#allocation4 + $0x10] sm:$0xff] %vm2182_vm2, %v2177_v54  ;;  %2630 = vmatprep.subr.bf16.mxu1 %v4790_v0  ;;  %v2211_v5 = vpop.permute.xlu1 %2210  ;;  %v4048_v54 = vld [vmem:[%s6297_s7 + $0xd0] sm:$0xff]  ;;  %v4055_v0 = vld [vmem:[%s6297_s7 + $0x108] sm:$0xff] }
 0x4a3   : > { %2217 = vst.msk [vmem:[#allocation4 + $0x38] sm:$0x3] %vm2216_vm3, %v2211_v5  ;;  %v2209_v7 = vpop.permute.xlu0 %2208  ;;  %v4487_v56 = vpack.c.bf16 %v4049_v55, %v4048_v54  ;;  %v4496_v1 = vpack.c.bf16 %v4055_v0, %v4054_v63  ;;  %v4058_v5 = vld [vmem:[%s6297_s7 + $0x120] sm:$0xff]  ;;  %v4819_v63 = vld [vmem:[%s6299_s9 + $0xb8] sm:$0xff]  }
 0x4a4   : > { %2215 = vst.msk [vmem:[#allocation4 + $0x18] sm:$0xff] %vm2214_vm4, %v2209_v7  ;;  %v4502_v7 = vpack.c.bf16 %v4059_v6, %v4058_v5  ;;  %v4812_v55 = vld [vmem:[%s6299_s9 + $0x80] sm:$0xff]  }
 0x4a5   : > { %2631 = vmatpush1.bf16.msra.mxu1 %v4788_v3  ;;  %v4057_v3 = vld [vmem:[%s6297_s7 + $0x118] sm:$0xff]  ;;  %v4820_v0 = vld [vmem:[%s6299_s9 + $0xc0] sm:$0xff]  }
 0x4a6   : > { %2632 = vmatprep.subr.bf16.mxu1 %v4793_v4  ;;  %v4499_v4 = vpack.c.bf16 %v4057_v3, %v4056_v2  ;;  %v4827_v2 = vld [vmem:[%s6301_s11 + $0x30] sm:$0xff]   ;;  %v4828_v3 = vld [vmem:[%s6301_s11 + $0x38] sm:$0xff]  }
 0x4a7   : > { %v2224_v17 = vld [vmem:[#allocation4 + $0x30] sm:$0x3] }
 0x4a9   : > { %2633 = vmatpush1.bf16.msra.mxu1 %v4791_v8  ;;  %v2220_v16 = vld [vmem:[#allocation4 + $0x10] sm:$0xff]  ;;  %v4060_v8 = vld [vmem:[%s6297_s7 + $0x130] sm:$0xff] }
 0x4aa   : > { %4038 = vmatprep.subr.msk.bf16.mxu1 %vm2564_vm6, %v4037_v9  ;;  %v2225_v14 = vld [vmem:[#allocation4 + $0x38] sm:$0x3]  ;;  %v2228_v20 = vpack.c.bf16 %v2224_v17, %v2220_v16  ;;  %v4061_v9 = vld [vmem:[%s6297_s7 + $0x138] sm:$0xff] }
 0x4ab   : > { %v2221_v18 = vld [vmem:[#allocation4 + $0x18] sm:$0xff]  ;;  %v4505_v10 = vpack.c.bf16 %v4061_v9, %v4060_v8 }
 0x4ac   : > { %v2229_v19 = vpack.c.bf16 %v2225_v14, %v2221_v18 }
 0x4ad   : > { %2635 = vmatpush1.bf16.msra.mxu1 %v2566_v13 }
 0x4ae   : > { %4307 = vmatprep.subr.bf16.mxu1 %v4913_v28  ;;  %4039 = vmatprep.mubr.msk.bf16.mxu1 %vm2560_vm7, %v2229_v19 }
 0x4b0   : > { %2647 = vmatmul.mubr.bf16.vlgmr.msra.gmra.mrb[20].mxu1 %v2228_v20 }
 0x4b1   : > { %4323 = vmatprep.mubr.msk.bf16.mxu1 %vm4938_vm13, %v4913_v28 }
 0x583   : > { %v2648_v29 = vpop.f32.mrb[20].mxu1 }
 0x584   : > { %v4523_v30 = vadd.f32 %v2648_v29, %v2288_v26  ;;  %v2650_v11 = vpop.f32.mrb[21].mxu1  ;;  %v4800_v29 = vld [vmem:[%s6299_s9 + $0x20] sm:$0xff]  }
 0x585   : > { %v4524_v34 = vadd.f32 %v2650_v11, %v2292_v27  ;;  %v2652_v36 = vpop.f32.mrb[22].mxu1  ;;  %v4822_v11 = vld [vmem:[%s6301_s11 + $0x8] sm:$0xff]  }
 0x586   : > { %v2661_v39 = vmul.f32 0.01, %v4523_v30  ;;  %v4525_v40 = vadd.f32 %v2652_v36, %v2288_v26  ;;  %v2654_v41 = vpop.f32.mrb[23].mxu1  ;;  %vm2657_vm9 = vcmp.ge.f32.partialorder %v4523_v30, 0.0  ;;  %v4798_v26 = vld [vmem:[%s6299_s9 + $0x10] sm:$0xff]   ;;  %v4824_v36 = vld [vmem:[%s6301_s11 + $0x18] sm:$0xff]  }
 0x587   : > { %vm2658_vm10 = vcmp.ge.f32.partialorder %v4524_v34, 0.0  ;;  %v2662_v32 = vmul.f32 0.01, %v4524_v34  ;;  %v4526_v33 = vadd.f32 %v2654_v41, %v2292_v27  ;;  %v4799_v27 = vld [vmem:[%s6299_s9 + $0x18] sm:$0xff]  }
 0x588   : > { %v2665_v46 = vsel %vm2657_vm9, %v4523_v30, %v2661_v39  ;;  %v2663_v47 = vmul.f32 0.01, %v4525_v40  ;;  %vm2659_vm12 = vcmp.ge.f32.partialorder %v4525_v40, 0.0  ;;  %v4821_v30 = vld [vmem:[%s6301_s11] sm:$0xff]  }
 0x589   : > { %vm2660_vm11 = vcmp.ge.f32.partialorder %v4526_v33, 0.0  ;;  %v2664_v42 = vmul.f32 0.01, %v4526_v33  ;;  %v2666_v43 = vsel %vm2658_vm10, %v4524_v34, %v2662_v32  ;;  %4308 = vmatpush3.bf16.msra.mxu1 %v4821_v30  ;;  %v4823_v34 = vld [vmem:[%s6301_s11 + $0x10] sm:$0xff]   ;;  %v4838_v30 = vld [vmem:[%s6305_s15 + $0x8] sm:$0xff]  }
 0x58a   : > { %4040 = vmatprep.mubr.msk.f32.mxu0 %vm551_vm0, %v2666_v43  ;;  %v2667_v52 = vsel %vm2659_vm12, %v4525_v40, %v2663_v47  ;;  %4309 = vmatprep.subr.bf16.mxu1 %v4913_v28  ;;  %v4806_v47 = vld [vmem:[%s6299_s9 + $0x50] sm:$0xff]  }
 0x58b   : > { %2760 = vmatmul.mubr.f32.vlgmr.msra.gmra.mrb[8].mxu0 %v2665_v46  ;;  %v2668_v48 = vsel %vm2660_vm11, %v4526_v33, %v2664_v42 }
 0x58c   : > { %4479 = vmatpush1.bf16.msra.mxu0 %v4478_v35  ;;  %4041 = vmatprep.mubr.msk.f32.mxu0 %vm551_vm0, %v2668_v48  ;;  %v4801_v35 = vld [vmem:[%s6299_s9 + $0x28] sm:$0xff]  }
 0x58d   : > { %4480 = vmatprep.subr.bf16.mxu0 %v4912_v31  ;;  %4310 = vmatpush3.bf16.msra.mxu1 %v4822_v11  ;;  %v4839_v11 = vld [vmem:[%s6305_s15 + $0x10] sm:$0xff]  }
 0x58e   : > { %4311 = vmatprep.subr.bf16.mxu1 %v4913_v28 }
 0x58f   : > { %2765 = vmatmul.mubr.f32.gmra.mrb[10].mxu0 %v2667_v52 }
 0x590   : > { %4482 = vmatpush1.bf16.msra.mxu0 %v4481_v49  ;;  %4062 = vmatprep.mubr.msk.f32.mxu0 %vm551_vm0, %v2666_v43  ;;  %v4802_v43 = vld [vmem:[%s6299_s9 + $0x30] sm:$0xff]   ;;  %v4807_v49 = vld [vmem:[%s6299_s9 + $0x58] sm:$0xff]  }
 0x591   : > { %4483 = vmatprep.subr.bf16.mxu0 %v4912_v31  ;;  %4312 = vmatpush3.bf16.msra.mxu1 %v4823_v34  ;;  %v4840_v34 = vld [vmem:[%s6305_s15 + $0x18] sm:$0xff]  }
 0x592   : > { %4313 = vmatprep.subr.bf16.mxu1 %v4913_v28 }
 0x594   : > { %4485 = vmatpush1.bf16.msra.mxu0 %v4484_v53  ;;  %v4811_v53 = vld [vmem:[%s6299_s9 + $0x78] sm:$0xff]  }
 0x595   : > { %4486 = vmatprep.subr.bf16.mxu0 %v4912_v31  ;;  %4314 = vmatpush3.bf16.msra.mxu1 %v4824_v36  ;;  %v4841_v36 = vld [vmem:[%s6305_s15 + $0x20] sm:$0xff]  }
 0x596   : > { %4315 = vmatprep.subr.bf16.mxu1 %v4913_v28 }
 0x598   : > { %4488 = vmatpush1.bf16.msra.mxu0 %v4487_v56  ;;  %v4813_v56 = vld [vmem:[%s6299_s9 + $0x88] sm:$0xff]  }
 0x599   : > { %4489 = vmatprep.subr.bf16.mxu0 %v4912_v31  ;;  %4316 = vmatpush3.bf16.msra.mxu1 %v4825_v37  ;;  %v4842_v37 = vld [vmem:[%s6305_s15 + $0x28] sm:$0xff]  }
 0x59a   : > { %4317 = vmatprep.subr.bf16.mxu1 %v4913_v28 }
 0x59c   : > { %4491 = vmatpush1.bf16.msra.mxu0 %v4490_v59  ;;  %v4816_v59 = vld [vmem:[%s6299_s9 + $0xa0] sm:$0xff]  }
 0x59d   : > { %4492 = vmatprep.subr.bf16.mxu0 %v4912_v31  ;;  %4318 = vmatpush3.bf16.msra.mxu1 %v4826_v38  ;;  %v4843_v38 = vld [vmem:[%s6305_s15 + $0x30] sm:$0xff]  }
 0x59e   : > { %4319 = vmatprep.subr.bf16.mxu1 %v4913_v28 }
 0x5a0   : > { %4494 = vmatpush1.bf16.msra.mxu0 %v4493_v62  ;;  %v4818_v62 = vld [vmem:[%s6299_s9 + $0xb0] sm:$0xff]  }
 0x5a1   : > { %4495 = vmatprep.subr.bf16.mxu0 %v4912_v31  ;;  %4320 = vmatpush3.bf16.msra.mxu1 %v4827_v2 }
 0x5a2   : > { %4321 = vmatprep.subr.bf16.mxu1 %v4913_v28 }
 0x5a4   : > { %4497 = vmatpush1.bf16.msra.mxu0 %v4496_v1 }
 0x5a5   : > { %4498 = vmatprep.subr.bf16.mxu0 %v4912_v31  ;;  %4322 = vmatpush3.bf16.msra.mxu1 %v4828_v3 }
 0x5a6   : > { %4327 = vmatprep.subr.bf16.mxu1 %v4913_v28 }
 0x5a8   : > { %4500 = vmatpush1.bf16.msra.mxu0 %v4499_v4  ;;  %v3021_v4 = vld [vmem:[%s6300_s10] sm:$0x1] }
 0x5a9   : > { %4501 = vmatprep.subr.bf16.mxu0 %v4912_v31 }
 0x5ac   : > { %4503 = vmatpush1.bf16.msra.mxu0 %v4502_v7 }
 0x5ad   : > { %4504 = vmatprep.subr.bf16.mxu0 %v4912_v31 }
 0x5b0   : > { %4506 = vmatpush1.bf16.msra.mxu0 %v4505_v10 }
 0x5b1   : > { %4507 = vmatprep.subr.bf16.mxu0 %v4912_v31 }
 0x5b3   : > { %2856 = vmatmul.mubr.f32.vlgmr.msra.gmra.mrb[12].mxu0 %v2665_v46  ;;  %v4805_v46 = vld [vmem:[%s6299_s9 + $0x48] sm:$0xff]  }
 0x5b4   : > { %4063 = vmatprep.mubr.msk.f32.mxu0 %vm551_vm0, %v2668_v48  ;;  %vm4509_vm0 = vmpackc.low %vm2564_vm6, %vm4914_vm5  ;;  %vm3063_vm5 = vcmask 654336  }
 0x5b7   : > { %2861 = vmatmul.mubr.f32.gmra.mrb[14].mxu0 %v2667_v52  ;;  %v4810_v52 = vld [vmem:[%s6299_s9 + $0x70] sm:$0xff]  }
 0x5b8   : > { %4227 = vmatprep.mubr.msk.f32.mxu0 %vm4938_vm13, %v4913_v28 }
 0x65e   : > { %v2761_v13 = vpop.f32.mrb[8].mxu0 }
 0x65f   : > { %v2763_v14 = vpop.f32.mrb[9].mxu0 }
 0x662   : > { %v2766_v16 = vpop.f32.mrb[10].mxu0 }
 0x663   : > { %v2768_v17 = vpop.f32.mrb[11].mxu0 }
 0x664   : > { %v4831_v17 = vld [vmem:[%s6303_s13 + $0x10] sm:$0xff]  }
 0x686   : > { %v2857_v18 = vpop.f32.mrb[12].mxu0 }
 0x687   : > { %v2866_v19 = vmax.f32 %v2761_v13, %v2857_v18  ;;  %v2859_v20 = vpop.f32.mrb[13].mxu0  ;;  %v4829_v13 = vld [vmem:[%s6303_s13] sm:$0xff]   ;;  %v4832_v18 = vld [vmem:[%s6303_s13 + $0x18] sm:$0xff]  }
 0x688   : > { %v4834_v20 = vld [vmem:[%s6303_s13 + $0x28] sm:$0xff]  }
 0x68a   : > { %v2862_v21 = vpop.f32.mrb[14].mxu0 }
 0x68b   : > { %v2867_v22 = vmax.f32 %v2766_v16, %v2862_v21  ;;  %v2864_v23 = vpop.f32.mrb[15].mxu0  ;;  %v4830_v16 = vld [vmem:[%s6303_s13 + $0x8] sm:$0xff]   ;;  %v4835_v21 = vld [vmem:[%s6303_s13 + $0x30] sm:$0xff]  }
 0x68c   : > { %v3468_v23 = vld [vmem:[%s6302_s12] sm:$0x1] }
 0x68d   : > { %v4508_v12 = vpack.c.bf16 %v2867_v22, %v2866_v19  ;;  %v4833_v19 = vld [vmem:[%s6303_s13 + $0x20] sm:$0xff]   ;;  %v4836_v22 = vld [vmem:[%s6303_s13 + $0x38] sm:$0xff]  }
 0x68f   : > { %4510 = vmatpush3.bf16.msk.msra.mxu0 %vm4509_vm0, %v4508_v12 }
 0x690   : > { %4511 = vmatprep.subr.bf16.mxu0 %v4912_v31  ;;  %v4797_v31 = vld [vmem:[%s6299_s9 + $0x8] sm:$0xff]  }
 0x692   : > { %4228 = vmatmul.mubr.msk.f32.vlgmr.msra.gmra.mrb[16].mxu0 %vm2054_vm8, %v2868_v24 }
 0x693   : > { %4514 = vmatpush3.bf16.msk.msra.mxu0 %vm4509_vm0, %v4508_v12  ;;  %4234 = vmatprep.mubr.msk.f32.mxu0 %vm4938_vm13, %v4913_v28 }
 0x694   : > { %4237 = vmatprep.subr.bf16.mxu0 %v4913_v28 }
 0x696   : > { %4235 = vmatmul.mubr.msk.f32.vlgmr.msra.gmra.mrb[18].mxu0 %vm2054_vm8, %v4066_v15 }
 0x697   : > { %4238 = vmatpush3.bf16.msra.mxu0 %v4796_v25  ;;  %4247 = vmatprep.mubr.msk.bf16.mxu0 %vm4938_vm13, %v4913_v28 }
 0x698   : > { %4239 = vmatprep.subr.bf16.mxu0 %v4913_v28 }
 0x69b   : > { %4240 = vmatpush3.bf16.msra.mxu0 %v4797_v31 }
 0x69c   : > { %4241 = vmatprep.subr.bf16.mxu0 %v4913_v28 }
 0x69f   : > { %4242 = vmatpush3.bf16.msra.mxu0 %v4798_v26 }
 0x6a0   : > { %4243 = vmatprep.subr.bf16.mxu0 %v4913_v28 }
 0x6a3   : > { %4244 = vmatpush3.bf16.msra.mxu0 %v4799_v27  ;;  %v4837_v27 = vld [vmem:[%s6305_s15] sm:$0xff]  }
 0x6a4   : > { %4245 = vmatprep.subr.bf16.mxu0 %v4913_v28 }
 0x6a7   : > { %4246 = vmatpush3.bf16.msra.mxu0 %v4800_v29 }
 0x6a8   : > { %4251 = vmatprep.subr.bf16.mxu0 %v4913_v28 }
 0x765   : > { %v2941_v39 = vpop.f32.mrb[16].mxu0 }
 0x766   : > { %v4229_v40 = vpop.f32.mrb[17].mxu0 }
 0x767   : > { %v3575_v40 = vld [vmem:[%s6304_s14] sm:$0x1] }
 0x769   : > { %v3016_v41 = vpop.f32.mrb[18].mxu0 }
 0x76a   : > { %v3020_v32 = vmax.f32 %v2941_v39, %v3016_v41  ;;  %v4236_v33 = vpop.f32.mrb[19].mxu0  ;;  %v4844_v39 = vld [vmem:[%s6305_s15 + $0x38] sm:$0xff]  }
 0x76c   : > { %v6061_v42 = vpack.c.bf16 %v3020_v32, %v3020_v32 }
 0x76e   : > { %4248 = vmatmul.mubr.msk.bf16.vlgmr.msra.gmra.mrb[20].mxu0 %vm3063_vm5, %v6061_v42  ;;  %v3118_v48 = vshrl.u32 %v6061_v42, 16  ;;  %v3205_v54 = vrot.slane %v6061_v42, 1  ;;  %v3375_v1 = vrot.slane %v6061_v42, 2 }
 0x76f   : > { %4252 = vmatpush3.bf16.msra.mxu0 %v4801_v35  ;;  %4261 = vmatprep.mubr.msk.bf16.mxu0 %vm4938_vm13, %v4913_v28 }
 0x770   : > { %4253 = vmatprep.subr.bf16.mxu0 %v4913_v28  ;;  %v3290_v60 = vrot.slane %v3118_v48, 1 }
 0x773   : > { %4254 = vmatpush3.bf16.msra.mxu0 %v4802_v43 }
 0x774   : > { %4255 = vmatprep.subr.bf16.mxu0 %v4913_v28 }
 0x777   : > { %4256 = vmatpush3.bf16.msra.mxu0 %v4803_v44 }
 0x778   : > { %4257 = vmatprep.subr.bf16.mxu0 %v4913_v28 }
 0x77b   : > { %4258 = vmatpush3.bf16.msra.mxu0 %v4804_v45  ;;  %v3682_v45 = vld [vmem:[%s6306_s16] sm:$0x1] }
 0x77c   : > { %4259 = vmatprep.subr.bf16.mxu0 %v4913_v28 }
 0x77f   : > { %4260 = vmatpush3.bf16.msra.mxu0 %v4805_v46 }
 0x780   : > { %4265 = vmatprep.subr.bf16.mxu0 %v4913_v28 }
 0x782   : > { %4262 = vmatmul.mubr.msk.bf16.vlgmr.msra.gmra.mrb[20].mxu0 %vm3063_vm5, %v3118_v48 }
 0x783   : > { %4266 = vmatpush3.bf16.msra.mxu0 %v4806_v47  ;;  %4275 = vmatprep.mubr.msk.bf16.mxu0 %vm4938_vm13, %v4913_v28 }
 0x784   : > { %4267 = vmatprep.subr.bf16.mxu0 %v4913_v28 }
 0x787   : > { %4268 = vmatpush3.bf16.msra.mxu0 %v4807_v49 }
 0x788   : > { %4269 = vmatprep.subr.bf16.mxu0 %v4913_v28 }
 0x78b   : > { %4270 = vmatpush3.bf16.msra.mxu0 %v4808_v50 }
 0x78c   : > { %4271 = vmatprep.subr.bf16.mxu0 %v4913_v28 }
 0x78f   : > { %4272 = vmatpush3.bf16.msra.mxu0 %v4809_v51 }
 0x790   : > { %4273 = vmatprep.subr.bf16.mxu0 %v4913_v28 }
 0x793   : > { %4274 = vmatpush3.bf16.msra.mxu0 %v4810_v52 }
 0x794   : > { %4279 = vmatprep.subr.bf16.mxu0 %v4913_v28 }
 0x796   : > { %4276 = vmatmul.mubr.msk.bf16.vlgmr.msra.gmra.mrb[20].mxu0 %vm3063_vm5, %v3205_v54 }
 0x797   : > { %4280 = vmatpush3.bf16.msra.mxu0 %v4811_v53  ;;  %4289 = vmatprep.mubr.msk.bf16.mxu0 %vm4938_vm13, %v4913_v28 }
 0x798   : > { %4281 = vmatprep.subr.bf16.mxu0 %v4913_v28 }
 0x79b   : > { %4282 = vmatpush3.bf16.msra.mxu0 %v4812_v55 }
 0x79c   : > { %4283 = vmatprep.subr.bf16.mxu0 %v4913_v28 }
 0x79f   : > { %4284 = vmatpush3.bf16.msra.mxu0 %v4813_v56 }
 0x7a0   : > { %4285 = vmatprep.subr.bf16.mxu0 %v4913_v28 }
 0x7a3   : > { %4286 = vmatpush3.bf16.msra.mxu0 %v4814_v57 }
 0x7a4   : > { %4287 = vmatprep.subr.bf16.mxu0 %v4913_v28 }
 0x7a7   : > { %4288 = vmatpush3.bf16.msra.mxu0 %v4815_v58 }
 0x7a8   : > { %4293 = vmatprep.subr.bf16.mxu0 %v4913_v28 }
 0x7aa   : > { %4290 = vmatmul.mubr.msk.bf16.vlgmr.msra.gmra.mrb[20].mxu0 %vm3063_vm5, %v3290_v60 }
 0x7ab   : > { %4294 = vmatpush3.bf16.msra.mxu0 %v4816_v59  ;;  %4303 = vmatprep.mubr.msk.bf16.mxu0 %vm4938_vm13, %v4913_v28 }
 0x7ac   : > { %4295 = vmatprep.subr.bf16.mxu0 %v4913_v28 }
 0x7af   : > { %4296 = vmatpush3.bf16.msra.mxu0 %v4817_v61 }
 0x7b0   : > { %4297 = vmatprep.subr.bf16.mxu0 %v4913_v28 }
 0x7b3   : > { %4298 = vmatpush3.bf16.msra.mxu0 %v4818_v62 }
 0x7b4   : > { %4299 = vmatprep.subr.bf16.mxu0 %v4913_v28 }
 0x7b7   : > { %4300 = vmatpush3.bf16.msra.mxu0 %v4819_v63 }
 0x7b8   : > { %4301 = vmatprep.subr.bf16.mxu0 %v4913_v28 }
 0x7bb   : > { %4302 = vmatpush3.bf16.msra.mxu0 %v4820_v0 }
 0x7be   : > { %4304 = vmatmul.mubr.msk.bf16.vlgmr.msra.gmra.mrb[20].mxu0 %vm3063_vm5, %v3375_v1 }
 0x891   : > { %v3443_v5 = vpop.f32.mrb[20].mxu0 }
 0x892   : > { %v4527_v6 = vadd.f32 %v3443_v5, %v3021_v4  ;;  %v4305_v7 = vpop.f32.mrb[21].mxu0 }
 0x893   : > { %v3446_v8 = vpop.f32.mrb[22].mxu0 }
 0x894   : > { %v3450_v9 = vmax.f32 %v4527_v6, 0.0  ;;  %v4306_v10 = vpop.f32.mrb[23].mxu0 }
 0x896   : > { %v3451_v14 = vpack.c.bf16 %v3450_v9, %v3450_v9 }
 0x898   : > { %4324 = vmatmul.mubr.bf16.vlgmr.msra.gmra.mrb[24].mxu1 %v3451_v14 }
 0x899   : > { %4328 = vmatpush3.bf16.msra.mxu1 %v4829_v13  ;;  %4343 = vmatprep.mubr.msk.bf16.mxu1 %vm4938_vm13, %v4913_v28 }
 0x89a   : > { %4329 = vmatprep.subr.bf16.mxu1 %v4913_v28 }
 0x89d   : > { %4330 = vmatpush3.bf16.msra.mxu1 %v4830_v16 }
 0x89e   : > { %4331 = vmatprep.subr.bf16.mxu1 %v4913_v28 }
 0x8a1   : > { %4332 = vmatpush3.bf16.msra.mxu1 %v4831_v17 }
 0x8a2   : > { %4333 = vmatprep.subr.bf16.mxu1 %v4913_v28 }
 0x8a5   : > { %4334 = vmatpush3.bf16.msra.mxu1 %v4832_v18 }
 0x8a6   : > { %4335 = vmatprep.subr.bf16.mxu1 %v4913_v28 }
 0x8a9   : > { %4336 = vmatpush3.bf16.msra.mxu1 %v4833_v19 }
 0x8aa   : > { %4337 = vmatprep.subr.bf16.mxu1 %v4913_v28 }
 0x8ad   : > { %4338 = vmatpush3.bf16.msra.mxu1 %v4834_v20 }
 0x8ae   : > { %4339 = vmatprep.subr.bf16.mxu1 %v4913_v28 }
 0x8b1   : > { %4340 = vmatpush3.bf16.msra.mxu1 %v4835_v21 }
 0x8b2   : > { %4341 = vmatprep.subr.bf16.mxu1 %v4913_v28 }
 0x8b5   : > { %4342 = vmatpush3.bf16.msra.mxu1 %v4836_v22 }
 0x8b6   : > { %4347 = vmatprep.subr.bf16.mxu1 %v4913_v28 }
 0x96b   : > { %v3551_v12 = vpop.f32.mrb[24].mxu1 }
 0x96c   : > { %v3552_v24 = vadd.f32 %v3551_v12, %v3468_v23  ;;  %v4325_v15 = vpop.f32.mrb[25].mxu1 }
 0x96d   : > { %v3554_v25 = vpop.f32.mrb[26].mxu1 }
 0x96e   : > { %v3557_v31 = vmax.f32 %v3552_v24, 0.0  ;;  %v4326_v26 = vpop.f32.mrb[27].mxu1 }
 0x970   : > { %v3558_v29 = vpack.c.bf16 %v3557_v31, %v3557_v31 }
 0x972   : > { %4344 = vmatmul.mubr.bf16.vlgmr.msra.gmra.mrb[28].mxu1 %v3558_v29 }
 0x973   : > { %4348 = vmatpush3.bf16.msra.mxu1 %v4837_v27  ;;  %4363 = vmatprep.mubr.msk.bf16.mxu1 %vm4938_vm13, %v4913_v28 }
 0x974   : > { %4349 = vmatprep.subr.bf16.mxu1 %v4913_v28 }
 0x977   : > { %4350 = vmatpush3.bf16.msra.mxu1 %v4838_v30 }
 0x978   : > { %4351 = vmatprep.subr.bf16.mxu1 %v4913_v28 }
 0x97b   : > { %4352 = vmatpush3.bf16.msra.mxu1 %v4839_v11 }
 0x97c   : > { %4353 = vmatprep.subr.bf16.mxu1 %v4913_v28 }
 0x97f   : > { %4354 = vmatpush3.bf16.msra.mxu1 %v4840_v34 }
 0x980   : > { %4355 = vmatprep.subr.bf16.mxu1 %v4913_v28 }
 0x983   : > { %4356 = vmatpush3.bf16.msra.mxu1 %v4841_v36 }
 0x984   : > { %4357 = vmatprep.subr.bf16.mxu1 %v4913_v28 }
 0x987   : > { %4358 = vmatpush3.bf16.msra.mxu1 %v4842_v37 }
 0x988   : > { %4359 = vmatprep.subr.bf16.mxu1 %v4913_v28 }
 0x98b   : > { %4360 = vmatpush3.bf16.msra.mxu1 %v4843_v38 }
 0x98c   : > { %4361 = vmatprep.subr.bf16.mxu1 %v4913_v28 }
 0x98f   : > { %4362 = vmatpush3.bf16.msra.mxu1 %v4844_v39 }
 0xa45   : > { %v3658_v41 = vpop.f32.mrb[28].mxu1 }
 0xa46   : > { %v3659_v32 = vadd.f32 %v3658_v41, %v3575_v40  ;;  %v4345_v33 = vpop.f32.mrb[29].mxu1 }
 0xa47   : > { %v3661_v35 = vpop.f32.mrb[30].mxu1 }
 0xa48   : > { %v3664_v42 = vmax.f32 %v3659_v32, 0.0  ;;  %v4346_v43 = vpop.f32.mrb[31].mxu1 }
 0xa4a   : > { %v3665_v44 = vpack.c.bf16 %v3664_v42, %v3664_v42 }
 0xa4c   : > { %4364 = vmatmul.mubr.bf16.vlgmr.msra.gmra.mrb[32].mxu1 %v3665_v44 }
 0xb1f   : > { %v3765_v28 = vpop.f32.mrb[32].mxu1 }
 0xb20   : > { %v3766_v46 = vadd.f32 %v3765_v28, %v3682_v45  ;;  %v4365_v47 = vpop.f32.mrb[33].mxu1 }
 0xb21   : > { %v3768_v48 = vpop.f32.mrb[34].mxu1 }
 0xb22   : > { %3771 = vst [vmem:[%s540_s30] sm:$0x1] %v3766_v46  ;;  %v4366_v49 = vpop.f32.mrb[35].mxu1 }
 0xb23   : > { %4858 = shalt.err (!%p4855_p3)
}
 0xb24   : > { %s4859_s17 = scalar_lea.hbm %s6248_s20, 16  ;;  %s4863_s24 = scalar_lea.hbm %s6330_s22, 32 }
 0xb25   : > { %p4860_p4 = scmp.ne.s32.totalorder %s6248_s20, %s4859_s17  ;;  %p4864_p9 = scmp.lt.u32.totalorder %s6248_s20, %s6330_s22 }
 0xb26   : > { %p4865_p10 = scmp.lt.u32.totalorder %s4863_s24, %s4859_s17  ;;  %p4867_p12 = scmp.lt.u32.totalorder %s4859_s17, %s6248_s20 }
 0xb27   : > { %p4861_p7 = pnand %p4860_p4, %p5068_p5 }
 0xb28   : > { %p4866_p11 = por %p4865_p10, %p4864_p9 }
 0xb29   : > { %p4862_p8 = pneg %p4861_p7 }
 0xb2a   : > { %p4868_p13 = por %p4867_p12, %p4866_p11 }
 0xb2c   : > { %p4869_p0 = pnand %p4868_p13, %p4862_p8 }
 0xb2e   : > { %4872 = shalt.err (!%p4869_p0)
}
 0xb2f   : > { %4557 = dma.vmem_to_hbm [thread:$0]  (%p5068_p5), %s6250_s0, 16, %s6248_s20, %s3773_s21  }
 0xb30 PF: > { %s6331_s28 = sld [smem:[#allocation10_spill]]  ;;  %s6332_s29 = sld [smem:[#allocation8_spill]] }
 0xb36   : > { %p4563_p1 = scmp.ge.s32.totalorder %s6331_s28, 2  ;;  %s3797_s19 = sand.u32 1, %s6332_s29  }
 0xb37   : > { %s3798_s30 = scalar_lea.sflag [#allocation6], %s3797_s19 }
 0xb38   : > { %p4560_p2 = pnand %p4563_p1, %p5072_p6 }
 0xb3a   : > { %4890 = dma.done.wait (!%p4560_p2), %s3798_s30, 16  }
 0xb3b   : > { %4892 = vsyncadd (!%p4560_p2), %s3798_s30, 4294967280  ;;  %s6334_s27 = sld [smem:[#allocation11_spill]]  ;;  %s6335_s17 = sld [smem:[#allocation9_spill]] }
 0xb3c   : > { %s6336_s26 = sld [smem:[#allocation12_spill]]  ;;  %s6337_s24 = smov %s4899_s25 }
 0xb41   : > { %p27_p3 = scmp.ge.s32.totalorder %s6334_s27, 4   ;;  %s6338_s25 = smov %s6335_s17 }
 0xb43   :  { %29 = sbr.rel (!%p27_p3) target bundleno = 7 (0x7), region = 129 }
 0xb4a   :  { %3802 = vsyncpa [#allocation6], 1 }
 0xb4b   :  { %3804 = vsyncpa [#allocation6 + $0x1], 1 }

</bundles_post_ra>
